<compile_context>
chip_gen: v7x
topology: tpu7x:2x2x1
jax: 0.10.0
libtpu: 0.0.40
codegen_flags: <defaults>
</compile_context>

<pallas_src>
import jax
import jax.numpy as jnp
from jax.experimental import pallas as pl
from jax.experimental.pallas import tpu as pltpu

_EPS = 1e-5


# ----------------------------- in-kernel helpers -----------------------------

def _gelu_exact(x):
    # Exact (erf-based) GELU, matching torch.nn.GELU() default.  erf uses the
    # Abramowitz-Stegun 7.1.26 rational approximation (|err| < 1.5e-7) so only
    # exp / div / mul are needed (all supported on VPU/EUP).
    a1, a2, a3, a4, a5 = (0.254829592, -0.284496736, 1.421413741,
                          -1.453152027, 1.061405429)
    p = 0.3275911
    z = x * 0.7071067811865476           # x / sqrt(2)
    sgn = jnp.where(z < 0.0, -1.0, 1.0)
    az = jnp.abs(z)
    t = 1.0 / (1.0 + p * az)
    poly = ((((a5 * t + a4) * t + a3) * t + a2) * t + a1) * t
    erf = sgn * (1.0 - poly * jnp.exp(-az * az))
    return 0.5 * x * (1.0 + erf)


# ----------------------------- fused kernels -----------------------------

def _repvit_s1_kernel(x_ref, wdw_ref, bdw_ref, w1_ref, b1_ref, w2_ref, b2_ref,
                      o_ref, xp_ref):
    # One batch element per grid step; every intermediate stays in VMEM.
    _, H, W, C = o_ref.shape

    # ---- token mixer: RepVGGDW folded to a single depthwise 3x3 conv ----
    # In-kernel zero padding (halo) instead of jnp.pad through HBM.
    xp_ref[...] = jnp.zeros(xp_ref.shape, xp_ref.dtype)
    xp_ref[1:H + 1, 1:W + 1, :] = x_ref[0].astype(jnp.float32)

    acc = jnp.zeros((H, W, C), jnp.float32)
    for dy in range(3):
        for dx in range(3):
            acc = acc + xp_ref[dy:dy + H, dx:dx + W, :] * wdw_ref[dy * 3 + dx]
    y = (acc + bdw_ref[0]).reshape(H * W, C)          # token-mixer output
    # TODO(synk): SqueezeExcite branch (use_se=1) not implemented; the module
    # here is built with use_se=0 -> nn.Identity().

    # ---- channel mixer: 1x1 -> GELU -> 1x1, residual add (all in VMEM) ----
    h = jnp.dot(y, w1_ref[...], preferred_element_type=jnp.float32) + b1_ref[...]
    h = _gelu_exact(h)
    z = jnp.dot(h, w2_ref[...], preferred_element_type=jnp.float32) + b2_ref[...]
    o_ref[...] = (y + z).reshape(1, H, W, C).astype(o_ref.dtype)


# Tap -> (row/col parity plane, padded offset) mapping for the stride-2 DW conv.
# Output (i, j), tap dy reads input row 2i + dy - 1:
#   dy=0 -> odd rows,  plane row i-1 (padded idx i)   -> (parity 1, offset 0)
#   dy=1 -> even rows, plane row i   (padded idx i+1) -> (parity 0, offset 1)
#   dy=2 -> odd rows,  plane row i   (padded idx i+1) -> (parity 1, offset 1)
_S2_TAP = {0: (1, 0), 1: (0, 1), 2: (1, 1)}


def _repvit_s2_kernel(xs_ref, wdw_ref, bdw_ref, wp_ref, bp_ref,
                      w1_ref, b1_ref, w2_ref, b2_ref, o_ref, pp_ref):
    _, Ho, Wo, Co = o_ref.shape
    Ci = wdw_ref.shape[1]

    # ---- token mixer: depthwise 3x3 stride-2 conv (BN folded) ----
    # xs holds the 4 input parity planes packed along channels; pad them by one
    # row/col at the top/left inside VMEM so every tap is a contiguous slice.
    pp_ref[...] = jnp.zeros(pp_ref.shape, pp_ref.dtype)
    pp_ref[1:, 1:, :] = xs_ref[0].astype(jnp.float32)

    acc = jnp.zeros((Ho, Wo, Ci), jnp.float32)
    for dy in range(3):
        p, oy = _S2_TAP[dy]
        for dx in range(3):
            q, ox = _S2_TAP[dx]
            g = p * 2 + q
            acc = acc + (pp_ref[oy:oy + Ho, ox:ox + Wo, g * Ci:(g + 1) * Ci]
                         * wdw_ref[dy * 3 + dx])
    t0 = (acc + bdw_ref[0]).reshape(Ho * Wo, Ci)
    # pointwise Conv2d_BN (folded), no activation
    t = jnp.dot(t0, wp_ref[...], preferred_element_type=jnp.float32) + bp_ref[...]
    # TODO(synk): SqueezeExcite branch (use_se=1) not implemented (use_se=0).

    # ---- channel mixer: 1x1 -> GELU -> 1x1, residual add ----
    h = jnp.dot(t, w1_ref[...], preferred_element_type=jnp.float32) + b1_ref[...]
    h = _gelu_exact(h)
    z = jnp.dot(h, w2_ref[...], preferred_element_type=jnp.float32) + b2_ref[...]
    o_ref[...] = (t + z).reshape(1, Ho, Wo, Co).astype(o_ref.dtype)


# ----------------------------- pallas_call wrappers -----------------------------

@jax.jit
def repvit_block_s1(x, p):
    """RepViTBlock stride=1 (identity path).  x: (N, H, W, C) NHWC, folded params."""
    N, H, W, C = x.shape
    hid = p["w1"].shape[1]
    return pl.pallas_call(
        _repvit_s1_kernel,
        out_shape=jax.ShapeDtypeStruct((N, H, W, C), x.dtype),
        grid=(N,),
        in_specs=[
            pl.BlockSpec((1, H, W, C), lambda n: (n, 0, 0, 0)),
            pl.BlockSpec((9, C), lambda n: (0, 0)),
            pl.BlockSpec((1, C), lambda n: (0, 0)),
            pl.BlockSpec((C, hid), lambda n: (0, 0)),
            pl.BlockSpec((1, hid), lambda n: (0, 0)),
            pl.BlockSpec((hid, C), lambda n: (0, 0)),
            pl.BlockSpec((1, C), lambda n: (0, 0)),
        ],
        out_specs=pl.BlockSpec((1, H, W, C), lambda n: (n, 0, 0, 0)),
        scratch_shapes=[pltpu.VMEM((H + 2, W + 2, C), jnp.float32)],
        compiler_params=pltpu.CompilerParams(dimension_semantics=("parallel",)),
    )(x, p["wdw"], p["bdw"].reshape(1, C),
      p["w1"], p["b1"].reshape(1, hid),
      p["w2"], p["b2"].reshape(1, C))


@jax.jit
def repvit_block_s2(x, p):
    """RepViTBlock stride=2 (downsampling path).  x: (N, H, W, Ci) NHWC."""
    N, H, W, Ci = x.shape
    Ho, Wo = H // 2, W // 2
    Co = p["wp"].shape[1]
    hid = p["w1"].shape[1]
    # Space-to-batch parity split: xs[n,i,j,(p*2+q)*Ci+c] = x[n,2i+p,2j+q,c].
    xs = (x.reshape(N, Ho, 2, Wo, 2, Ci)
           .transpose(0, 1, 3, 2, 4, 5)
           .reshape(N, Ho, Wo, 4 * Ci))
    return pl.pallas_call(
        _repvit_s2_kernel,
        out_shape=jax.ShapeDtypeStruct((N, Ho, Wo, Co), x.dtype),
        grid=(N,),
        in_specs=[
            pl.BlockSpec((1, Ho, Wo, 4 * Ci), lambda n: (n, 0, 0, 0)),
            pl.BlockSpec((9, Ci), lambda n: (0, 0)),
            pl.BlockSpec((1, Ci), lambda n: (0, 0)),
            pl.BlockSpec((Ci, Co), lambda n: (0, 0)),
            pl.BlockSpec((1, Co), lambda n: (0, 0)),
            pl.BlockSpec((Co, hid), lambda n: (0, 0)),
            pl.BlockSpec((1, hid), lambda n: (0, 0)),
            pl.BlockSpec((hid, Co), lambda n: (0, 0)),
            pl.BlockSpec((1, Co), lambda n: (0, 0)),
        ],
        out_specs=pl.BlockSpec((1, Ho, Wo, Co), lambda n: (n, 0, 0, 0)),
        scratch_shapes=[pltpu.VMEM((Ho + 1, Wo + 1, 4 * Ci), jnp.float32)],
        compiler_params=pltpu.CompilerParams(dimension_semantics=("parallel",)),
    )(xs, p["wdw"], p["bdw"].reshape(1, Ci),
      p["wp"], p["bp"].reshape(1, Co),
      p["w1"], p["b1"].reshape(1, hid),
      p["w2"], p["b2"].reshape(1, Co))


# ----------------------------- BN folding (eval mode) -----------------------------

def _fold_conv_bn(w, bn):
    """Conv2d_BN fold: w's last axis is Cout; bn = (gamma, beta, mean, var)."""
    g, b, m, v = bn
    s = g / jnp.sqrt(v + _EPS)
    return w * s, b - m * s


def _fold_repvggdw(raw):
    """RepVGGDW: bn(conv3x3_bn(x) + conv1x1_dw(x) + x) -> one DW 3x3 conv."""
    w3, b3 = _fold_conv_bn(raw["w3"], raw["bn3"])          # (3,3,C), (C,)
    wsum = w3.at[1, 1].add(raw["w1"] + 1.0)                # + 1x1 dw conv + identity
    bsum = b3 + raw["b1"]
    g, b, m, v = raw["bno"]
    s = g / jnp.sqrt(v + _EPS)
    return wsum * s, b + (bsum - m) * s


# ----------------------------- parameter setup (deterministic) -----------------------------

def _bn_init(key, c):
    k1, k2, k3, k4 = jax.random.split(key, 4)
    return (1.0 + 0.1 * jax.random.normal(k1, (c,), jnp.float32),   # gamma
            0.1 * jax.random.normal(k2, (c,), jnp.float32),         # beta
            0.1 * jax.random.normal(k3, (c,), jnp.float32),         # running_mean
            0.5 + jax.random.uniform(k4, (c,), jnp.float32))        # running_var


def init_raw_params_s1(key, c, hidden):
    ks = jax.random.split(key, 9)
    return {
        "w3": 0.3 * jax.random.normal(ks[0], (3, 3, c), jnp.float32),
        "bn3": _bn_init(ks[1], c),
        "w1": 0.3 * jax.random.normal(ks[2], (c,), jnp.float32),
        "b1": 0.1 * jax.random.normal(ks[3], (c,), jnp.float32),
        "bno": _bn_init(ks[4], c),
        "wcm1": 0.2 * jax.random.normal(ks[5], (c, hidden), jnp.float32),
        "bncm1": _bn_init(ks[6], hidden),
        "wcm2": 0.2 * jax.random.normal(ks[7], (hidden, c), jnp.float32),
        "bncm2": _bn_init(ks[8], c),
    }


def fold_params_s1(raw):
    wdw, bdw = _fold_repvggdw(raw)
    w1, b1 = _fold_conv_bn(raw["wcm1"], raw["bncm1"])
    w2, b2 = _fold_conv_bn(raw["wcm2"], raw["bncm2"])
    c = bdw.shape[0]
    return {"wdw": wdw.reshape(9, c), "bdw": bdw,
            "w1": w1, "b1": b1, "w2": w2, "b2": b2}


def init_raw_params_s2(key, ci, co):
    ks = jax.random.split(key, 8)
    return {
        "wdw": 0.3 * jax.random.normal(ks[0], (3, 3, ci), jnp.float32),
        "bndw": _bn_init(ks[1], ci),
        "wpw": 0.2 * jax.random.normal(ks[2], (ci, co), jnp.float32),
        "bnpw": _bn_init(ks[3], co),
        "wcm1": 0.2 * jax.random.normal(ks[4], (co, 2 * co), jnp.float32),
        "bncm1": _bn_init(ks[5], 2 * co),
        "wcm2": 0.2 * jax.random.normal(ks[6], (2 * co, co), jnp.float32),
        "bncm2": _bn_init(ks[7], co),
    }


def fold_params_s2(raw):
    wdw, bdw = _fold_conv_bn(raw["wdw"], raw["bndw"])
    wp, bp = _fold_conv_bn(raw["wpw"], raw["bnpw"])
    w1, b1 = _fold_conv_bn(raw["wcm1"], raw["bncm1"])
    w2, b2 = _fold_conv_bn(raw["wcm2"], raw["bncm2"])
    ci = bdw.shape[0]
    return {"wdw": wdw.reshape(9, ci), "bdw": bdw, "wp": wp, "bp": bp,
            "w1": w1, "b1": b1, "w2": w2, "b2": b2}


# ----------------------------- pure-JAX reference (unfused, mirrors PyTorch eval) ---------------

def _bn_ref(x, bn):
    g, b, m, v = bn
    return (x - m) * (g / jnp.sqrt(v + _EPS)) + b


def _dwconv_ref(x, w, stride):
    c = x.shape[-1]
    return jax.lax.conv_general_dilated(
        x, w.reshape(3, 3, 1, c), window_strides=(stride, stride),
        padding=((1, 1), (1, 1)),
        dimension_numbers=("NHWC", "HWIO", "NHWC"),
        feature_group_count=c,
        precision=jax.lax.Precision.HIGHEST)


def _pw_ref(x, w):
    return jnp.einsum("nhwc,cd->nhwd", x, w, precision=jax.lax.Precision.HIGHEST)


def repvit_ref_s1(x, raw):
    conv3 = _bn_ref(_dwconv_ref(x, raw["w3"], 1), raw["bn3"])
    conv1 = x * raw["w1"] + raw["b1"]
    y = _bn_ref(conv3 + conv1 + x, raw["bno"])                     # RepVGGDW
    h = jax.nn.gelu(_bn_ref(_pw_ref(y, raw["wcm1"]), raw["bncm1"]),
                    approximate=False)
    z = _bn_ref(_pw_ref(h, raw["wcm2"]), raw["bncm2"])
    return y + z                                                   # Residual


def repvit_ref_s2(x, raw):
    t = _bn_ref(_dwconv_ref(x, raw["wdw"], 2), raw["bndw"])
    t = _bn_ref(_pw_ref(t, raw["wpw"]), raw["bnpw"])               # token mixer
    h = jax.nn.gelu(_bn_ref(_pw_ref(t, raw["wcm1"]), raw["bncm1"]),
                    approximate=False)
    z = _bn_ref(_pw_ref(h, raw["wcm2"]), raw["bncm2"])
    return t + z                                                   # Residual


# ----------------------------- main -----------------------------

if __name__ == "__main__":
    key = jax.random.PRNGKey(0)
    kx1, kp1, kx2, kp2 = jax.random.split(key, 4)

    # RepViTBlock(stride=1): inp = oup = 16, hidden_dim = 32 (identity path).
    N, H, W, C, HID = 2, 16, 16, 16, 32
    x1 = jax.random.normal(kx1, (N, H, W, C), jnp.float32)   # NHWC (NCHW: (2,16,16,16))
    raw1 = init_raw_params_s1(kp1, C, HID)
    y1 = jax.block_until_ready(repvit_block_s1(x1, fold_params_s1(raw1)))
    assert y1.shape == (N, H, W, C), y1.shape
    err1 = float(jnp.max(jnp.abs(y1 - repvit_ref_s1(x1, raw1))))
    if err1 > 1e-3:
        raise AssertionError(f"stride-1 Pallas RepViTBlock mismatch: max abs err {err1}")

    # RepViTBlock(stride=2): inp = 16, oup = 32, hidden_dim = 2*inp (downsampling path).
    CI, CO = 16, 32
    x2 = jax.random.normal(kx2, (N, H, W, CI), jnp.float32)
    raw2 = init_raw_params_s2(kp2, CI, CO)
    y2 = jax.block_until_ready(repvit_block_s2(x2, fold_params_s2(raw2)))
    assert y2.shape == (N, H // 2, W // 2, CO), y2.shape
    err2 = float(jnp.max(jnp.abs(y2 - repvit_ref_s2(x2, raw2))))
    if err2 > 1e-3:
        raise AssertionError(f"stride-2 Pallas RepViTBlock mismatch: max abs err {err2}")

    print("KERNEL_OK")
</pallas_src>

<mosaic_0001>
module attributes {stable_mosaic.version = 11 : i64} {
  func.func @_repvit_s1_kernel(%arg0: i32, %arg1: memref<1x16x16x16xf32, #tpu.memory_space<vmem>>, %arg2: memref<9x16xf32, #tpu.memory_space<vmem>>, %arg3: memref<1x16xf32, #tpu.memory_space<vmem>>, %arg4: memref<16x32xf32, #tpu.memory_space<vmem>>, %arg5: memref<1x32xf32, #tpu.memory_space<vmem>>, %arg6: memref<32x16xf32, #tpu.memory_space<vmem>>, %arg7: memref<1x16xf32, #tpu.memory_space<vmem>>, %arg8: memref<1x16x16x16xf32, #tpu.memory_space<vmem>>, %arg9: memref<18x18x16xf32, #tpu.memory_space<vmem>>) attributes {dimension_semantics = [#tpu.dimension_semantics<parallel>], iteration_bounds = array<i64: 2>, scalar_prefetch = 0 : i64, scratch_operands = 1 : i64, tpu.core_type = #tpu.core_type<tc>, window_params = [{transform_indices = @transform_0, window_bounds = array<i64: 1, 16, 16, 16>}, {pipeline_mode = #tpu.pipeline_mode<synchronous>, transform_indices = @transform_1, window_bounds = array<i64: 9, 16>}, {pipeline_mode = #tpu.pipeline_mode<synchronous>, transform_indices = @transform_2, window_bounds = array<i64: 1, 16>}, {pipeline_mode = #tpu.pipeline_mode<synchronous>, transform_indices = @transform_3, window_bounds = array<i64: 16, 32>}, {pipeline_mode = #tpu.pipeline_mode<synchronous>, transform_indices = @transform_4, window_bounds = array<i64: 1, 32>}, {pipeline_mode = #tpu.pipeline_mode<synchronous>, transform_indices = @transform_5, window_bounds = array<i64: 32, 16>}, {pipeline_mode = #tpu.pipeline_mode<synchronous>, transform_indices = @transform_6, window_bounds = array<i64: 1, 16>}, {transform_indices = @transform_7, window_bounds = array<i64: 1, 16, 16, 16>}]} {
    %cst = arith.constant 0.000000e+00 : f32
    %0 = vector.broadcast %cst : f32 to vector<18x18x16xf32>
    %c0 = arith.constant 0 : index
    %c0_0 = arith.constant 0 : index
    %c0_1 = arith.constant 0 : index
    %1 = vector.load %arg9[%c0, %c0_0, %c0_1] : memref<18x18x16xf32, #tpu.memory_space<vmem>>, vector<18x18x16xf32>
    tpu.vector_store %arg9[%c0, %c0_0, %c0_1], %0 {strides = array<i32>} : memref<18x18x16xf32, #tpu.memory_space<vmem>>, vector<18x18x16xf32>,
    %c0_2 = arith.constant 0 : index
    %c0_3 = arith.constant 0 : index
    %c0_4 = arith.constant 0 : index
    %c0_5 = arith.constant 0 : index
    %2 = vector.load %arg1[%c0_2, %c0_3, %c0_4, %c0_5] : memref<1x16x16x16xf32, #tpu.memory_space<vmem>>, vector<1x16x16x16xf32>
    %3 = vector.shape_cast %2 : vector<1x16x16x16xf32> to vector<16x16x16xf32>
    %c1 = arith.constant 1 : index
    %c1_6 = arith.constant 1 : index
    %c0_7 = arith.constant 0 : index
    %4 = vector.load %arg9[%c1, %c1_6, %c0_7] : memref<18x18x16xf32, #tpu.memory_space<vmem>>, vector<16x16x16xf32>
    tpu.vector_store %arg9[%c1, %c1_6, %c0_7], %3 {strides = array<i32>} : memref<18x18x16xf32, #tpu.memory_space<vmem>>, vector<16x16x16xf32>,
    %cst_8 = arith.constant 0.000000e+00 : f32
    %5 = vector.broadcast %cst_8 : f32 to vector<16x16x16xf32>
    %c0_9 = arith.constant 0 : index
    %c0_10 = arith.constant 0 : index
    %c0_11 = arith.constant 0 : index
    %6 = vector.load %arg9[%c0_9, %c0_10, %c0_11] : memref<18x18x16xf32, #tpu.memory_space<vmem>>, vector<16x16x16xf32>
    %c0_12 = arith.constant 0 : index
    %c0_13 = arith.constant 0 : index
    %7 = vector.load %arg2[%c0_12, %c0_13] : memref<9x16xf32, #tpu.memory_space<vmem>>, vector<1x16xf32>
    %8 = vector.shape_cast %7 : vector<1x16xf32> to vector<16xf32>
    %9 = vector.shape_cast %8 : vector<16xf32> to vector<1x1x16xf32>
    %10 = vector.broadcast %9 : vector<1x1x16xf32> to vector<16x16x16xf32>
    %11 = arith.mulf %6, %10 : vector<16x16x16xf32>
    %12 = arith.addf %5, %11 : vector<16x16x16xf32>
    %c0_14 = arith.constant 0 : index
    %c1_15 = arith.constant 1 : index
    %c0_16 = arith.constant 0 : index
    %13 = vector.load %arg9[%c0_14, %c1_15, %c0_16] : memref<18x18x16xf32, #tpu.memory_space<vmem>>, vector<16x16x16xf32>
    %c1_17 = arith.constant 1 : index
    %c0_18 = arith.constant 0 : index
    %14 = vector.load %arg2[%c1_17, %c0_18] : memref<9x16xf32, #tpu.memory_space<vmem>>, vector<1x16xf32>
    %15 = vector.shape_cast %14 : vector<1x16xf32> to vector<16xf32>
    %16 = vector.shape_cast %15 : vector<16xf32> to vector<1x1x16xf32>
    %17 = vector.broadcast %16 : vector<1x1x16xf32> to vector<16x16x16xf32>
    %18 = arith.mulf %13, %17 : vector<16x16x16xf32>
    %19 = arith.addf %12, %18 : vector<16x16x16xf32>
    %c0_19 = arith.constant 0 : index
    %c2 = arith.constant 2 : index
    %c0_20 = arith.constant 0 : index
    %20 = vector.load %arg9[%c0_19, %c2, %c0_20] : memref<18x18x16xf32, #tpu.memory_space<vmem>>, vector<16x16x16xf32>
    %c2_21 = arith.constant 2 : index
    %c0_22 = arith.constant 0 : index
    %21 = vector.load %arg2[%c2_21, %c0_22] : memref<9x16xf32, #tpu.memory_space<vmem>>, vector<1x16xf32>
    %22 = vector.shape_cast %21 : vector<1x16xf32> to vector<16xf32>
    %23 = vector.shape_cast %22 : vector<16xf32> to vector<1x1x16xf32>
    %24 = vector.broadcast %23 : vector<1x1x16xf32> to vector<16x16x16xf32>
    %25 = arith.mulf %20, %24 : vector<16x16x16xf32>
    %26 = arith.addf %19, %25 : vector<16x16x16xf32>
    %c1_23 = arith.constant 1 : index
    %c0_24 = arith.constant 0 : index
    %c0_25 = arith.constant 0 : index
    %27 = vector.load %arg9[%c1_23, %c0_24, %c0_25] : memref<18x18x16xf32, #tpu.memory_space<vmem>>, vector<16x16x16xf32>
    %c3 = arith.constant 3 : index
    %c0_26 = arith.constant 0 : index
    %28 = vector.load %arg2[%c3, %c0_26] : memref<9x16xf32, #tpu.memory_space<vmem>>, vector<1x16xf32>
    %29 = vector.shape_cast %28 : vector<1x16xf32> to vector<16xf32>
    %30 = vector.shape_cast %29 : vector<16xf32> to vector<1x1x16xf32>
    %31 = vector.broadcast %30 : vector<1x1x16xf32> to vector<16x16x16xf32>
    %32 = arith.mulf %27, %31 : vector<16x16x16xf32>
    %33 = arith.addf %26, %32 : vector<16x16x16xf32>
    %c1_27 = arith.constant 1 : index
    %c1_28 = arith.constant 1 : index
    %c0_29 = arith.constant 0 : index
    %34 = vector.load %arg9[%c1_27, %c1_28, %c0_29] : memref<18x18x16xf32, #tpu.memory_space<vmem>>, vector<16x16x16xf32>
    %c4 = arith.constant 4 : index
    %c0_30 = arith.constant 0 : index
    %35 = vector.load %arg2[%c4, %c0_30] : memref<9x16xf32, #tpu.memory_space<vmem>>, vector<1x16xf32>
    %36 = vector.shape_cast %35 : vector<1x16xf32> to vector<16xf32>
    %37 = vector.shape_cast %36 : vector<16xf32> to vector<1x1x16xf32>
    %38 = vector.broadcast %37 : vector<1x1x16xf32> to vector<16x16x16xf32>
    %39 = arith.mulf %34, %38 : vector<16x16x16xf32>
    %40 = arith.addf %33, %39 : vector<16x16x16xf32>
    %c1_31 = arith.constant 1 : index
    %c2_32 = arith.constant 2 : index
    %c0_33 = arith.constant 0 : index
    %41 = vector.load %arg9[%c1_31, %c2_32, %c0_33] : memref<18x18x16xf32, #tpu.memory_space<vmem>>, vector<16x16x16xf32>
    %c5 = arith.constant 5 : index
    %c0_34 = arith.constant 0 : index
    %42 = vector.load %arg2[%c5, %c0_34] : memref<9x16xf32, #tpu.memory_space<vmem>>, vector<1x16xf32>
    %43 = vector.shape_cast %42 : vector<1x16xf32> to vector<16xf32>
    %44 = vector.shape_cast %43 : vector<16xf32> to vector<1x1x16xf32>
    %45 = vector.broadcast %44 : vector<1x1x16xf32> to vector<16x16x16xf32>
    %46 = arith.mulf %41, %45 : vector<16x16x16xf32>
    %47 = arith.addf %40, %46 : vector<16x16x16xf32>
    %c2_35 = arith.constant 2 : index
    %c0_36 = arith.constant 0 : index
    %c0_37 = arith.constant 0 : index
    %48 = vector.load %arg9[%c2_35, %c0_36, %c0_37] : memref<18x18x16xf32, #tpu.memory_space<vmem>>, vector<16x16x16xf32>
    %c6 = arith.constant 6 : index
    %c0_38 = arith.constant 0 : index
    %49 = vector.load %arg2[%c6, %c0_38] : memref<9x16xf32, #tpu.memory_space<vmem>>, vector<1x16xf32>
    %50 = vector.shape_cast %49 : vector<1x16xf32> to vector<16xf32>
    %51 = vector.shape_cast %50 : vector<16xf32> to vector<1x1x16xf32>
    %52 = vector.broadcast %51 : vector<1x1x16xf32> to vector<16x16x16xf32>
    %53 = arith.mulf %48, %52 : vector<16x16x16xf32>
    %54 = arith.addf %47, %53 : vector<16x16x16xf32>
    %c2_39 = arith.constant 2 : index
    %c1_40 = arith.constant 1 : index
    %c0_41 = arith.constant 0 : index
    %55 = vector.load %arg9[%c2_39, %c1_40, %c0_41] : memref<18x18x16xf32, #tpu.memory_space<vmem>>, vector<16x16x16xf32>
    %c7 = arith.constant 7 : index
    %c0_42 = arith.constant 0 : index
    %56 = vector.load %arg2[%c7, %c0_42] : memref<9x16xf32, #tpu.memory_space<vmem>>, vector<1x16xf32>
    %57 = vector.shape_cast %56 : vector<1x16xf32> to vector<16xf32>
    %58 = vector.shape_cast %57 : vector<16xf32> to vector<1x1x16xf32>
    %59 = vector.broadcast %58 : vector<1x1x16xf32> to vector<16x16x16xf32>
    %60 = arith.mulf %55, %59 : vector<16x16x16xf32>
    %61 = arith.addf %54, %60 : vector<16x16x16xf32>
    %c2_43 = arith.constant 2 : index
    %c2_44 = arith.constant 2 : index
    %c0_45 = arith.constant 0 : index
    %62 = vector.load %arg9[%c2_43, %c2_44, %c0_45] : memref<18x18x16xf32, #tpu.memory_space<vmem>>, vector<16x16x16xf32>
    %c8 = arith.constant 8 : index
    %c0_46 = arith.constant 0 : index
    %63 = vector.load %arg2[%c8, %c0_46] : memref<9x16xf32, #tpu.memory_space<vmem>>, vector<1x16xf32>
    %64 = vector.shape_cast %63 : vector<1x16xf32> to vector<16xf32>
    %65 = vector.shape_cast %64 : vector<16xf32> to vector<1x1x16xf32>
    %66 = vector.broadcast %65 : vector<1x1x16xf32> to vector<16x16x16xf32>
    %67 = arith.mulf %62, %66 : vector<16x16x16xf32>
    %68 = arith.addf %61, %67 : vector<16x16x16xf32>
    %c0_47 = arith.constant 0 : index
    %c0_48 = arith.constant 0 : index
    %69 = vector.load %arg3[%c0_47, %c0_48] : memref<1x16xf32, #tpu.memory_space<vmem>>, vector<1x16xf32>
    %70 = vector.shape_cast %69 : vector<1x16xf32> to vector<16xf32>
    %71 = vector.shape_cast %70 : vector<16xf32> to vector<1x1x16xf32>
    %72 = vector.broadcast %71 : vector<1x1x16xf32> to vector<16x16x16xf32>
    %73 = arith.addf %68, %72 : vector<16x16x16xf32>
    %74 = vector.shape_cast %73 : vector<16x16x16xf32> to vector<256x16xf32>
    %c0_49 = arith.constant 0 : index
    %c0_50 = arith.constant 0 : index
    %75 = vector.load %arg4[%c0_49, %c0_50] : memref<16x32xf32, #tpu.memory_space<vmem>>, vector<16x32xf32>
    %cst_51 = arith.constant dense<0.000000e+00> : vector<256x32xf32>
    %76 = tpu.matmul %74, %75, %cst_51 {dimension_numbers = #tpu.dot_dimension_numbers<[1], [0], [0], [1], [0, 0, 1, 1], [], []>} : vector<256x16xf32>, vector<16x32xf32>, vector<256x32xf32> -> vector<256x32xf32>
    %c0_52 = arith.constant 0 : index
    %c0_53 = arith.constant 0 : index
    %77 = vector.load %arg5[%c0_52, %c0_53] : memref<1x32xf32, #tpu.memory_space<vmem>>, vector<1x32xf32>
    %78 = vector.broadcast %77 : vector<1x32xf32> to vector<256x32xf32>
    %79 = arith.addf %76, %78 : vector<256x32xf32>
    %cst_54 = arith.constant 0.707106769 : f32
    %80 = vector.broadcast %cst_54 : f32 to vector<256x32xf32>
    %81 = arith.mulf %79, %80 : vector<256x32xf32>
    %cst_55 = arith.constant 0.000000e+00 : f32
    %82 = vector.broadcast %cst_55 : f32 to vector<256x32xf32>
    %83 = arith.cmpf olt, %81, %82 : vector<256x32xf32>
    %cst_56 = arith.constant -1.000000e+00 : f32
    %cst_57 = arith.constant 1.000000e+00 : f32
    %84 = vector.broadcast %cst_56 : f32 to vector<256x32xf32>
    %85 = vector.broadcast %cst_57 : f32 to vector<256x32xf32>
    %86 = arith.select %83, %84, %85 : vector<256x32xi1>, vector<256x32xf32>
    %87 = math.absf %81 : vector<256x32xf32>
    %cst_58 = arith.constant 0.327591091 : f32
    %88 = vector.broadcast %cst_58 : f32 to vector<256x32xf32>
    %89 = arith.mulf %88, %87 : vector<256x32xf32>
    %cst_59 = arith.constant 1.000000e+00 : f32
    %90 = vector.broadcast %cst_59 : f32 to vector<256x32xf32>
    %91 = arith.addf %90, %89 : vector<256x32xf32>
    %cst_60 = arith.constant 1.000000e+00 : f32
    %92 = vector.broadcast %cst_60 : f32 to vector<256x32xf32>
    %93 = arith.divf %92, %91 : vector<256x32xf32>
    %cst_61 = arith.constant 1.06140542 : f32
    %94 = vector.broadcast %cst_61 : f32 to vector<256x32xf32>
    %95 = arith.mulf %94, %93 : vector<256x32xf32>
    %cst_62 = arith.constant -1.45315206 : f32
    %96 = vector.broadcast %cst_62 : f32 to vector<256x32xf32>
    %97 = arith.addf %95, %96 : vector<256x32xf32>
    %98 = arith.mulf %97, %93 : vector<256x32xf32>
    %cst_63 = arith.constant 1.42141378 : f32
    %99 = vector.broadcast %cst_63 : f32 to vector<256x32xf32>
    %100 = arith.addf %98, %99 : vector<256x32xf32>
    %101 = arith.mulf %100, %93 : vector<256x32xf32>
    %cst_64 = arith.constant -0.284496725 : f32
    %102 = vector.broadcast %cst_64 : f32 to vector<256x32xf32>
    %103 = arith.addf %101, %102 : vector<256x32xf32>
    %104 = arith.mulf %103, %93 : vector<256x32xf32>
    %cst_65 = arith.constant 0.254829586 : f32
    %105 = vector.broadcast %cst_65 : f32 to vector<256x32xf32>
    %106 = arith.addf %104, %105 : vector<256x32xf32>
    %107 = arith.mulf %106, %93 : vector<256x32xf32>
    %cst_66 = arith.constant 0.000000e+00 : f32
    %108 = vector.broadcast %cst_66 : f32 to vector<256x32xf32>
    %109 = arith.subf %108, %87 : vector<256x32xf32>
    %110 = arith.mulf %109, %87 : vector<256x32xf32>
    %111 = math.exp %110 : vector<256x32xf32>
    %112 = arith.mulf %107, %111 : vector<256x32xf32>
    %cst_67 = arith.constant 1.000000e+00 : f32
    %113 = vector.broadcast %cst_67 : f32 to vector<256x32xf32>
    %114 = arith.subf %113, %112 : vector<256x32xf32>
    %115 = arith.mulf %86, %114 : vector<256x32xf32>
    %cst_68 = arith.constant 5.000000e-01 : f32
    %116 = vector.broadcast %cst_68 : f32 to vector<256x32xf32>
    %117 = arith.mulf %116, %79 : vector<256x32xf32>
    %cst_69 = arith.constant 1.000000e+00 : f32
    %118 = vector.broadcast %cst_69 : f32 to vector<256x32xf32>
    %119 = arith.addf %118, %115 : vector<256x32xf32>
    %120 = arith.mulf %117, %119 : vector<256x32xf32>
    %c0_70 = arith.constant 0 : index
    %c0_71 = arith.constant 0 : index
    %121 = vector.load %arg6[%c0_70, %c0_71] : memref<32x16xf32, #tpu.memory_space<vmem>>, vector<32x16xf32>
    %cst_72 = arith.constant dense<0.000000e+00> : vector<256x16xf32>
    %122 = tpu.matmul %120, %121, %cst_72 {dimension_numbers = #tpu.dot_dimension_numbers<[1], [0], [0], [1], [0, 0, 1, 1], [], []>} : vector<256x32xf32>, vector<32x16xf32>, vector<256x16xf32> -> vector<256x16xf32>
    %c0_73 = arith.constant 0 : index
    %c0_74 = arith.constant 0 : index
    %123 = vector.load %arg7[%c0_73, %c0_74] : memref<1x16xf32, #tpu.memory_space<vmem>>, vector<1x16xf32>
    %124 = vector.broadcast %123 : vector<1x16xf32> to vector<256x16xf32>
    %125 = arith.addf %122, %124 : vector<256x16xf32>
    %126 = arith.addf %74, %125 : vector<256x16xf32>
    %127 = vector.shape_cast %126 : vector<256x16xf32> to vector<1x16x16x16xf32>
    %c0_75 = arith.constant 0 : index
    %c0_76 = arith.constant 0 : index
    %c0_77 = arith.constant 0 : index
    %c0_78 = arith.constant 0 : index
    %128 = vector.load %arg8[%c0_75, %c0_76, %c0_77, %c0_78] : memref<1x16x16x16xf32, #tpu.memory_space<vmem>>, vector<1x16x16x16xf32>
    tpu.vector_store %arg8[%c0_75, %c0_76, %c0_77, %c0_78], %127 {strides = array<i32>} : memref<1x16x16x16xf32, #tpu.memory_space<vmem>>, vector<1x16x16x16xf32>,
    return
  }
  func.func @transform_0(%arg0: i32) -> (i32, i32, i32, i32) {
    %c0_i32 = arith.constant 0 : i32
    %c0_i32_0 = arith.constant 0 : i32
    %c0_i32_1 = arith.constant 0 : i32
    %c0_i32_2 = arith.constant 0 : i32
    return %arg0, %c0_i32, %c0_i32_0, %c0_i32_1 : i32, i32, i32, i32
  }
  func.func @transform_1(%arg0: i32) -> (i32, i32) {
    %c0_i32 = arith.constant 0 : i32
    %c0_i32_0 = arith.constant 0 : i32
    %c0_i32_1 = arith.constant 0 : i32
    return %c0_i32, %c0_i32_0 : i32, i32
  }
  func.func @transform_2(%arg0: i32) -> (i32, i32) {
    %c0_i32 = arith.constant 0 : i32
    %c0_i32_0 = arith.constant 0 : i32
    %c0_i32_1 = arith.constant 0 : i32
    return %c0_i32, %c0_i32_0 : i32, i32
  }
  func.func @transform_3(%arg0: i32) -> (i32, i32) {
    %c0_i32 = arith.constant 0 : i32
    %c0_i32_0 = arith.constant 0 : i32
    %c0_i32_1 = arith.constant 0 : i32
    return %c0_i32, %c0_i32_0 : i32, i32
  }
  func.func @transform_4(%arg0: i32) -> (i32, i32) {
    %c0_i32 = arith.constant 0 : i32
    %c0_i32_0 = arith.constant 0 : i32
    %c0_i32_1 = arith.constant 0 : i32
    return %c0_i32, %c0_i32_0 : i32, i32
  }
  func.func @transform_5(%arg0: i32) -> (i32, i32) {
    %c0_i32 = arith.constant 0 : i32
    %c0_i32_0 = arith.constant 0 : i32
    %c0_i32_1 = arith.constant 0 : i32
    return %c0_i32, %c0_i32_0 : i32, i32
  }
  func.func @transform_6(%arg0: i32) -> (i32, i32) {
    %c0_i32 = arith.constant 0 : i32
    %c0_i32_0 = arith.constant 0 : i32
    %c0_i32_1 = arith.constant 0 : i32
    return %c0_i32, %c0_i32_0 : i32, i32
  }
  func.func @transform_7(%arg0: i32) -> (i32, i32, i32, i32) {
    %c0_i32 = arith.constant 0 : i32
    %c0_i32_0 = arith.constant 0 : i32
    %c0_i32_1 = arith.constant 0 : i32
    %c0_i32_2 = arith.constant 0 : i32
    return %arg0, %c0_i32, %c0_i32_0, %c0_i32_1 : i32, i32, i32, i32
  }
}

</mosaic_0001>

<bundles_post_ra>
// kernel: repvit_block_s1.1
= control target key start
LH: loop header
LB: loop body
LE: loop exit
PB: predicated region body
PF: predicated region fallthrough
CT: control target
= control target key end

     0   :  { %12 = vsyncpa [#allocation4], 0  ;;  %s5815_s0 = inlined_call_operand.hbm [shape: f32[2,16,16,16], index: 0, kind: input, shape index: {}]   ;;  %s5816_s1 = inlined_call_operand.vmem [shape: f32[9,16], index: 1, kind: input, shape index: {}]   ;;  %s5817_s2 = inlined_call_operand.vmem [shape: f32[1,16], index: 2, kind: input, shape index: {}]   ;;  %s5818_s3 = inlined_call_operand.vmem [shape: f32[16,32], index: 3, kind: input, shape index: {}]   ;;  %s5819_s4 = inlined_call_operand.vmem [shape: f32[1,32], index: 4, kind: input, shape index: {}]   ;;  %s5820_s5 = inlined_call_operand.vmem [shape: f32[32,16], index: 5, kind: input, shape index: {}]   ;;  %s5821_s6 = inlined_call_operand.vmem [shape: f32[1,16], index: 6, kind: input, shape index: {}]   ;;  %s5822_s7 = inlined_call_operand.hbm [shape: f32[2,16,16,16], index: 7, kind: output, shape index: {}]  }
   0x1   :  { %14 = vsyncpa [#allocation4 + $0x1], 0 }
   0x2   :  { %15 = vsyncpa [#allocation5], 0 }
   0x3   :  { %17 = vsyncpa [#allocation5 + $0x1], 0  ;;  %s3664_s24 = smov 0   ;;  %s3666_s25 = smov 0  }
   0x4   :  { %s3668_s26 = smov 0   ;;  %s3670_s27 = smov 0  }
   0x5 LB: > { %s3685_s28 = sadd.s32 4294967295, %s3614_s27   ;;  %s3045_s29 = sadd.s32 4294967294, %s3614_s27   ;;  %s3614_s27 = sphi %s3670_s27, %s5983_s27   ;;  %s3610_s26 = sphi %s3668_s26, %s5982_s26   ;;  %s3606_s25 = sphi %s3666_s25, %s5981_s25   ;;  %s3602_s24 = sphi %s3664_s24, %s5980_s24  }
   0x6   : > { %s3689_s30 = sadd.s32 1, %s3614_s27   ;;  %s30_s8 = sadd.s32 1, %s3610_s26 }
   0x7   : > { %s27_s9 = ssub.s32 %s3614_s27, %s3689_s30  ;;  %p37_p0 = scmp.ne.s32.totalorder %s3610_s26, %s3606_s25 }
   0x8   : > { %p28_p1 = scmp.eq.s32.totalorder %s27_s9, 0  ;;  %p38_p2 = scmp.eq.s32.totalorder %s3614_s27, 0 }
   0x9   : > { %p43_p3 = scmp.ne.s32.totalorder %s3606_s25, %s3602_s24  ;;  %p44_p4 = scmp.eq.s32.totalorder %s3685_s28, 0 }
   0xa   : > { %s3701_s10 = scalar_select %p28_p1, %s3610_s26, %s30_s8  }
   0xb   : > { %p3703_p5 = por %p38_p2, %p37_p0  ;;  %p3707_p6 = por %p44_p4, %p43_p3 }
   0xc   : > { %p193_p7 = scmp.eq.s32.totalorder %s3685_s28, 1  ;;  %p199_p8 = scmp.eq.s32.totalorder %s3045_s29, 1 }
   0xd   : > { %p3339_p10 = scmp.lt.s32.totalorder %s3614_s27, 2  ;;  %s237_s15 = sand.u32 1, %s3610_s26  }
   0xe   : > { %p3714_p11 = por %p193_p7, %p37_p0  ;;  %p3718_p12 = por %p199_p8, %p43_p3 }
   0xf   : > { %s3135_s16 = sshll.u32 %s3614_s27, 12  ;;  %s3048_s17 = sshll.u32 %s237_s15, 8 }
  0x10   : > { %s5865_s13 = scalar_select %p3714_p11, 1, 0 }
  0x11   : > { %s5866_s14 = scalar_select %p3718_p12, 1, 0 }
  0x12   : > { %s3727_s20 = scalar_lea.hbm %s5815_s0, %s3135_s16  ;;  %s241_s21 = scalar_lea.vmem [#allocation3], %s3048_s17 }
  0x13   : > { %s248_s22 = sshll.u32 %s241_s21, 4  ;;  %p3731_p13 = pnand %p3339_p10, %p3703_p5  ;;  %s3735_s22 = int_to_ptr.vmem [resolvable:$true] %s248_s22 }
  0x14   : > { %s3737_s29 = scalar_lea.sflag [#allocation4], %s237_s15  ;;  %s3518_s8 = scalar_lea.hbm %s3727_s20, 4096 }
  0x15   : > { %p3519_p0 = scmp.ne.s32.totalorder %s3727_s20, %s3518_s8  ;;  %p3520_p1 = pneg %p3731_p13 }
  0x16   : > { %s3523_s16 = scalar_lea.hbm %s5815_s0, 8192  ;;  %p3524_p4 = scmp.lt.u32.totalorder %s3727_s20, %s5815_s0 }
  0x17   : > { %p3521_p2 = pnand %p3520_p1, %p3519_p0  ;;  %p3525_p5 = scmp.lt.u32.totalorder %s3523_s16, %s3518_s8 }
  0x18   : > { %p3527_p8 = scmp.lt.u32.totalorder %s3518_s8, %s3727_s20 }
  0x19   : > { %p3522_p3 = pneg %p3521_p2  ;;  %p3526_p7 = por %p3525_p5, %p3524_p4 }
  0x1b   : > { %p3528_p10 = por %p3527_p8, %p3526_p7 }
  0x1d   : > { %p3529_p9 = pnand %p3528_p10, %p3522_p3 }
  0x1f   : > { %3532 = shalt.err (!%p3529_p9)
}
  0x20   : > { %s3533_s15 = scalar_lea.vmem %s3735_s22, 4096  ;;  %s3616_s19 = smov [#allocation3]  }
  0x21   : > { %p3534_p0 = scmp.ne.s32.totalorder %s3735_s22, %s3533_s15  ;;  %s3538_s21 = sshll.u32 %s3616_s19, 4  ;;  %s3539_s21 = int_to_ptr.vmem [resolvable:$false] %s3538_s21 }
  0x22   : > { %s3540_s9 = scalar_lea.vmem %s3539_s21, 8192  ;;  %p3541_p11 = scmp.lt.s32.totalorder %s3735_s22, %s3539_s21 }
  0x23   : > { %p3536_p2 = pnand %p3534_p0, %p3520_p1  ;;  %p3542_p4 = scmp.lt.s32.totalorder %s3540_s9, %s3533_s15 }
  0x25   : > { %p3537_p12 = pneg %p3536_p2  ;;  %p3543_p5 = por %p3542_p4, %p3541_p11 }
  0x27   : > { %p3544_p7 = pnand %p3543_p5, %p3537_p12 }
  0x29   : > { %3547 = shalt.err (!%p3544_p7)
}
  0x2a   : > { %s3617_s8 = smov 128   ;;  %s3618_s11 = smov 8  }
  0x2b   : > { %3334 = dma.hbm_to_vmem [thread:$0]  (!%p3731_p13), %s3727_s20, 4096, %s3735_s22, %s3737_s29, %s3617_s8, %s3617_s8, %s3618_s11  }
  0x2c   : > { %p3051_p9 = scmp.ge.s32.totalorder %s3614_s27, 1  ;;  %p256_p1 = scmp.lt.s32.totalorder %s3614_s27, 3 }
  0x2e   : > { %p257_p3 = pnand %p3051_p9, %p256_p1 }
  0x30   : > { %260 = sbr.rel (%p257_p3) target bundleno = 804 (0x324), region = 48 }
  0x37   : > { %s3768_s16 = sand.u32 1, %s3606_s25  }
  0x38   : > { %s3052_s17 = sshll.u32 %s3768_s16, 8  ;;  %s263_s18 = scalar_lea.sflag [#allocation4], %s3768_s16 }
  0x39   : > { %s3774_s15 = scalar_lea.vmem [#allocation3], %s3052_s17 }
  0x3a   : > { %3593 = dma.done.wait (%p3707_p6), %s263_s18, 4096  }
  0x3b   : > { %3595 = vsyncadd (%p3707_p6), %s263_s18, 4294963200  ;;  %vm297_vm0 = vcmask 130048   ;;  %vm300_vm1 = vcmask 123904   ;;  %v3619_v0 = vmov 0.0   ;;  %v1367_v1 = vld [vmem:[%s5818_s3] sm:$0xff]  ;;  %v1368_v2 = vld [vmem:[%s5818_s3 + $0x8] sm:$0xff] }
  0x3c   : > { %298 = vst.msk [vmem:[#allocation2] sm:$0xff] %vm297_vm0, %v3619_v0  ;;  %299 = vst.msk [vmem:[#allocation2 + $0x8] sm:$0xff] %vm297_vm0, %v3619_v0  ;;  %v353_v3 = vld [vmem:[%s3774_s15] sm:$0xff]  ;;  %v3315_v4 = vpack.c.bf16 %v1368_v2, %v1367_v1  ;;  %v354_v5 = vld [vmem:[%s3774_s15 + $0x8] sm:$0xff]  ;;  %s5638_s12 = scalar_lea.vmem [#allocation6], %s3052_s17  ;;  %s3136_s17 = sshll.u32 %s3685_s28, 12 }
  0x3d   : > { %302 = vst.msk [vmem:[#allocation2 + $0x18] sm:$0xff] %vm297_vm0, %v3619_v0  ;;  %303 = vst.msk [vmem:[#allocation2 + $0x20] sm:$0xff] %vm297_vm0, %v3619_v0  ;;  %v355_v6 = vld [vmem:[%s3774_s15 + $0x10] sm:$0xff]  ;;  %v356_v7 = vld [vmem:[%s3774_s15 + $0x18] sm:$0xff]  ;;  %s2972_s20 = sshll.u32 %s5638_s12, 4  ;;  %s5764_s23 = scalar_lea.hbm %s5822_s7, %s3136_s17  ;;  %s5766_s20 = int_to_ptr.vmem [resolvable:$true] %s2972_s20 }
  0x3e   : > { %304 = vst.msk [vmem:[#allocation2 + $0x28] sm:$0x3] %vm300_vm1, %v3619_v0  ;;  %307 = vst.msk [vmem:[#allocation2 + $0x40] sm:$0x3] %vm300_vm1, %v3619_v0  ;;  %v3851_v9 = vld [vmem:[%s5816_s1] ss:$0 sm:$0xff]  ;;  %3316 = vmatprep.subr.bf16.mxu0 %v3315_v4 }
  0x3f   : > { %305 = vst.msk [vmem:[#allocation2 + $0x30] sm:$0xff] %vm297_vm0, %v3619_v0  ;;  %306 = vst.msk [vmem:[#allocation2 + $0x38] sm:$0xff] %vm297_vm0, %v3619_v0  ;;  %v3857_v12 = vld [vmem:[%s5816_s1 + $0x1] ss:$0 sm:$0xff]  ;;  %v3862_v14 = vld [vmem:[%s5816_s1 + $0x2] ss:$0 sm:$0xff]  ;;  %3318 = vmatpush3.bf16.msra.mxu0 %v3315_v4 }
  0x40   : > { %301 = vst.msk [vmem:[#allocation2 + $0x10] sm:$0x3] %vm300_vm1, %v3619_v0  ;;  %310 = vst.msk [vmem:[#allocation2 + $0x58] sm:$0x3] %vm300_vm1, %v3619_v0  ;;  %v3869_v17 = vld [vmem:[%s5816_s1 + $0x3] ss:$0 sm:$0xff] }
  0x41   : > { %308 = vst.msk [vmem:[#allocation2 + $0x48] sm:$0xff] %vm297_vm0, %v3619_v0  ;;  %309 = vst.msk [vmem:[#allocation2 + $0x50] sm:$0xff] %vm297_vm0, %v3619_v0  ;;  %v3874_v18 = vld [vmem:[%s5816_s1 + $0x4] ss:$0 sm:$0xff]  ;;  %v3879_v20 = vld [vmem:[%s5816_s1 + $0x5] ss:$0 sm:$0xff] }
  0x42   : > { %311 = vst.msk [vmem:[#allocation2 + $0x60] sm:$0xff] %vm297_vm0, %v3619_v0  ;;  %312 = vst.msk [vmem:[#allocation2 + $0x68] sm:$0xff] %vm297_vm0, %v3619_v0  ;;  %v3884_v23 = vld [vmem:[%s5816_s1 + $0x6] ss:$0 sm:$0xff]  ;;  %v357_v27 = vld [vmem:[%s3774_s15 + $0x20] sm:$0xff]  ;;  %s2959_s28 = scalar_lea.sflag [#allocation5], %s3768_s16 }
  0x43   : > { %313 = vst.msk [vmem:[#allocation2 + $0x70] sm:$0x3] %vm300_vm1, %v3619_v0  ;;  %316 = vst.msk [vmem:[#allocation2 + $0x88] sm:$0x3] %vm300_vm1, %v3619_v0  ;;  %v418_v8 = vld [vmem:[#allocation2] sm:$0xff]  ;;  %v419_v21 = vld [vmem:[#allocation2 + $0x8] sm:$0xff] }
  0x44   : > { %314 = vst.msk [vmem:[#allocation2 + $0x78] sm:$0xff] %vm297_vm0, %v3619_v0  ;;  %315 = vst.msk [vmem:[#allocation2 + $0x80] sm:$0xff] %vm297_vm0, %v3619_v0  ;;  %v519_v10 = vld [vmem:[#allocation2 + $0x1] sm:$0xff]  ;;  %v455_v11 = vmul.f32 %v3851_v9, %v418_v8  ;;  %v456_v24 = vmul.f32 %v3851_v9, %v419_v21  ;;  %v358_v28 = vld [vmem:[%s3774_s15 + $0x28] sm:$0xff]  ;;  %s3548_s29 = scalar_lea.vmem %s5766_s20, 4096  ;;  %p5977_p11 = scmp.ne.s32.totalorder %s5865_s13, 0 }
  0x45   : > { %317 = vst.msk [vmem:[#allocation2 + $0x90] sm:$0xff] %vm297_vm0, %v3619_v0  ;;  %318 = vst.msk [vmem:[#allocation2 + $0x98] sm:$0xff] %vm297_vm0, %v3619_v0  ;;  %v620_v13 = vld [vmem:[#allocation2 + $0x2] sm:$0xff]  ;;  %v556_v15 = vmul.f32 %v3857_v12, %v519_v10  ;;  %v361_v57 = vld [vmem:[%s3774_s15 + $0x40] sm:$0xff]  ;;  %p3549_p6 = scmp.ne.s32.totalorder %s5766_s20, %s3548_s29  ;;  %s3621_s19 = smov [#allocation6]  }
  0x46   : > { %319 = vst.msk [vmem:[#allocation2 + $0xa0] sm:$0x3] %vm300_vm1, %v3619_v0  ;;  %322 = vst.msk [vmem:[#allocation2 + $0xb8] sm:$0x3] %vm300_vm1, %v3619_v0  ;;  %v657_v16 = vmul.f32 %v3862_v14, %v620_v13  ;;  %v359_v33 = vld [vmem:[%s3774_s15 + $0x30] sm:$0xff]  ;;  %v360_v56 = vld [vmem:[%s3774_s15 + $0x38] sm:$0xff] }
  0x47   : > { %320 = vst.msk [vmem:[#allocation2 + $0xa8] sm:$0xff] %vm297_vm0, %v3619_v0  ;;  %321 = vst.msk [vmem:[#allocation2 + $0xb0] sm:$0xff] %vm297_vm0, %v3619_v0  ;;  %v588_v19 = vadd.f32 %v556_v15, %v455_v11  ;;  %v520_v22 = vld [vmem:[#allocation2 + $0x9] sm:$0xff]  ;;  %v3899_v37 = vld [vmem:[%s5816_s1 + $0x7] ss:$0 sm:$0xff]  ;;  %p3550_p12 = pnand %p3549_p6, %p5977_p11  ;;  %s3552_s21 = sshll.u32 %s3621_s19, 4  ;;  %s3553_s21 = int_to_ptr.vmem [resolvable:$false] %s3552_s21 }
  0x48   : > { %323 = vst.msk [vmem:[#allocation2 + $0xc0] sm:$0xff] %vm297_vm0, %v3619_v0  ;;  %324 = vst.msk [vmem:[#allocation2 + $0xc8] sm:$0xff] %vm297_vm0, %v3619_v0  ;;  %v557_v25 = vmul.f32 %v3857_v12, %v520_v22  ;;  %v621_v26 = vld [vmem:[#allocation2 + $0xa] sm:$0xff]  ;;  %v3904_v38 = vld [vmem:[%s5816_s1 + $0x8] ss:$0 sm:$0xff]  ;;  %s3554_s9 = scalar_lea.vmem %s3553_s21, 8192  ;;  %p3555_p8 = scmp.lt.s32.totalorder %s5766_s20, %s3553_s21 }
  0x49   : > { %325 = vst.msk [vmem:[#allocation2 + $0xd0] sm:$0x3] %vm300_vm1, %v3619_v0  ;;  %328 = vst.msk [vmem:[#allocation2 + $0xe8] sm:$0x3] %vm300_vm1, %v3619_v0  ;;  %v689_v29 = vadd.f32 %v657_v16, %v588_v19  ;;  %v658_v32 = vmul.f32 %v3862_v14, %v621_v26  ;;  %v362_v62 = vld [vmem:[%s3774_s15 + $0x48] sm:$0xff]  ;;  %v363_v63 = vld [vmem:[%s3774_s15 + $0x50] sm:$0xff]  ;;  %p3551_p13 = pneg %p3550_p12  ;;  %p3556_p10 = scmp.lt.s32.totalorder %s3554_s9, %s3548_s29 }
  0x4a   : > { %326 = vst.msk [vmem:[#allocation2 + $0xd8] sm:$0xff] %vm297_vm0, %v3619_v0  ;;  %327 = vst.msk [vmem:[#allocation2 + $0xe0] sm:$0xff] %vm297_vm0, %v3619_v0  ;;  %v589_v39 = vadd.f32 %v557_v25, %v456_v24 }
  0x4b   : > { %329 = vst.msk [vmem:[#allocation2 + $0xf0] sm:$0xff] %vm297_vm0, %v3619_v0  ;;  %330 = vst.msk [vmem:[#allocation2 + $0xf8] sm:$0xff] %vm297_vm0, %v3619_v0  ;;  %p3557_p0 = por %p3556_p10, %p3555_p8 }
  0x4c   : > { %331 = vst.msk [vmem:[#allocation2 + $0x100] sm:$0x3] %vm300_vm1, %v3619_v0  ;;  %334 = vst.msk [vmem:[#allocation2 + $0x118] sm:$0x3] %vm300_vm1, %v3619_v0  ;;  %v690_v48 = vadd.f32 %v658_v32, %v589_v39  ;;  %v370_v39 = vld [vmem:[%s3774_s15 + $0x88] sm:$0xff] }
  0x4d   : > { %332 = vst.msk [vmem:[#allocation2 + $0x108] sm:$0xff] %vm297_vm0, %v3619_v0  ;;  %333 = vst.msk [vmem:[#allocation2 + $0x110] sm:$0xff] %vm297_vm0, %v3619_v0  ;;  %p3558_p2 = pnand %p3557_p0, %p3551_p13 }
  0x4e   : > { %335 = vst.msk [vmem:[#allocation2 + $0x120] sm:$0xff] %vm297_vm0, %v3619_v0  ;;  %336 = vst.msk [vmem:[#allocation2 + $0x128] sm:$0xff] %vm297_vm0, %v3619_v0 }
  0x4f   : > { %337 = vst.msk [vmem:[#allocation2 + $0x130] sm:$0x3] %vm300_vm1, %v3619_v0  ;;  %340 = vst.msk [vmem:[#allocation2 + $0x148] sm:$0x3] %vm300_vm1, %v3619_v0 }
  0x50   : > { %338 = vst.msk [vmem:[#allocation2 + $0x138] sm:$0xff] %vm297_vm0, %v3619_v0  ;;  %339 = vst.msk [vmem:[#allocation2 + $0x140] sm:$0xff] %vm297_vm0, %v3619_v0 }
  0x51   : > { %341 = vst.msk [vmem:[#allocation2 + $0x150] sm:$0xff] %vm297_vm0, %v3619_v0  ;;  %342 = vst.msk [vmem:[#allocation2 + $0x158] sm:$0xff] %vm297_vm0, %v3619_v0 }
  0x52   : > { %343 = vst.msk [vmem:[#allocation2 + $0x160] sm:$0x3] %vm300_vm1, %v3619_v0  ;;  %346 = vst.msk [vmem:[#allocation2 + $0x178] sm:$0x3] %vm300_vm1, %v3619_v0 }
  0x53   : > { %344 = vst.msk [vmem:[#allocation2 + $0x168] sm:$0xff] %vm297_vm0, %v3619_v0  ;;  %345 = vst.msk [vmem:[#allocation2 + $0x170] sm:$0xff] %vm297_vm0, %v3619_v0 }
  0x54   : > { %347 = vst.msk [vmem:[#allocation2 + $0x180] sm:$0xff] %vm297_vm0, %v3619_v0  ;;  %348 = vst.msk [vmem:[#allocation2 + $0x188] sm:$0xff] %vm297_vm0, %v3619_v0 }
  0x55   : > { %349 = vst.msk [vmem:[#allocation2 + $0x190] sm:$0x3] %vm300_vm1, %v3619_v0  ;;  %352 = vst.msk [vmem:[#allocation2 + $0x1a8] sm:$0x3] %vm300_vm1, %v3619_v0 }
  0x56   : > { %350 = vst.msk [vmem:[#allocation2 + $0x198] sm:$0xff] %vm297_vm0, %v3619_v0  ;;  %351 = vst.msk [vmem:[#allocation2 + $0x1a0] sm:$0xff] %vm297_vm0, %v3619_v0  ;;  %v364_v0 = vld [vmem:[%s3774_s15 + $0x58] sm:$0xff] }
  0x57   : > { %386 = vst.msk [vmem:[#allocation2 + $0x19] sm:$0xff] %vm297_vm0, %v353_v3  ;;  %387 = vst.msk [vmem:[#allocation2 + $0x21] sm:$0xff] %vm297_vm0, %v354_v5  ;;  %v365_v5 = vld [vmem:[%s3774_s15 + $0x60] sm:$0xff] }
  0x58   : > { %388 = vst.msk [vmem:[#allocation2 + $0x31] sm:$0xff] %vm297_vm0, %v355_v6  ;;  %389 = vst.msk [vmem:[#allocation2 + $0x39] sm:$0xff] %vm297_vm0, %v356_v7  ;;  %v366_v6 = vld [vmem:[%s3774_s15 + $0x68] sm:$0xff]  ;;  %v367_v7 = vld [vmem:[%s3774_s15 + $0x70] sm:$0xff] }
  0x59   : > { %390 = vst.msk [vmem:[#allocation2 + $0x49] sm:$0xff] %vm297_vm0, %v357_v27  ;;  %391 = vst.msk [vmem:[#allocation2 + $0x51] sm:$0xff] %vm297_vm0, %v358_v28 }
  0x5a   : > { %392 = vst.msk [vmem:[#allocation2 + $0x61] sm:$0xff] %vm297_vm0, %v359_v33  ;;  %393 = vst.msk [vmem:[#allocation2 + $0x69] sm:$0xff] %vm297_vm0, %v360_v56 }
  0x5b   : > { %394 = vst.msk [vmem:[#allocation2 + $0x79] sm:$0xff] %vm297_vm0, %v361_v57  ;;  %395 = vst.msk [vmem:[#allocation2 + $0x81] sm:$0xff] %vm297_vm0, %v362_v62 }
  0x5c   : > { %396 = vst.msk [vmem:[#allocation2 + $0x91] sm:$0xff] %vm297_vm0, %v363_v63  ;;  %397 = vst.msk [vmem:[#allocation2 + $0x99] sm:$0xff] %vm297_vm0, %v364_v0 }
  0x5d   : > { %398 = vst.msk [vmem:[#allocation2 + $0xa9] sm:$0xff] %vm297_vm0, %v365_v5  ;;  %399 = vst.msk [vmem:[#allocation2 + $0xb1] sm:$0xff] %vm297_vm0, %v366_v6 }
  0x5e   : > { %v721_v30 = vld [vmem:[#allocation2 + $0x18] sm:$0xff]  ;;  %v722_v43 = vld [vmem:[#allocation2 + $0x20] sm:$0xff]  ;;  %400 = vst.msk [vmem:[#allocation2 + $0xc1] sm:$0xff] %vm297_vm0, %v367_v7  ;;  %403 = vst.msk [vmem:[#allocation2 + $0xe1] sm:$0xff] %vm297_vm0, %v370_v39 }
  0x5f   : > { %v822_v31 = vld [vmem:[#allocation2 + $0x19] sm:$0xff]  ;;  %v758_v34 = vmul.f32 %v3869_v17, %v721_v30  ;;  %v457_v40 = vmul.f32 %v3851_v9, %v721_v30  ;;  %v3908_v41 = vld [vmem:[#allocation2 + $0x30] sm:$0xff]  ;;  %v759_v49 = vmul.f32 %v3869_v17, %v722_v43  ;;  %v823_v50 = vld [vmem:[#allocation2 + $0x21] sm:$0xff]  ;;  %v458_v15 = vmul.f32 %v3851_v9, %v722_v43 }
  0x60   : > { %v859_v35 = vmul.f32 %v3874_v18, %v822_v31  ;;  %v923_v36 = vld [vmem:[#allocation2 + $0x1a] sm:$0xff]  ;;  %v3910_v42 = vld [vmem:[#allocation2 + $0x31] sm:$0xff]  ;;  %v558_v44 = vmul.f32 %v3857_v12, %v822_v31  ;;  %v924_v51 = vld [vmem:[#allocation2 + $0x22] sm:$0xff]  ;;  %v1062_v52 = vmul.f32 %v3884_v23, %v3908_v41  ;;  %v860_v54 = vmul.f32 %v3874_v18, %v823_v50 }
  0x61   : > { %v790_v45 = vadd.f32 %v758_v34, %v689_v29  ;;  %v960_v46 = vmul.f32 %v3879_v20, %v923_v36  ;;  %v3914_v47 = vld [vmem:[#allocation2 + $0x32] sm:$0xff]  ;;  %v1163_v53 = vmul.f32 %v3899_v37, %v3910_v42  ;;  %v791_v59 = vadd.f32 %v759_v49, %v690_v48  ;;  %v3947_v13 = vld [vmem:[#allocation2 + $0x3a] sm:$0xff]  ;;  %v3960_v27 = vld [vmem:[#allocation2 + $0x48] sm:$0xff] }
  0x62   : > { %v3922_v55 = vld [vmem:[#allocation2 + $0x38] sm:$0xff]  ;;  %v961_v60 = vmul.f32 %v3879_v20, %v924_v51  ;;  %v590_v61 = vadd.f32 %v558_v44, %v457_v40  ;;  %v1264_v1 = vmul.f32 %v3904_v38, %v3914_v47  ;;  %v659_v3 = vmul.f32 %v3862_v14, %v923_v36  ;;  %v3962_v28 = vld [vmem:[#allocation2 + $0x49] sm:$0xff]  ;;  %v371_v40 = vld [vmem:[%s3774_s15 + $0x90] sm:$0xff] }
  0x63   : > { %v891_v58 = vadd.f32 %v859_v35, %v790_v45  ;;  %v1063_v2 = vmul.f32 %v3884_v23, %v3922_v55  ;;  %v760_v4 = vmul.f32 %v3869_v17, %v3908_v41  ;;  %v892_v10 = vadd.f32 %v860_v54, %v791_v59  ;;  %v3945_v11 = vld [vmem:[#allocation2 + $0x39] sm:$0xff]  ;;  %v368_v31 = vld [vmem:[%s3774_s15 + $0x78] sm:$0xff]  ;;  %v369_v36 = vld [vmem:[%s3774_s15 + $0x80] sm:$0xff]  ;;  %404 = vst.msk [vmem:[#allocation2 + $0xf1] sm:$0xff] %vm297_vm0, %v371_v40 }
  0x64   : > { %v559_v16 = vmul.f32 %v3857_v12, %v823_v50  ;;  %v1164_v19 = vmul.f32 %v3899_v37, %v3945_v11  ;;  %v1265_v21 = vmul.f32 %v3904_v38, %v3947_v13  ;;  %v691_v22 = vadd.f32 %v659_v3, %v590_v61  ;;  %401 = vst.msk [vmem:[#allocation2 + $0xc9] sm:$0xff] %vm297_vm0, %v368_v31  ;;  %v372_v48 = vld [vmem:[%s3774_s15 + $0x98] sm:$0xff]  ;;  %v373_v49 = vld [vmem:[%s3774_s15 + $0xa0] sm:$0xff]  ;;  %v374_v50 = vld [vmem:[%s3774_s15 + $0xa8] sm:$0xff] }
  0x65   : > { %v992_v8 = vadd.f32 %v960_v46, %v891_v58  ;;  %v861_v24 = vmul.f32 %v3874_v18, %v3910_v42  ;;  %v993_v26 = vadd.f32 %v961_v60, %v892_v10  ;;  %v660_v30 = vmul.f32 %v3862_v14, %v924_v51  ;;  %402 = vst.msk [vmem:[#allocation2 + $0xd9] sm:$0xff] %vm297_vm0, %v369_v36  ;;  %v3987_v51 = vld [vmem:[%s5817_s2] ss:$0 sm:$0xff]  ;;  %v3998_v60 = vld [vmem:[#allocation2 + $0x50] sm:$0xff] }
  0x66   : > { %v591_v29 = vadd.f32 %v559_v16, %v458_v15  ;;  %v792_v32 = vadd.f32 %v760_v4, %v691_v22  ;;  %v962_v33 = vmul.f32 %v3879_v20, %v3914_v47  ;;  %v1064_v34 = vmul.f32 %v3884_v23, %v3960_v27  ;;  %405 = vst.msk [vmem:[#allocation2 + $0xf9] sm:$0xff] %vm297_vm0, %v372_v48  ;;  %v1229_v3 = vld [vmem:[#allocation2 + $0x4a] sm:$0xff] }
  0x67   : > { %v1094_v25 = vadd.f32 %v1062_v52, %v992_v8  ;;  %v761_v35 = vmul.f32 %v3869_v17, %v3922_v55  ;;  %v1095_v44 = vadd.f32 %v1063_v2, %v993_v26  ;;  %v862_v46 = vmul.f32 %v3874_v18, %v3945_v11  ;;  %406 = vst.msk [vmem:[#allocation2 + $0x109] sm:$0xff] %vm297_vm0, %v373_v49  ;;  %v1129_v5 = vld [vmem:[#allocation2 + $0x51] sm:$0xff] }
  0x68   : > { %v692_v45 = vadd.f32 %v660_v30, %v591_v29  ;;  %v893_v52 = vadd.f32 %v861_v24, %v792_v32  ;;  %v963_v54 = vmul.f32 %v3879_v20, %v3947_v13  ;;  %v459_v56 = vmul.f32 %v3851_v9, %v3908_v41  ;;  %407 = vst.msk [vmem:[#allocation2 + $0x111] sm:$0xff] %vm297_vm0, %v374_v50  ;;  %v4030_v32 = vld [vmem:[#allocation2 + $0x60] sm:$0xff] }
  0x69   : > { %v1195_v43 = vadd.f32 %v1163_v53, %v1094_v25  ;;  %v1165_v53 = vmul.f32 %v3899_v37, %v3962_v28  ;;  %v1196_v58 = vadd.f32 %v1164_v19, %v1095_v44  ;;  %v560_v61 = vmul.f32 %v3857_v12, %v3910_v42  ;;  %v4044_v44 = vld [vmem:[#allocation2 + $0x62] sm:$0xff] }
  0x6a   : > { %v793_v59 = vadd.f32 %v761_v35, %v692_v45  ;;  %v994_v62 = vadd.f32 %v962_v33, %v893_v52  ;;  %v1065_v63 = vmul.f32 %v3884_v23, %v3998_v60  ;;  %v661_v41 = vmul.f32 %v3862_v14, %v3914_v47 }
  0x6b   : > { %v1296_v57 = vadd.f32 %v1264_v1, %v1195_v43  ;;  %v762_v0 = vmul.f32 %v3869_v17, %v3960_v27  ;;  %v1297_v1 = vadd.f32 %v1265_v21, %v1196_v58  ;;  %v592_v6 = vadd.f32 %v560_v61, %v459_v56  ;;  %v1230_v21 = vld [vmem:[#allocation2 + $0x52] sm:$0xff]  ;;  %v4058_v58 = vld [vmem:[#allocation2 + $0x69] sm:$0xff] }
  0x6c   : > { %v894_v4 = vadd.f32 %v862_v46, %v793_v59  ;;  %v1096_v7 = vadd.f32 %v1064_v34, %v994_v62  ;;  %v1266_v42 = vmul.f32 %v3904_v38, %v1229_v3  ;;  %v1166_v8 = vmul.f32 %v3899_v37, %v1129_v5  ;;  %v4034_v34 = vld [vmem:[#allocation2 + $0x61] sm:$0xff] }
  0x6d   : > { %v4009_v2 = vadd.f32 %v3987_v51, %v1296_v57  ;;  %v4016_v47 = vadd.f32 %v3987_v51, %v1297_v1  ;;  %v693_v15 = vadd.f32 %v661_v41, %v592_v6  ;;  %v863_v16 = vmul.f32 %v3874_v18, %v3962_v28  ;;  %v4056_v57 = vld [vmem:[#allocation2 + $0x68] sm:$0xff] }
  0x6e   : > { %v995_v10 = vadd.f32 %v963_v54, %v894_v4  ;;  %v1197_v19 = vadd.f32 %v1165_v53, %v1096_v7  ;;  %v460_v22 = vmul.f32 %v3851_v9, %v3922_v55  ;;  %v561_v24 = vmul.f32 %v3857_v12, %v3945_v11  ;;  %v4073_v4 = vld [vmem:[#allocation2 + $0x78] sm:$0xff] }
  0x6f   : > { %5868 = vst [vmem:[#allocation9_spill] sm:$0xff] %v4009_v2  ;;  %3211 = vmatprep.mubr.msk.f32.mxu0 %vm297_vm0, %v4009_v2  ;;  %5869 = vst [vmem:[#allocation10_spill] sm:$0xff] %v4016_v47  ;;  %v662_v25 = vmul.f32 %v3862_v14, %v3947_v13  ;;  %v1267_v29 = vmul.f32 %v3904_v38, %v1230_v21  ;;  %v794_v30 = vadd.f32 %v762_v0, %v693_v15  ;;  %v4069_v0 = vld [vmem:[#allocation2 + $0x6a] sm:$0xff] }
  0x70   : > { %3212 = vmatmul.mubr.msk.f32.vlgmr.msra.gmra.mrb[0].mxu0 %vm297_vm0, %v4016_v47  ;;  %v1097_v26 = vadd.f32 %v1065_v63, %v995_v10  ;;  %v964_v31 = vmul.f32 %v3879_v20, %v1229_v3  ;;  %v1298_v33 = vadd.f32 %v1266_v42, %v1197_v19  ;;  %v1066_v55 = vmul.f32 %v3884_v23, %v4030_v32  ;;  %v376_v19 = vld [vmem:[%s3774_s15 + $0xb8] sm:$0xff] }
  0x71   : > { %v593_v11 = vadd.f32 %v561_v24, %v460_v22  ;;  %v763_v13 = vmul.f32 %v3869_v17, %v3998_v60  ;;  %v895_v36 = vadd.f32 %v863_v16, %v794_v30  ;;  %v1167_v39 = vmul.f32 %v3899_v37, %v4034_v34  ;;  %v375_v16 = vld [vmem:[%s3774_s15 + $0xb0] sm:$0xff]  ;;  %409 = vst.msk [vmem:[#allocation2 + $0x129] sm:$0xff] %vm297_vm0, %v376_v19 }
  0x72   : > { %v1198_v35 = vadd.f32 %v1166_v8, %v1097_v26  ;;  %v864_v40 = vmul.f32 %v3874_v18, %v1129_v5  ;;  %v4042_v43 = vadd.f32 %v3987_v51, %v1298_v33  ;;  %v461_v46 = vmul.f32 %v3851_v9, %v3960_v27  ;;  %v4081_v8 = vld [vmem:[#allocation2 + $0x79] sm:$0xff]  ;;  %408 = vst.msk [vmem:[#allocation2 + $0x121] sm:$0xff] %vm297_vm0, %v375_v16 }
  0x73   : > { %v694_v45 = vadd.f32 %v662_v25, %v593_v11  ;;  %v562_v48 = vmul.f32 %v3857_v12, %v3962_v28  ;;  %v996_v50 = vadd.f32 %v964_v31, %v895_v36  ;;  %v1268_v52 = vmul.f32 %v3904_v38, %v4044_v44  ;;  %v378_v26 = vld [vmem:[%s3774_s15 + $0xc8] sm:$0xff]  ;;  %v381_v11 = vld [vmem:[%s3774_s15 + $0xe0] sm:$0xff] }
  0x74   : > { %5870 = vst [vmem:[#allocation11_spill] sm:$0xff] %v4042_v43  ;;  %v1299_v49 = vadd.f32 %v1267_v29, %v1198_v35  ;;  %v663_v53 = vmul.f32 %v3862_v14, %v1229_v3  ;;  %3214 = vmatprep.mubr.msk.f32.mxu0 %vm297_vm0, %v4042_v43  ;;  %v965_v56 = vmul.f32 %v3879_v20, %v1230_v21  ;;  %411 = vst.msk [vmem:[#allocation2 + $0x141] sm:$0xff] %vm297_vm0, %v378_v26  ;;  %v1033_v26 = vld [vmem:[#allocation2 + $0x90] sm:$0xff] }
  0x75   : > { %v795_v54 = vadd.f32 %v763_v13, %v694_v45  ;;  %v594_v27 = vadd.f32 %v562_v48, %v461_v46  ;;  %v764_v28 = vmul.f32 %v3869_v17, %v4030_v32  ;;  %v1098_v61 = vadd.f32 %v1066_v55, %v996_v50  ;;  %v380_v55 = vld [vmem:[%s3774_s15 + $0xd8] sm:$0xff]  ;;  %v382_v13 = vld [vmem:[%s3774_s15 + $0xe8] sm:$0xff]  ;;  %414 = vst.msk [vmem:[#allocation2 + $0x169] sm:$0xff] %vm297_vm0, %v381_v11  ;;  %v383_v45 = vld [vmem:[%s3774_s15 + $0xf0] sm:$0xff] }
  0x76   : > { %v4063_v59 = vadd.f32 %v3987_v51, %v1299_v49  ;;  %v1067_v62 = vmul.f32 %v3884_v23, %v4056_v57  ;;  %v1168_v63 = vmul.f32 %v3899_v37, %v4058_v58  ;;  %v865_v3 = vmul.f32 %v3874_v18, %v4034_v34  ;;  %413 = vst.msk [vmem:[#allocation2 + $0x159] sm:$0xff] %vm297_vm0, %v380_v55  ;;  %v384_v46 = vld [vmem:[%s3774_s15 + $0xf8] sm:$0xff]  ;;  %v1233_v49 = vld [vmem:[#allocation2 + $0x7a] sm:$0xff] }
  0x77   : > { %v896_v41 = vadd.f32 %v864_v40, %v795_v54  ;;  %v695_v1 = vadd.f32 %v663_v53, %v594_v27  ;;  %v462_v6 = vmul.f32 %v3851_v9, %v3998_v60  ;;  %v1199_v7 = vadd.f32 %v1167_v39, %v1098_v61  ;;  %415 = vst.msk [vmem:[#allocation2 + $0x171] sm:$0xff] %vm297_vm0, %v382_v13 }
  0x78   : > { %5871 = vst [vmem:[#allocation12_spill] sm:$0xff] %v4063_v59  ;;  %3215 = vmatmul.mubr.msk.f32.gmra.mrb[2].mxu0 %vm297_vm0, %v4063_v59  ;;  %v1269_v42 = vmul.f32 %v3904_v38, %v4069_v0  ;;  %v563_v10 = vmul.f32 %v3857_v12, %v1129_v5  ;;  %v664_v15 = vmul.f32 %v3862_v14, %v1230_v21  ;;  %v377_v5 = vld [vmem:[%s3774_s15 + $0xc0] sm:$0xff]  ;;  %v379_v21 = vld [vmem:[%s3774_s15 + $0xd0] sm:$0xff]  ;;  %416 = vst.msk [vmem:[#allocation2 + $0x181] sm:$0xff] %vm297_vm0, %v383_v45 }
  0x79   : > { %v997_v22 = vadd.f32 %v965_v56, %v896_v41  ;;  %v796_v60 = vadd.f32 %v764_v28, %v695_v1  ;;  %v966_v24 = vmul.f32 %v3879_v20, %v4044_v44  ;;  %v1068_v25 = vmul.f32 %v3884_v23, %v4073_v4  ;;  %410 = vst.msk [vmem:[#allocation2 + $0x139] sm:$0xff] %vm297_vm0, %v377_v5  ;;  %v1032_v28 = vld [vmem:[#allocation2 + $0x80] sm:$0xff] }
  0x7a   : > { %v1300_v29 = vadd.f32 %v1268_v52, %v1199_v7  ;;  %v1169_v30 = vmul.f32 %v3899_v37, %v4081_v8  ;;  %v595_v31 = vadd.f32 %v563_v10, %v462_v6  ;;  %v765_v33 = vmul.f32 %v3869_v17, %v4056_v57  ;;  %412 = vst.msk [vmem:[#allocation2 + $0x151] sm:$0xff] %vm297_vm0, %v379_v21  ;;  %v1134_v21 = vld [vmem:[#allocation2 + $0x91] sm:$0xff] }
  0x7b   : > { %v1099_v35 = vadd.f32 %v1067_v62, %v997_v22  ;;  %v897_v36 = vadd.f32 %v865_v3, %v796_v60  ;;  %v866_v39 = vmul.f32 %v3874_v18, %v4058_v58  ;;  %v463_v40 = vmul.f32 %v3851_v9, %v4030_v32  ;;  %417 = vst.msk [vmem:[#allocation2 + $0x189] sm:$0xff] %vm297_vm0, %v384_v46  ;;  %v1133_v62 = vld [vmem:[#allocation2 + $0x81] sm:$0xff] }
  0x7c   : > { %v4116_v48 = vadd.f32 %v3987_v51, %v1300_v29  ;;  %v696_v50 = vadd.f32 %v664_v15, %v595_v31  ;;  %v564_v52 = vmul.f32 %v3857_v12, %v4034_v34  ;;  %v665_v53 = vmul.f32 %v3862_v14, %v4044_v44 }
  0x7d   : > { %v1200_v32 = vadd.f32 %v1168_v63, %v1099_v35  ;;  %v998_v54 = vadd.f32 %v966_v24, %v897_v36  ;;  %v1270_v56 = vmul.f32 %v3904_v38, %v1233_v49  ;;  %v967_v27 = vmul.f32 %v3879_v20, %v4069_v0 }
  0x7e   : > { %5872 = vst [vmem:[#allocation13_spill] sm:$0xff] %v4116_v48  ;;  %3217 = vmatprep.mubr.msk.f32.mxu0 %vm297_vm0, %v4116_v48  ;;  %v797_v61 = vadd.f32 %v765_v33, %v696_v50  ;;  %v1069_v34 = vmul.f32 %v3884_v23, %v1032_v28  ;;  %v596_v44 = vadd.f32 %v564_v52, %v463_v40  ;;  %v1235_v50 = vld [vmem:[#allocation2 + $0x92] sm:$0xff] }
  0x7f   : > { %v766_v41 = vmul.f32 %v3869_v17, %v4073_v4  ;;  %v1301_v1 = vadd.f32 %v1269_v42, %v1200_v32  ;;  %v1100_v63 = vadd.f32 %v1068_v25, %v998_v54  ;;  %v1170_v3 = vmul.f32 %v3899_v37, %v1133_v62  ;;  %v1234_v25 = vld [vmem:[#allocation2 + $0x82] sm:$0xff]  ;;  %v1034_v32 = vld [vmem:[#allocation2 + $0x98] sm:$0xff] }
  0x80   : > { %v867_v6 = vmul.f32 %v3874_v18, %v4081_v8  ;;  %v898_v7 = vadd.f32 %v866_v39, %v797_v61  ;;  %v697_v10 = vadd.f32 %v665_v53, %v596_v44  ;;  %v464_v15 = vmul.f32 %v3851_v9, %v4056_v57 }
  0x81   : > { %v565_v16 = vmul.f32 %v3857_v12, %v4058_v58  ;;  %v4140_v19 = vadd.f32 %v3987_v51, %v1301_v1  ;;  %v1201_v22 = vadd.f32 %v1169_v30, %v1100_v63  ;;  %v968_v42 = vmul.f32 %v3879_v20, %v1233_v49 }
  0x82   : > { %v666_v60 = vmul.f32 %v3862_v14, %v4069_v0  ;;  %v999_v24 = vadd.f32 %v967_v27, %v898_v7  ;;  %v798_v5 = vadd.f32 %v766_v41, %v697_v10  ;;  %v767_v57 = vmul.f32 %v3869_v17, %v1032_v28 }
  0x83   : > { %5873 = vst [vmem:[#allocation14_spill] sm:$0xff] %v4140_v19  ;;  %v597_v29 = vadd.f32 %v565_v16, %v464_v15  ;;  %3218 = vmatmul.mubr.msk.f32.gmra.mrb[4].mxu0 %vm297_vm0, %v4140_v19  ;;  %v1302_v58 = vadd.f32 %v1270_v56, %v1201_v22  ;;  %v1271_v31 = vmul.f32 %v3904_v38, %v1234_v25  ;;  %v1236_v16 = vld [vmem:[#allocation2 + $0x9a] sm:$0xff] }
  0x84   : > { %v1070_v30 = vmul.f32 %v3884_v23, %v1033_v26  ;;  %v1171_v33 = vmul.f32 %v3899_v37, %v1134_v21  ;;  %v1101_v55 = vadd.f32 %v1069_v34, %v999_v24  ;;  %v899_v0 = vadd.f32 %v867_v6, %v798_v5 }
  0x85   : > { %v698_v11 = vadd.f32 %v666_v60, %v597_v29  ;;  %v868_v13 = vmul.f32 %v3874_v18, %v1133_v62  ;;  %v4153_v35 = vadd.f32 %v3987_v51, %v1302_v58  ;;  %v465_v36 = vmul.f32 %v3851_v9, %v4073_v4  ;;  %v1135_v4 = vld [vmem:[#allocation2 + $0x99] sm:$0xff]  ;;  %v1035_v60 = vld [vmem:[#allocation2 + $0xa8] sm:$0xff] }
  0x86   : > { %v566_v39 = vmul.f32 %v3857_v12, %v4081_v8  ;;  %v667_v40 = vmul.f32 %v3862_v14, %v1233_v49  ;;  %v1202_v45 = vadd.f32 %v1170_v3, %v1101_v55  ;;  %v1000_v46 = vadd.f32 %v968_v42, %v899_v0  ;;  %v1136_v58 = vld [vmem:[#allocation2 + $0xa9] sm:$0xff] }
  0x87   : > { %5874 = vst [vmem:[#allocation15_spill] sm:$0xff] %v4153_v35  ;;  %v799_v52 = vadd.f32 %v767_v57, %v698_v11  ;;  %v969_v53 = vmul.f32 %v3879_v20, %v1234_v25  ;;  %3220 = vmatprep.mubr.msk.f32.mxu0 %vm297_vm0, %v4153_v35  ;;  %v1272_v54 = vmul.f32 %v3904_v38, %v1235_v50 }
  0x88   : > { %v1071_v56 = vmul.f32 %v3884_v23, %v1034_v32  ;;  %v598_v27 = vadd.f32 %v566_v39, %v465_v36  ;;  %v768_v8 = vmul.f32 %v3869_v17, %v1033_v26  ;;  %v1303_v61 = vadd.f32 %v1271_v31, %v1202_v45  ;;  %v1237_v39 = vld [vmem:[#allocation2 + $0xaa] sm:$0xff] }
  0x89   : > { %v1102_v49 = vadd.f32 %v1070_v30, %v1000_v46  ;;  %v900_v34 = vadd.f32 %v868_v13, %v799_v52  ;;  %v1172_v44 = vmul.f32 %v3899_v37, %v1135_v4  ;;  %v869_v1 = vmul.f32 %v3874_v18, %v1134_v21 }
  0x8a   : > { %v699_v41 = vadd.f32 %v667_v40, %v598_v27  ;;  %v466_v63 = vmul.f32 %v3851_v9, %v1032_v28  ;;  %v567_v3 = vmul.f32 %v3857_v12, %v1133_v62  ;;  %v4171_v6 = vadd.f32 %v3987_v51, %v1303_v61 }
  0x8b   : > { %v1203_v7 = vadd.f32 %v1171_v33, %v1102_v49  ;;  %v1001_v10 = vadd.f32 %v969_v53, %v900_v34  ;;  %v668_v15 = vmul.f32 %v3862_v14, %v1234_v25  ;;  %v970_v42 = vmul.f32 %v3879_v20, %v1235_v50 }
  0x8c   : > { %5875 = vst [vmem:[#allocation16_spill] sm:$0xff] %v4171_v6  ;;  %v800_v22 = vadd.f32 %v768_v8, %v699_v41  ;;  %v599_v24 = vadd.f32 %v567_v3, %v466_v63  ;;  %v769_v5 = vmul.f32 %v3869_v17, %v1034_v32  ;;  %3221 = vmatmul.mubr.msk.f32.gmra.mrb[6].mxu0 %vm297_vm0, %v4171_v6  ;;  %v1238_v3 = vld [vmem:[#allocation2 + $0xb2] sm:$0xff] }
  0x8d   : > { %v1304_v28 = vadd.f32 %v1272_v54, %v1203_v7  ;;  %v1103_v62 = vadd.f32 %v1071_v56, %v1001_v10  ;;  %v1273_v29 = vmul.f32 %v3904_v38, %v1236_v16  ;;  %v1072_v57 = vmul.f32 %v3884_v23, %v1035_v60  ;;  %v1036_v54 = vld [vmem:[#allocation2 + $0xb0] sm:$0xff]  ;;  %v1037_v7 = vld [vmem:[#allocation2 + $0xc0] sm:$0xff] }
  0x8e   : > { %v901_v31 = vadd.f32 %v869_v1, %v800_v22  ;;  %v1173_v25 = vmul.f32 %v3899_v37, %v1136_v58  ;;  %v700_v30 = vadd.f32 %v668_v15, %v599_v24  ;;  %v870_v33 = vmul.f32 %v3874_v18, %v1135_v4  ;;  %v1137_v56 = vld [vmem:[#allocation2 + $0xb1] sm:$0xff] }
  0x8f   : > { %v4183_v55 = vadd.f32 %v3987_v51, %v1304_v28  ;;  %v1204_v0 = vadd.f32 %v1172_v44, %v1103_v62  ;;  %v467_v11 = vmul.f32 %v3851_v9, %v1033_v26  ;;  %v568_v13 = vmul.f32 %v3857_v12, %v1134_v21  ;;  %v1138_v62 = vld [vmem:[#allocation2 + $0xc1] sm:$0xff] }
  0x90   : > { %v1002_v36 = vadd.f32 %v970_v42, %v901_v31  ;;  %v801_v40 = vadd.f32 %v769_v5, %v700_v30  ;;  %v971_v45 = vmul.f32 %v3879_v20, %v1236_v16  ;;  %v669_v46 = vmul.f32 %v3862_v14, %v1235_v50 }
  0x91   : > { %5876 = vst [vmem:[#allocation17_spill] sm:$0xff] %v4183_v55  ;;  %3223 = vmatprep.mubr.msk.f32.mxu0 %vm297_vm0, %v4183_v55  ;;  %v1305_v52 = vadd.f32 %v1273_v29, %v1204_v0  ;;  %v1274_v53 = vmul.f32 %v3904_v38, %v1237_v39  ;;  %v600_v27 = vadd.f32 %v568_v13, %v467_v11  ;;  %v1239_v0 = vld [vmem:[#allocation2 + $0xc2] sm:$0xff] }
  0x92   : > { %v770_v26 = vmul.f32 %v3869_v17, %v1035_v60  ;;  %v1104_v8 = vadd.f32 %v1072_v57, %v1002_v36  ;;  %v902_v21 = vadd.f32 %v870_v33, %v801_v40  ;;  %v1073_v61 = vmul.f32 %v3884_v23, %v1036_v54 }
  0x93   : > { %v1174_v49 = vmul.f32 %v3899_v37, %v1137_v56  ;;  %v4196_v34 = vadd.f32 %v3987_v51, %v1305_v52  ;;  %v701_v50 = vadd.f32 %v669_v46, %v600_v27  ;;  %v871_v44 = vmul.f32 %v3874_v18, %v1136_v58  ;;  %v1139_v27 = vld [vmem:[#allocation2 + $0xc9] sm:$0xff] }
  0x94   : > { %v468_v41 = vmul.f32 %v3851_v9, %v1034_v32  ;;  %v1205_v1 = vadd.f32 %v1173_v25, %v1104_v8  ;;  %v1003_v63 = vadd.f32 %v971_v45, %v902_v21  ;;  %v569_v10 = vmul.f32 %v3857_v12, %v1135_v4 }
  0x95   : > { %5877 = vst [vmem:[#allocation18_spill] sm:$0xff] %v4196_v34  ;;  %v670_v15 = vmul.f32 %v3862_v14, %v1236_v16  ;;  %3224 = vmatmul.mubr.msk.f32.gmra.mrb[8].mxu0 %vm297_vm0, %v4196_v34  ;;  %v1275_v22 = vmul.f32 %v3904_v38, %v1238_v3  ;;  %v802_v42 = vadd.f32 %v770_v26, %v701_v50 }
  0x96   : > { %v972_v24 = vmul.f32 %v3879_v20, %v1237_v39  ;;  %v1074_v5 = vmul.f32 %v3884_v23, %v1037_v7  ;;  %v1306_v28 = vadd.f32 %v1274_v53, %v1205_v1  ;;  %v1105_v32 = vadd.f32 %v1073_v61, %v1003_v63  ;;  %v1038_v53 = vld [vmem:[#allocation2 + $0xc8] sm:$0xff] }
  0x97   : > { %v601_v29 = vadd.f32 %v569_v10, %v468_v41  ;;  %v771_v57 = vmul.f32 %v3869_v17, %v1036_v54  ;;  %v903_v31 = vadd.f32 %v871_v44, %v802_v42  ;;  %v1175_v4 = vmul.f32 %v3899_v37, %v1138_v62  ;;  %v1240_v44 = vld [vmem:[#allocation2 + $0xca] sm:$0xff] }
  0x98   : > { %v872_v16 = vmul.f32 %v3874_v18, %v1137_v56  ;;  %v469_v25 = vmul.f32 %v3851_v9, %v1035_v60  ;;  %v4212_v30 = vadd.f32 %v3987_v51, %v1306_v28  ;;  %v1206_v33 = vadd.f32 %v1174_v49, %v1105_v32 }
  0x99   : > { %v702_v11 = vadd.f32 %v670_v15, %v601_v29  ;;  %v570_v13 = vmul.f32 %v3857_v12, %v1136_v58  ;;  %v1004_v36 = vadd.f32 %v972_v24, %v903_v31  ;;  %v1276_v40 = vmul.f32 %v3904_v38, %v1239_v0  ;;  %v1039_v15 = vld [vmem:[#allocation2 + $0xd8] sm:$0xff] }
  0x9a   : > { %5878 = vst [vmem:[#allocation19_spill] sm:$0xff] %v4212_v30  ;;  %v973_v45 = vmul.f32 %v3879_v20, %v1238_v3  ;;  %v671_v46 = vmul.f32 %v3862_v14, %v1237_v39  ;;  %3226 = vmatprep.mubr.msk.f32.mxu0 %vm297_vm0, %v4212_v30  ;;  %v1307_v52 = vadd.f32 %v1275_v22, %v1206_v33  ;;  %v1140_v29 = vld [vmem:[#allocation2 + $0xd9] sm:$0xff] }
  0x9b   : > { %v803_v60 = vadd.f32 %v771_v57, %v702_v11  ;;  %v602_v26 = vadd.f32 %v570_v13, %v469_v25  ;;  %v772_v8 = vmul.f32 %v3869_v17, %v1037_v7  ;;  %v1106_v21 = vadd.f32 %v1074_v5, %v1004_v36  ;;  %v1241_v11 = vld [vmem:[#allocation2 + $0xda] sm:$0xff] }
  0x9c   : > { %v1075_v58 = vmul.f32 %v3884_v23, %v1038_v53  ;;  %v1176_v61 = vmul.f32 %v3899_v37, %v1139_v27  ;;  %v873_v49 = vmul.f32 %v3874_v18, %v1138_v62  ;;  %v4225_v50 = vadd.f32 %v3987_v51, %v1307_v52 }
  0x9d   : > { %v904_v39 = vadd.f32 %v872_v16, %v803_v60  ;;  %v703_v41 = vadd.f32 %v671_v46, %v602_v26  ;;  %v470_v1 = vmul.f32 %v3851_v9, %v1036_v54  ;;  %v1207_v63 = vadd.f32 %v1175_v4, %v1106_v21  ;;  %v1040_v26 = vld [vmem:[#allocation2 + $0xe0] sm:$0xff] }
  0x9e   : > { %5879 = vst [vmem:[#allocation20_spill] sm:$0xff] %v4225_v50  ;;  %v1277_v10 = vmul.f32 %v3904_v38, %v1240_v44  ;;  %v571_v22 = vmul.f32 %v3857_v12, %v1137_v56  ;;  %v672_v42 = vmul.f32 %v3862_v14, %v1238_v3  ;;  %3227 = vmatmul.mubr.msk.f32.gmra.mrb[10].mxu0 %vm297_vm0, %v4225_v50  ;;  %v1141_v21 = vld [vmem:[#allocation2 + $0xe1] sm:$0xff] }
  0x9f   : > { %v1005_v24 = vadd.f32 %v973_v45, %v904_v39  ;;  %v804_v5 = vadd.f32 %v772_v8, %v703_v41  ;;  %v974_v28 = vmul.f32 %v3879_v20, %v1239_v0  ;;  %v1076_v32 = vmul.f32 %v3884_v23, %v1039_v15 }
  0xa0   : > { %v1308_v57 = vadd.f32 %v1276_v40, %v1207_v63  ;;  %v1177_v54 = vmul.f32 %v3899_v37, %v1140_v29  ;;  %v603_v31 = vadd.f32 %v571_v22, %v470_v1  ;;  %v773_v4 = vmul.f32 %v3869_v17, %v1038_v53 }
  0xa1   : > { %v1107_v16 = vadd.f32 %v1075_v58, %v1005_v24  ;;  %v905_v56 = vadd.f32 %v873_v49, %v804_v5  ;;  %v874_v3 = vmul.f32 %v3874_v18, %v1139_v27  ;;  %v471_v25 = vmul.f32 %v3851_v9, %v1037_v7 }
  0xa2   : > { %v4240_v33 = vadd.f32 %v3987_v51, %v1308_v57  ;;  %v704_v13 = vadd.f32 %v672_v42, %v603_v31  ;;  %v572_v36 = vmul.f32 %v3857_v12, %v1138_v62  ;;  %v673_v40 = vmul.f32 %v3862_v14, %v1239_v0  ;;  %v1041_v31 = vld [vmem:[#allocation2 + $0xf0] sm:$0xff] }
  0xa3   : > { %v1208_v45 = vadd.f32 %v1176_v61, %v1107_v16  ;;  %v1006_v46 = vadd.f32 %v974_v28, %v905_v56  ;;  %v1278_v52 = vmul.f32 %v3904_v38, %v1241_v11  ;;  %v975_v60 = vmul.f32 %v3879_v20, %v1240_v44 }
  0xa4   : > { %5880 = vst [vmem:[#allocation21_spill] sm:$0xff] %v4240_v33  ;;  %3229 = vmatprep.mubr.msk.f32.mxu0 %vm297_vm0, %v4240_v33  ;;  %v805_v7 = vadd.f32 %v773_v4, %v704_v13  ;;  %v1077_v8 = vmul.f32 %v3884_v23, %v1040_v26  ;;  %v604_v58 = vadd.f32 %v572_v36, %v471_v25  ;;  %v1142_v4 = vld [vmem:[#allocation2 + $0xf1] sm:$0xff] }
  0xa5   : > { %v774_v49 = vmul.f32 %v3869_v17, %v1039_v15  ;;  %v1309_v62 = vadd.f32 %v1277_v10, %v1208_v45  ;;  %v1108_v39 = vadd.f32 %v1076_v32, %v1006_v46  ;;  %v1178_v0 = vmul.f32 %v3899_v37, %v1141_v21  ;;  %v1242_v32 = vld [vmem:[#allocation2 + $0xe2] sm:$0xff] }
  0xa6   : > { %v875_v61 = vmul.f32 %v3874_v18, %v1140_v29  ;;  %v906_v41 = vadd.f32 %v874_v3, %v805_v7  ;;  %v705_v1 = vadd.f32 %v673_v40, %v604_v58  ;;  %v472_v63 = vmul.f32 %v3851_v9, %v1038_v53  ;;  %v1243_v58 = vld [vmem:[#allocation2 + $0xf2] sm:$0xff] }
  0xa7   : > { %v573_v22 = vmul.f32 %v3857_v12, %v1139_v27  ;;  %v4255_v42 = vadd.f32 %v3987_v51, %v1309_v62  ;;  %v1209_v24 = vadd.f32 %v1177_v54, %v1108_v39  ;;  %v976_v5 = vmul.f32 %v3879_v20, %v1241_v11 }
  0xa8   : > { %v674_v28 = vmul.f32 %v3862_v14, %v1240_v44  ;;  %v1007_v10 = vadd.f32 %v975_v60, %v906_v41  ;;  %v806_v57 = vadd.f32 %v774_v49, %v705_v1  ;;  %v775_v56 = vmul.f32 %v3869_v17, %v1040_v26  ;;  %v1143_v41 = vld [vmem:[#allocation2 + $0xf9] sm:$0xff] }
  0xa9   : > { %5881 = vst [vmem:[#allocation22_spill] sm:$0xff] %v4255_v42  ;;  %v605_v16 = vadd.f32 %v573_v22, %v472_v63  ;;  %3230 = vmatmul.mubr.msk.f32.gmra.mrb[12].mxu0 %vm297_vm0, %v4255_v42  ;;  %v1310_v53 = vadd.f32 %v1278_v52, %v1209_v24  ;;  %v1279_v27 = vmul.f32 %v3904_v38, %v1242_v32 }
  0xaa   : > { %v1078_v54 = vmul.f32 %v3884_v23, %v1041_v31  ;;  %v1179_v3 = vmul.f32 %v3899_v37, %v1142_v4  ;;  %v1109_v25 = vadd.f32 %v1077_v8, %v1007_v10  ;;  %v907_v44 = vadd.f32 %v875_v61, %v806_v57  ;;  %v1042_v8 = vld [vmem:[#allocation2 + $0xf8] sm:$0xff] }
  0xab   : > { %v706_v13 = vadd.f32 %v674_v28, %v605_v16  ;;  %v876_v36 = vmul.f32 %v3874_v18, %v1141_v21  ;;  %v4267_v40 = vadd.f32 %v3987_v51, %v1310_v53  ;;  %v473_v45 = vmul.f32 %v3851_v9, %v1039_v15  ;;  %v1244_v53 = vld [vmem:[#allocation2 + $0xfa] sm:$0xff] }
  0xac   : > { %v574_v46 = vmul.f32 %v3857_v12, %v1140_v29  ;;  %v675_v52 = vmul.f32 %v3862_v14, %v1241_v11  ;;  %v1210_v60 = vadd.f32 %v1178_v0, %v1109_v25  ;;  %v1008_v7 = vadd.f32 %v976_v5, %v907_v44  ;;  %v1043_v25 = vld [vmem:[#allocation2 + $0x108] sm:$0xff] }
  0xad   : > { %5882 = vst [vmem:[#allocation23_spill] sm:$0xff] %v4267_v40  ;;  %v807_v49 = vadd.f32 %v775_v56, %v706_v13  ;;  %v977_v62 = vmul.f32 %v3879_v20, %v1242_v32  ;;  %3232 = vmatprep.mubr.msk.f32.mxu0 %vm297_vm0, %v4267_v40  ;;  %v1280_v39 = vmul.f32 %v3904_v38, %v1243_v58 }
  0xae   : > { %v1079_v61 = vmul.f32 %v3884_v23, %v1042_v8  ;;  %v606_v15 = vadd.f32 %v574_v46, %v473_v45  ;;  %v776_v29 = vmul.f32 %v3869_v17, %v1041_v31  ;;  %v1311_v1 = vadd.f32 %v1279_v27, %v1210_v60  ;;  %v1144_v45 = vld [vmem:[#allocation2 + $0x109] sm:$0xff] }
  0xaf   : > { %v1110_v11 = vadd.f32 %v1078_v54, %v1008_v7  ;;  %v908_v0 = vadd.f32 %v876_v36, %v807_v49  ;;  %v1180_v63 = vmul.f32 %v3899_v37, %v1143_v41  ;;  %v877_v24 = vmul.f32 %v3874_v18, %v1142_v4 }
  0xb0   : > { %v707_v22 = vadd.f32 %v675_v52, %v606_v15  ;;  %v474_v5 = vmul.f32 %v3851_v9, %v1040_v26  ;;  %v575_v28 = vmul.f32 %v3857_v12, %v1141_v21  ;;  %v4283_v10 = vadd.f32 %v3987_v51, %v1311_v1  ;;  %v1245_v15 = vld [vmem:[#allocation2 + $0x10a] sm:$0xff] }
  0xb1   : > { %v1211_v57 = vadd.f32 %v1179_v3, %v1110_v11  ;;  %v1009_v16 = vadd.f32 %v977_v62, %v908_v0  ;;  %v676_v56 = vmul.f32 %v3862_v14, %v1242_v32  ;;  %v978_v54 = vmul.f32 %v3879_v20, %v1243_v58 }
  0xb2   : > { %5883 = vst [vmem:[#allocation24_spill] sm:$0xff] %v4283_v10  ;;  %v808_v27 = vadd.f32 %v776_v29, %v707_v22  ;;  %v607_v44 = vadd.f32 %v575_v28, %v474_v5  ;;  %v777_v13 = vmul.f32 %v3869_v17, %v1042_v8  ;;  %3233 = vmatmul.mubr.msk.f32.gmra.mrb[14].mxu0 %vm297_vm0, %v4283_v10  ;;  %v5903_v10 = vmov 1.0  }
  0xb3   : > { %v1312_v26 = vadd.f32 %v1280_v39, %v1211_v57  ;;  %v1111_v21 = vadd.f32 %v1079_v61, %v1009_v16  ;;  %v1281_v36 = vmul.f32 %v3904_v38, %v1244_v53  ;;  %v1080_v3 = vmul.f32 %v3884_v23, %v1043_v25  ;;  %v4320_v16 = vld [vmem:[%s5816_s1] ss:$0 sm:$0xff] }
  0xb4   : > { %v909_v46 = vadd.f32 %v877_v24, %v808_v27  ;;  %v1181_v32 = vmul.f32 %v3899_v37, %v1144_v45  ;;  %v708_v52 = vadd.f32 %v676_v56, %v607_v44  ;;  %v878_v60 = vmul.f32 %v3874_v18, %v1143_v41  ;;  %v4304_v24 = vld [vmem:[#allocation2 + $0x110] sm:$0xff]  ;;  %v4323_v44 = vld [vmem:[#allocation2 + $0x120] sm:$0xff] }
  0xb5   : > { %v4295_v7 = vadd.f32 %v3987_v51, %v1312_v26  ;;  %v1212_v49 = vadd.f32 %v1180_v63, %v1111_v21  ;;  %v475_v62 = vmul.f32 %v3851_v9, %v1041_v31  ;;  %v576_v39 = vmul.f32 %v3857_v12, %v1142_v4  ;;  %v4306_v63 = vld [vmem:[#allocation2 + $0x111] sm:$0xff] }
  0xb6   : > { %v1010_v61 = vadd.f32 %v978_v54, %v909_v46  ;;  %v809_v29 = vadd.f32 %v777_v13, %v708_v52  ;;  %v979_v1 = vmul.f32 %v3879_v20, %v1244_v53  ;;  %v677_v11 = vmul.f32 %v3862_v14, %v1243_v58  ;;  %v1246_v54 = vld [vmem:[#allocation2 + $0x112] sm:$0xff]  ;;  %v4328_v13 = vld [vmem:[%s5816_s1 + $0x1] ss:$0 sm:$0xff] }
  0xb7   : > { %5884 = vst [vmem:[#allocation25_spill] sm:$0xff] %v4295_v7  ;;  %3235 = vmatprep.mubr.msk.f32.mxu0 %vm297_vm0, %v4295_v7  ;;  %v1313_v0 = vadd.f32 %v1281_v36, %v1212_v49  ;;  %v1282_v22 = vmul.f32 %v3904_v38, %v1245_v15  ;;  %v608_v9 = vadd.f32 %v576_v39, %v475_v62  ;;  %v1146_v52 = vld [vmem:[#allocation2 + $0x121] sm:$0xff] }
  0xb8   : > { %v778_v12 = vmul.f32 %v3869_v17, %v1043_v25  ;;  %v1112_v31 = vadd.f32 %v1080_v3, %v1010_v61  ;;  %v910_v4 = vadd.f32 %v878_v60, %v809_v29  ;;  %v1081_v5 = vmul.f32 %v3884_v23, %v4304_v24  ;;  %v4346_v49 = vld [vmem:[%s5816_s1 + $0x3] ss:$0 sm:$0xff] }
  0xb9   : > { %v1182_v14 = vmul.f32 %v3899_v37, %v4306_v63  ;;  %v4314_v58 = vadd.f32 %v3987_v51, %v1313_v0  ;;  %v709_v28 = vadd.f32 %v677_v11, %v608_v9  ;;  %v879_v57 = vmul.f32 %v3874_v18, %v1144_v45  ;;  %v4334_v18 = vld [vmem:[%s5816_s1 + $0x2] ss:$0 sm:$0xff] }
  0xba   : > { %v476_v17 = vmul.f32 %v4320_v16, %v1042_v8  ;;  %v1213_v56 = vadd.f32 %v1181_v32, %v1112_v31  ;;  %v1011_v27 = vadd.f32 %v979_v1, %v910_v4  ;;  %v577_v26 = vmul.f32 %v4328_v13, %v1143_v41  ;;  %v1247_v11 = vld [vmem:[#allocation2 + $0x122] sm:$0xff] }
  0xbb   : > { %5885 = vst [vmem:[#allocation26_spill] sm:$0xff] %v4314_v58  ;;  %v678_v21 = vmul.f32 %v4334_v18, %v1244_v53  ;;  %3236 = vmatmul.mubr.msk.f32.gmra.mrb[16].mxu0 %vm297_vm0, %v4314_v58  ;;  %v1283_v8 = vmul.f32 %v3904_v38, %v1246_v54  ;;  %v810_v36 = vadd.f32 %v778_v12, %v709_v28  ;;  %v4367_v12 = vld [vmem:[%s5816_s1 + $0x5] ss:$0 sm:$0xff]  ;;  %v1147_v28 = vld [vmem:[#allocation2 + $0x129] sm:$0xff] }
  0xbc   : > { %v980_v3 = vmul.f32 %v3879_v20, %v1245_v15  ;;  %v1082_v46 = vmul.f32 %v3884_v23, %v4323_v44  ;;  %v1314_v32 = vadd.f32 %v1282_v22, %v1213_v56  ;;  %v1113_v41 = vadd.f32 %v1081_v5, %v1011_v27  ;;  %v4354_v20 = vld [vmem:[%s5816_s1 + $0x4] ss:$0 sm:$0xff] }
  0xbd   : > { %v609_v60 = vadd.f32 %v577_v26, %v476_v17  ;;  %v779_v53 = vmul.f32 %v4346_v49, %v4304_v24  ;;  %v911_v62 = vadd.f32 %v879_v57, %v810_v36  ;;  %v1183_v39 = vmul.f32 %v3899_v37, %v1146_v52  ;;  %v4378_v17 = vld [vmem:[%s5816_s1 + $0x6] ss:$0 sm:$0xff]  ;;  %v1248_v36 = vld [vmem:[#allocation2 + $0x12a] sm:$0xff] }
  0xbe   : > { %v880_v23 = vmul.f32 %v4354_v20, %v4306_v63  ;;  %v477_v61 = vmul.f32 %v4320_v16, %v1043_v25  ;;  %v4360_v29 = vadd.f32 %v3987_v51, %v1314_v32  ;;  %v1214_v1 = vadd.f32 %v1182_v14, %v1113_v41  ;;  %v1046_v14 = vld [vmem:[#allocation2 + $0x128] sm:$0xff] }
  0xbf   : > { %v710_v0 = vadd.f32 %v678_v21, %v609_v60  ;;  %v578_v22 = vmul.f32 %v4328_v13, %v1144_v45  ;;  %v1012_v9 = vadd.f32 %v980_v3, %v911_v62  ;;  %v1284_v37 = vmul.f32 %v3904_v38, %v1247_v11  ;;  %v4396_v41 = vld [vmem:[%s5816_s1 + $0x8] ss:$0 sm:$0xff] }
  0xc0   : > { %5886 = vst [vmem:[#allocation27_spill] sm:$0xff] %v4360_v29  ;;  %v981_v31 = vmul.f32 %v4367_v12, %v1246_v54  ;;  %v679_v25 = vmul.f32 %v4334_v18, %v1245_v15  ;;  %3238 = vmatprep.mubr.msk.f32.mxu0 %vm297_vm0, %v4360_v29  ;;  %v1315_v4 = vadd.f32 %v1283_v8, %v1214_v1  ;;  %v4384_v15 = vld [vmem:[%s5816_s1 + $0x7] ss:$0 sm:$0xff] }
  0xc1   : > { %v811_v5 = vadd.f32 %v779_v53, %v710_v0  ;;  %v610_v45 = vadd.f32 %v578_v22, %v477_v61  ;;  %v780_v38 = vmul.f32 %v4346_v49, %v4323_v44  ;;  %v1114_v57 = vadd.f32 %v1082_v46, %v1012_v9  ;;  %v1047_v53 = vld [vmem:[#allocation2 + $0x138] sm:$0xff] }
  0xc2   : > { %v1083_v56 = vmul.f32 %v4378_v17, %v1046_v14  ;;  %v1184_v27 = vmul.f32 %v4384_v15, %v1147_v28  ;;  %v881_v26 = vmul.f32 %v4354_v20, %v1146_v52  ;;  %v4389_v21 = vadd.f32 %v3987_v51, %v1315_v4  ;;  %v1148_v0 = vld [vmem:[#allocation2 + $0x139] sm:$0xff] }
  0xc3   : > { %v912_v8 = vadd.f32 %v880_v23, %v811_v5  ;;  %v711_v3 = vadd.f32 %v679_v25, %v610_v45  ;;  %v478_v46 = vmul.f32 %v4320_v16, %v4304_v24  ;;  %v1215_v32 = vadd.f32 %v1183_v39, %v1114_v57 }
  0xc4   : > { %5887 = vst [vmem:[#allocation28_spill] sm:$0xff] %v4389_v21  ;;  %v1285_v60 = vmul.f32 %v4396_v41, %v1248_v36  ;;  %v579_v62 = vmul.f32 %v4328_v13, %v4306_v63  ;;  %v680_v61 = vmul.f32 %v4334_v18, %v1246_v54  ;;  %3239 = vmatmul.mubr.msk.f32.gmra.mrb[18].mxu0 %vm297_vm0, %v4389_v21 }
  0xc5   : > { %v1013_v23 = vadd.f32 %v981_v31, %v912_v8  ;;  %v812_v1 = vadd.f32 %v780_v38, %v711_v3  ;;  %v982_v24 = vmul.f32 %v4367_v12, %v1247_v11  ;;  %v1084_v39 = vmul.f32 %v4378_v17, %v1047_v53  ;;  %v1249_v38 = vld [vmem:[#allocation2 + $0x13a] sm:$0xff] }
  0xc6   : > { %v1316_v22 = vadd.f32 %v1284_v37, %v1215_v32  ;;  %v1185_v9 = vmul.f32 %v4384_v15, %v1148_v0  ;;  %v611_v25 = vadd.f32 %v579_v62, %v478_v46  ;;  %v781_v4 = vmul.f32 %v4346_v49, %v1046_v14 }
  0xc7   : > { %v1115_v5 = vadd.f32 %v1083_v56, %v1013_v23  ;;  %v913_v63 = vadd.f32 %v881_v26, %v812_v1  ;;  %v882_v54 = vmul.f32 %v4354_v20, %v1147_v28  ;;  %v479_v45 = vmul.f32 %v4320_v16, %v4323_v44  ;;  %v1048_v26 = vld [vmem:[#allocation2 + $0x140] sm:$0xff] }
  0xc8   : > { %v4412_v31 = vadd.f32 %v3987_v51, %v1316_v22  ;;  %v712_v57 = vadd.f32 %v680_v61, %v611_v25  ;;  %v580_v8 = vmul.f32 %v4328_v13, %v1146_v52  ;;  %v681_v37 = vmul.f32 %v4334_v18, %v1247_v11  ;;  %v1149_v23 = vld [vmem:[#allocation2 + $0x141] sm:$0xff] }
  0xc9   : > { %v1216_v3 = vadd.f32 %v1184_v27, %v1115_v5  ;;  %v1014_v46 = vadd.f32 %v982_v24, %v913_v63  ;;  %v1286_v32 = vmul.f32 %v4396_v41, %v1249_v38  ;;  %v983_v56 = vmul.f32 %v4367_v12, %v1248_v36 }
  0xca   : > { %5888 = vst [vmem:[#allocation29_spill] sm:$0xff] %v4412_v31  ;;  %3241 = vmatprep.mubr.msk.f32.mxu0 %vm297_vm0, %v4412_v31  ;;  %v813_v44 = vadd.f32 %v781_v4, %v712_v57  ;;  %v1085_v62 = vmul.f32 %v4378_v17, %v1048_v26  ;;  %v612_v1 = vadd.f32 %v580_v8, %v479_v45  ;;  %v1150_v31 = vld [vmem:[#allocation2 + $0x151] sm:$0xff] }
  0xcb   : > { %v782_v61 = vmul.f32 %v4346_v49, %v1047_v53  ;;  %v1317_v52 = vadd.f32 %v1285_v60, %v1216_v3  ;;  %v1116_v22 = vadd.f32 %v1084_v39, %v1014_v46  ;;  %v1186_v11 = vmul.f32 %v4384_v15, %v1149_v23  ;;  %v1250_v39 = vld [vmem:[#allocation2 + $0x142] sm:$0xff]  ;;  %v1049_v46 = vld [vmem:[#allocation2 + $0x150] sm:$0xff] }
  0xcc   : > { %v883_v27 = vmul.f32 %v4354_v20, %v1148_v0  ;;  %v914_v24 = vadd.f32 %v882_v54, %v813_v44  ;;  %v713_v25 = vadd.f32 %v681_v37, %v612_v1  ;;  %v480_v5 = vmul.f32 %v4320_v16, %v1046_v14 }
  0xcd   : > { %v581_v63 = vmul.f32 %v4328_v13, %v1147_v28  ;;  %v4427_v4 = vadd.f32 %v3987_v51, %v1317_v52  ;;  %v1217_v57 = vadd.f32 %v1185_v9, %v1116_v22  ;;  %v984_v45 = vmul.f32 %v4367_v12, %v1249_v38 }
  0xce   : > { %v682_v8 = vmul.f32 %v4334_v18, %v1248_v36  ;;  %v1015_v60 = vadd.f32 %v983_v56, %v914_v24  ;;  %v814_v3 = vadd.f32 %v782_v61, %v713_v25  ;;  %v783_v54 = vmul.f32 %v4346_v49, %v1048_v26 }
  0xcf   : > { %5889 = vst [vmem:[#allocation30_spill] sm:$0xff] %v4427_v4  ;;  %v613_v29 = vadd.f32 %v581_v63, %v480_v5  ;;  %3242 = vmatmul.mubr.msk.f32.gmra.mrb[20].mxu0 %vm297_vm0, %v4427_v4  ;;  %v1318_v14 = vadd.f32 %v1286_v32, %v1217_v57  ;;  %v1287_v28 = vmul.f32 %v4396_v41, %v1250_v39  ;;  %v1251_v5 = vld [vmem:[#allocation2 + $0x152] sm:$0xff] }
  0xd0   : > { %v1086_v9 = vmul.f32 %v4378_v17, %v1049_v46  ;;  %v1187_v37 = vmul.f32 %v4384_v15, %v1150_v31  ;;  %v1117_v44 = vadd.f32 %v1085_v62, %v1015_v60  ;;  %v915_v36 = vadd.f32 %v883_v27, %v814_v3  ;;  %v1050_v62 = vld [vmem:[#allocation2 + $0x158] sm:$0xff] }
  0xd1   : > { %v714_v56 = vadd.f32 %v682_v8, %v613_v29  ;;  %v884_v1 = vmul.f32 %v4354_v20, %v1149_v23  ;;  %v4439_v61 = vadd.f32 %v3987_v51, %v1318_v14  ;;  %v481_v52 = vmul.f32 %v4320_v16, %v1047_v53  ;;  %v1151_v27 = vld [vmem:[#allocation2 + $0x159] sm:$0xff] }
  0xd2   : > { %v582_v22 = vmul.f32 %v4328_v13, %v1148_v0  ;;  %v683_v32 = vmul.f32 %v4334_v18, %v1249_v38  ;;  %v1218_v24 = vadd.f32 %v1186_v11, %v1117_v44  ;;  %v1016_v25 = vadd.f32 %v984_v45, %v915_v36  ;;  %v4457_v44 = vld [vmem:[%s5817_s2] ss:$0 sm:$0xff] }
  0xd3   : > { %5890 = vst [vmem:[#allocation31_spill] sm:$0xff] %v4439_v61  ;;  %v815_v63 = vadd.f32 %v783_v54, %v714_v56  ;;  %v985_v57 = vmul.f32 %v4367_v12, %v1250_v39  ;;  %3244 = vmatprep.mubr.msk.f32.mxu0 %vm297_vm0, %v4439_v61  ;;  %v1288_v29 = vmul.f32 %v4396_v41, %v1251_v5 }
  0xd4   : > { %v1087_v51 = vmul.f32 %v4378_v17, %v1050_v62  ;;  %v614_v53 = vadd.f32 %v582_v22, %v481_v52  ;;  %v784_v0 = vmul.f32 %v4346_v49, %v1049_v46  ;;  %v1319_v8 = vadd.f32 %v1287_v28, %v1218_v24 }
  0xd5   : > { %v1118_v38 = vadd.f32 %v1086_v9, %v1016_v25  ;;  %v916_v11 = vadd.f32 %v884_v1, %v815_v63  ;;  %v1188_v45 = vmul.f32 %v4384_v15, %v1151_v27  ;;  %v885_v3 = vmul.f32 %v4354_v20, %v1150_v31  ;;  %v1252_v1 = vld [vmem:[#allocation2 + $0x15a] sm:$0xff] }
  0xd6   : > { %v715_v60 = vadd.f32 %v683_v32, %v614_v53  ;;  %v482_v54 = vmul.f32 %v4320_v16, %v1048_v26  ;;  %v583_v14 = vmul.f32 %v4328_v13, %v1149_v23  ;;  %v4460_v36 = vadd.f32 %v4457_v44, %v1319_v8  ;;  %v1051_v32 = vld [vmem:[#allocation2 + $0x168] sm:$0xff] }
  0xd7   : > { %v1219_v28 = vadd.f32 %v1187_v37, %v1118_v38  ;;  %v1017_v9 = vadd.f32 %v985_v57, %v916_v11  ;;  %v684_v56 = vmul.f32 %v4334_v18, %v1250_v39  ;;  %v986_v22 = vmul.f32 %v4367_v12, %v1251_v5  ;;  %v1152_v57 = vld [vmem:[#allocation2 + $0x169] sm:$0xff] }
  0xd8   : > { %5891 = vst [vmem:[#allocation32_spill] sm:$0xff] %v4460_v36  ;;  %v816_v52 = vadd.f32 %v784_v0, %v715_v60  ;;  %v615_v26 = vadd.f32 %v583_v14, %v482_v54  ;;  %v785_v23 = vmul.f32 %v4346_v49, %v1050_v62  ;;  %3245 = vmatmul.mubr.msk.f32.gmra.mrb[22].mxu0 %vm297_vm0, %v4460_v36  ;;  %v1253_v54 = vld [vmem:[#allocation2 + $0x16a] sm:$0xff] }
  0xd9   : > { %v1320_v24 = vadd.f32 %v1288_v29, %v1219_v28  ;;  %v1119_v25 = vadd.f32 %v1087_v51, %v1017_v9  ;;  %v1289_v63 = vmul.f32 %v4396_v41, %v1252_v1  ;;  %v1088_v37 = vmul.f32 %v4378_v17, %v1051_v32 }
  0xda   : > { %v917_v53 = vadd.f32 %v885_v3, %v816_v52  ;;  %v1189_v39 = vmul.f32 %v4384_v15, %v1152_v57  ;;  %v716_v0 = vadd.f32 %v684_v56, %v615_v26  ;;  %v886_v8 = vmul.f32 %v4354_v20, %v1151_v27  ;;  %v1052_v52 = vld [vmem:[#allocation2 + $0x170] sm:$0xff] }
  0xdb   : > { %v4472_v38 = vadd.f32 %v4457_v44, %v1320_v24  ;;  %v1220_v11 = vadd.f32 %v1188_v45, %v1119_v25  ;;  %v483_v60 = vmul.f32 %v4320_v16, %v1049_v46  ;;  %v584_v29 = vmul.f32 %v4328_v13, %v1150_v31  ;;  %v1153_v26 = vld [vmem:[#allocation2 + $0x171] sm:$0xff] }
  0xdc   : > { %v1018_v51 = vadd.f32 %v986_v22, %v917_v53  ;;  %v817_v14 = vadd.f32 %v785_v23, %v716_v0  ;;  %v987_v28 = vmul.f32 %v4367_v12, %v1252_v1  ;;  %v685_v3 = vmul.f32 %v4334_v18, %v1251_v5 }
  0xdd   : > { %5892 = vst [vmem:[#allocation33_spill] sm:$0xff] %v4472_v38  ;;  %3247 = vmatprep.mubr.msk.f32.mxu0 %vm297_vm0, %v4472_v38  ;;  %v1321_v9 = vadd.f32 %v1289_v63, %v1220_v11  ;;  %v1290_v56 = vmul.f32 %v4396_v41, %v1253_v54  ;;  %v616_v45 = vadd.f32 %v584_v29, %v483_v60  ;;  %v1254_v38 = vld [vmem:[#allocation2 + $0x172] sm:$0xff] }
  0xde   : > { %v786_v46 = vmul.f32 %v4346_v49, %v1051_v32  ;;  %v1120_v24 = vadd.f32 %v1088_v37, %v1018_v51  ;;  %v918_v31 = vadd.f32 %v886_v8, %v817_v14  ;;  %v1089_v22 = vmul.f32 %v4378_v17, %v1052_v52 }
  0xdf   : > { %v1190_v23 = vmul.f32 %v4384_v15, %v1153_v26  ;;  %v4485_v25 = vadd.f32 %v4457_v44, %v1321_v9  ;;  %v717_v5 = vadd.f32 %v685_v3, %v616_v45  ;;  %v887_v53 = vmul.f32 %v4354_v20, %v1152_v57  ;;  %v1053_v9 = vld [vmem:[#allocation2 + $0x180] sm:$0xff] }
  0xe0   : > { %v484_v63 = vmul.f32 %v4320_v16, %v1050_v62  ;;  %v1221_v0 = vadd.f32 %v1189_v39, %v1120_v24  ;;  %v1019_v11 = vadd.f32 %v987_v28, %v918_v31  ;;  %v585_v60 = vmul.f32 %v4328_v13, %v1151_v27 }
  0xe1   : > { %5893 = vst [vmem:[#allocation34_spill] sm:$0xff] %v4485_v25  ;;  %v686_v37 = vmul.f32 %v4334_v18, %v1252_v1  ;;  %3248 = vmatmul.mubr.msk.f32.gmra.mrb[24].mxu0 %vm297_vm0, %v4485_v25  ;;  %v1291_v8 = vmul.f32 %v4396_v41, %v1254_v38  ;;  %v818_v29 = vadd.f32 %v786_v46, %v717_v5  ;;  %v1154_v46 = vld [vmem:[#allocation2 + $0x181] sm:$0xff] }
  0xe2   : > { %v988_v51 = vmul.f32 %v4367_v12, %v1253_v54  ;;  %v1322_v14 = vadd.f32 %v1290_v56, %v1221_v0  ;;  %v1121_v3 = vadd.f32 %v1089_v22, %v1019_v11  ;;  %v617_v45 = vadd.f32 %v585_v60, %v484_v63 }
  0xe3   : > { %v787_v62 = vmul.f32 %v4346_v49, %v1052_v52  ;;  %v919_v39 = vadd.f32 %v887_v53, %v818_v29  ;;  %v1090_v28 = vmul.f32 %v4378_v17, %v1053_v9  ;;  %v888_v27 = vmul.f32 %v4354_v20, %v1153_v26  ;;  %v1054_v29 = vld [vmem:[#allocation2 + $0x188] sm:$0xff] }
  0xe4   : > { %v485_v1 = vmul.f32 %v4320_v16, %v1051_v32  ;;  %v4500_v24 = vadd.f32 %v4457_v44, %v1322_v14  ;;  %v1222_v31 = vadd.f32 %v1190_v23, %v1121_v3  ;;  %v718_v5 = vadd.f32 %v686_v37, %v617_v45  ;;  %v1255_v32 = vld [vmem:[#allocation2 + $0x182] sm:$0xff] }
  0xe5   : > { %v586_v56 = vmul.f32 %v4328_v13, %v1152_v57  ;;  %v1020_v22 = vadd.f32 %v988_v51, %v919_v39  ;;  %v1191_v63 = vmul.f32 %v4384_v15, %v1154_v46  ;;  %v989_v0 = vmul.f32 %v4367_v12, %v1254_v38 }
  0xe6   : > { %5894 = vst [vmem:[#allocation35_spill] sm:$0xff] %v4500_v24  ;;  %v687_v53 = vmul.f32 %v4334_v18, %v1253_v54  ;;  %3250 = vmatprep.mubr.msk.f32.mxu0 %vm297_vm0, %v4500_v24  ;;  %v1323_v11 = vadd.f32 %v1291_v8, %v1222_v31  ;;  %v819_v60 = vadd.f32 %v787_v62, %v718_v5  ;;  %v1155_v62 = vld [vmem:[#allocation2 + $0x189] sm:$0xff]  ;;  %v1055_v5 = vld [vmem:[#allocation2 + $0x198] sm:$0xff]  ;;  %v5839_v24 = vmov 1.0  }
  0xe7   : > { %v618_v14 = vadd.f32 %v586_v56, %v485_v1  ;;  %v788_v23 = vmul.f32 %v4346_v49, %v1053_v9  ;;  %v1122_v37 = vadd.f32 %v1090_v28, %v1020_v22  ;;  %v1292_v57 = vmul.f32 %v4396_v41, %v1255_v32 }
  0xe8   : > { %v1091_v51 = vmul.f32 %v4378_v17, %v1054_v29  ;;  %v889_v3 = vmul.f32 %v4354_v20, %v1154_v46  ;;  %v4513_v45 = vadd.f32 %v4457_v44, %v1323_v11  ;;  %v920_v54 = vadd.f32 %v888_v27, %v819_v60  ;;  %v1156_v11 = vld [vmem:[#allocation2 + $0x199] sm:$0xff] }
  0xe9   : > { %v719_v39 = vadd.f32 %v687_v53, %v618_v14  ;;  %v486_v8 = vmul.f32 %v4320_v16, %v1052_v52  ;;  %v1223_v31 = vadd.f32 %v1191_v63, %v1122_v37  ;;  %v587_v1 = vmul.f32 %v4328_v13, %v1153_v26  ;;  %v1256_v53 = vld [vmem:[#allocation2 + $0x18a] sm:$0xff] }
  0xea   : > { %5895 = vst [vmem:[#allocation36_spill] sm:$0xff] %v4513_v45  ;;  %v688_v9 = vmul.f32 %v4334_v18, %v1254_v38  ;;  %3251 = vmatmul.mubr.msk.f32.gmra.mrb[26].mxu0 %vm297_vm0, %v4513_v45  ;;  %v1021_v28 = vadd.f32 %v989_v0, %v920_v54  ;;  %v1192_v46 = vmul.f32 %v4384_v15, %v1155_v62  ;;  %v1257_v0 = vld [vmem:[#allocation2 + $0x19a] sm:$0xff] }
  0xeb   : > { %v820_v56 = vadd.f32 %v788_v23, %v719_v39  ;;  %v990_v22 = vmul.f32 %v4367_v12, %v1255_v32  ;;  %v1324_v27 = vadd.f32 %v1292_v57, %v1223_v31  ;;  %v619_v16 = vadd.f32 %v587_v1, %v486_v8  ;;  %v1056_v57 = vld [vmem:[#allocation2 + $0x1a0] sm:$0xff] }
  0xec   : > { %v789_v52 = vmul.f32 %v4346_v49, %v1054_v29  ;;  %v1123_v63 = vadd.f32 %v1091_v51, %v1021_v28  ;;  %v1293_v13 = vmul.f32 %v4396_v41, %v1256_v53  ;;  %v1092_v18 = vmul.f32 %v4378_v17, %v1055_v5  ;;  %v1157_v39 = vld [vmem:[#allocation2 + $0x1a1] sm:$0xff] }
  0xed   : > { %v921_v26 = vadd.f32 %v889_v3, %v820_v56  ;;  %v4526_v38 = vadd.f32 %v4457_v44, %v1324_v27  ;;  %v720_v60 = vadd.f32 %v688_v9, %v619_v16  ;;  %v890_v14 = vmul.f32 %v4354_v20, %v1155_v62  ;;  %v1258_v5 = vld [vmem:[#allocation2 + $0x1a2] sm:$0xff] }
  0xee   : > { %v1224_v32 = vadd.f32 %v1192_v46, %v1123_v63  ;;  %v1193_v37 = vmul.f32 %v4384_v15, %v1156_v11  ;;  %v991_v29 = vmul.f32 %v4367_v12, %v1256_v53  ;;  %v1294_v54 = vmul.f32 %v4396_v41, %v1257_v0  ;;  %v2562_v63 = vld [vmem:[%s5820_s5 + $0x8] sm:$0xff] }
  0xef   : > { %5896 = vst [vmem:[#allocation37_spill] sm:$0xff] %v4526_v38  ;;  %v1022_v23 = vadd.f32 %v990_v22, %v921_v26  ;;  %3253 = vmatprep.mubr.msk.f32.mxu0 %vm297_vm0, %v4526_v38  ;;  %v821_v49 = vadd.f32 %v789_v52, %v720_v60  ;;  %v1093_v31 = vmul.f32 %v4378_v17, %v1056_v57 }
  0xf0   : > { %v1325_v51 = vadd.f32 %v1293_v13, %v1224_v32  ;;  %v1194_v9 = vmul.f32 %v4384_v15, %v1157_v39  ;;  %v1295_v46 = vmul.f32 %v4396_v41, %v1258_v5  ;;  %v4555_v15 = vld [vmem:[%s5819_s4] ss:$0 sm:$0xff] }
  0xf1   : > { %v1124_v3 = vadd.f32 %v1092_v18, %v1022_v23  ;;  %v922_v8 = vadd.f32 %v890_v14, %v821_v49 }
  0xf2   : > { %v4536_v20 = vadd.f32 %v4457_v44, %v1325_v51 }
  0xf3   : > { %v1225_v62 = vadd.f32 %v1193_v37, %v1124_v3  ;;  %v1023_v1 = vadd.f32 %v991_v29, %v922_v8 }
  0xf4   : > { %5897 = vst [vmem:[#allocation38_spill] sm:$0xff] %v4536_v20  ;;  %3254 = vmatmul.mubr.msk.f32.gmra.mrb[28].mxu0 %vm297_vm0, %v4536_v20 }
  0xf5   : > { %v1326_v12 = vadd.f32 %v1294_v54, %v1225_v62  ;;  %v1125_v28 = vadd.f32 %v1093_v31, %v1023_v1 }
  0xf7   : > { %v4543_v56 = vadd.f32 %v4457_v44, %v1326_v12  ;;  %v1226_v22 = vadd.f32 %v1194_v9, %v1125_v28 }
  0xf9   : > { %5898 = vst [vmem:[#allocation39_spill] sm:$0xff] %v4543_v56  ;;  %3256 = vmatprep.mubr.msk.f32.mxu0 %vm297_vm0, %v4543_v56  ;;  %v1327_v17 = vadd.f32 %v1295_v46, %v1226_v22 }
  0xfb   : > { %v4548_v27 = vadd.f32 %v4457_v44, %v1327_v17  ;;  %v2561_v44 = vld [vmem:[%s5820_s5] sm:$0xff]  ;;  %v2563_v17 = vld [vmem:[%s5820_s5 + $0x10] sm:$0xff] }
  0xfc   : > { %v3319_v26 = vpack.c.bf16 %v2562_v63, %v2561_v44 }
  0xfd   : > { %5899 = vst [vmem:[#allocation40_spill] sm:$0xff] %v4548_v27  ;;  %3257 = vmatmul.mubr.msk.f32.gmra.mrb[30].mxu0 %vm297_vm0, %v4548_v27 }
  0xfe   : > { %3320 = vmatprep.subr.bf16.mxu1 %v3319_v26 }
  0xff   : > { %3322 = vmatpush3.bf16.msra.mxu1 %v3319_v26 }
 0x143   : > { %v3213_v41 = vpop.f32.mrb[0].mxu0 }
 0x144   : > { %v4558_v53 = vadd.f32 %v3213_v41, %v4555_v15  ;;  %v1538_v11 = vpop.f32.mrb[1].mxu0 }
 0x145   : > { %v4574_v60 = vadd.f32 %v4555_v15, %v1538_v11  ;;  %v2564_v11 = vld [vmem:[%s5820_s5 + $0x18] sm:$0xff] }
 0x146   : > { %v4561_v16 = vmul.f32 0.70710677, %v4558_v53  ;;  %v3323_v63 = vpack.c.bf16 %v2564_v11, %v2563_v17 }
 0x147   : > { %v4589_v49 = vmul.f32 0.70710677, %v4574_v60 }
 0x148   : > { %v4564_v52 = vand.u32 2147483647, %v4561_v16  ;;  %3324 = vmatprep.subr.bf16.mxu1 %v3323_v63  ;;  %vm1730_vm2 = vcmp.lt.f32.partialorder %v4561_v16, 0.0 }
 0x149   : > { %v1793_v39 = vand.u32 2147483647, %v4589_v49  ;;  %3326 = vmatpush3.bf16.msra.mxu1 %v3323_v63  ;;  %vm1729_vm3 = vcmp.lt.f32.partialorder %v4589_v49, 0.0  ;;  %v4664_v45 = vsel %vm1730_vm2, -1.0, %v5839_v24 }
 0x14a   : > { %v1826_v13 = vmul.f32 0.3275911, %v4564_v52  ;;  %v2242_v11 = vsub.f32 0.0, %v4564_v52 }
 0x14b   : > { %v3216_v18 = vpop.f32.mrb[2].mxu0  ;;  %v1825_v12 = vmul.f32 0.3275911, %v1793_v39 }
 0x14c   : > { %v1858_v0 = vadd.f32 1.0, %v1826_v13  ;;  %v4577_v14 = vadd.f32 %v3216_v18, %v4555_v15  ;;  %v1548_v32 = vpop.f32.mrb[3].mxu0 }
 0x14d   : > { %v4580_v23 = vadd.f32 %v4555_v15, %v1548_v32  ;;  %v1857_v13 = vadd.f32 1.0, %v1825_v12 }
 0x14e   : > { %3379 = vrcp.f32 %v1858_v0  ;;  %v4583_v37 = vmul.f32 0.70710677, %v4577_v14 }
 0x14f   : > { %v4586_v57 = vmul.f32 0.70710677, %v4580_v23 }
 0x150   : > { %v4592_v29 = vand.u32 2147483647, %v4583_v37  ;;  %vm1732_vm4 = vcmp.lt.f32.partialorder %v4583_v37, 0.0 }
 0x151   : > { %v4595_v51 = vand.u32 2147483647, %v4586_v57  ;;  %vm1731_vm5 = vcmp.lt.f32.partialorder %v4586_v57, 0.0 }
 0x152   : > { %v1828_v3 = vmul.f32 0.3275911, %v4592_v29  ;;  %v2244_v38 = vsub.f32 0.0, %v4592_v29  ;;  %v4720_v33 = vsel %vm1731_vm5, -1.0, %v5903_v10 }
 0x153   : > { %v1827_v54 = vmul.f32 0.3275911, %v4595_v51 }
 0x154   : > { %v1860_v8 = vadd.f32 1.0, %v1828_v3 }
 0x155   : > { %v1859_v31 = vadd.f32 1.0, %v1827_v54 }
 0x156   : > { %3381 = vrcp.f32 %v1860_v8  ;;  %v3219_v62 = vpop.f32.mrb[4].mxu0 }
 0x157   : > { %3383 = vrcp.f32 %v1859_v31  ;;  %v4601_v5 = vadd.f32 %v3219_v62, %v4555_v15  ;;  %v1558_v1 = vpop.f32.mrb[5].mxu0 }
 0x158   : > { %v4603_v9 = vpop.eup %3379  ;;  %v4606_v28 = vadd.f32 %v4555_v15, %v1558_v1  ;;  %3385 = vrcp.f32 %v1857_v13 }
 0x159   : > { %v1954_v46 = vmul.f32 1.0614054, %v4603_v9  ;;  %v4610_v22 = vmul.f32 0.70710677, %v4601_v5 }
 0x15a   : > { %v4616_v41 = vmul.f32 0.70710677, %v4606_v28 }
 0x15b   : > { %v4622_v44 = vand.u32 2147483647, %v4610_v22  ;;  %v1986_v18 = vadd.f32 -1.4531521, %v1954_v46  ;;  %vm1734_vm6 = vcmp.lt.f32.partialorder %v4610_v22, 0.0 }
 0x15c   : > { %v4625_v26 = vand.u32 2147483647, %v4616_v41  ;;  %vm1733_vm7 = vcmp.lt.f32.partialorder %v4616_v41, 0.0 }
 0x15d   : > { %v1830_v0 = vmul.f32 0.3275911, %v4622_v44  ;;  %v2018_v46 = vmul.f32 %v4603_v9, %v1986_v18 }
 0x15e   : > { %v1829_v32 = vmul.f32 0.3275911, %v4625_v26  ;;  %v2245_v57 = vsub.f32 0.0, %v4625_v26 }
 0x15f   : > { %v1862_v3 = vadd.f32 1.0, %v1830_v0  ;;  %v3222_v54 = vpop.f32.mrb[6].mxu0  ;;  %v2050_v27 = vadd.f32 1.4214138, %v2018_v46 }
 0x160   : > { %v4629_v8 = vpop.eup %3381  ;;  %v1861_v31 = vadd.f32 1.0, %v1829_v32  ;;  %v4632_v62 = vadd.f32 %v3222_v54, %v4555_v15  ;;  %v1568_v1 = vpop.f32.mrb[7].mxu0  ;;  %v2241_v32 = vsub.f32 0.0, %v1793_v39 }
 0x161   : > { %v4634_v12 = vpop.eup %3383  ;;  %v1956_v17 = vmul.f32 1.0614054, %v4629_v8  ;;  %3387 = vrcp.f32 %v1862_v3  ;;  %v4647_v18 = vadd.f32 %v4555_v15, %v1568_v1  ;;  %v2274_v3 = vmul.f32 %v2242_v11, %v4564_v52 }
 0x162   : > { %v1955_v63 = vmul.f32 1.0614054, %v4634_v12  ;;  %3389 = vrcp.f32 %v1861_v31  ;;  %v4641_v0 = vmul.f32 0.70710677, %v4632_v62  ;;  %v4660_v1 = vmul.f32 0.5, %v4558_v53  ;;  %v4673_v53 = vpop.eup %3385 }
 0x163   : > { %v1988_v13 = vadd.f32 -1.4531521, %v1956_v17  ;;  %v4657_v20 = vmul.f32 0.70710677, %v4647_v18  ;;  %v2273_v46 = vmul.f32 %v2241_v32, %v1793_v39  ;;  %v2082_v25 = vmul.f32 %v4603_v9, %v2050_v27  ;;  %5901 = vst [vmem:[#allocation42_spill] sm:$0xff] %v4673_v53 }
 0x164   : > { %v1987_v54 = vadd.f32 -1.4531521, %v1955_v63  ;;  %v4644_v56 = vand.u32 2147483647, %v4641_v0  ;;  %v2243_v63 = vsub.f32 0.0, %v4595_v51  ;;  %v2276_v32 = vmul.f32 %v2244_v38, %v4592_v29 }
 0x165   : > { %v2020_v17 = vmul.f32 %v4629_v8, %v1988_v13  ;;  %v4668_v13 = vmul.f32 0.5, %v4574_v60  ;;  %v4671_v61 = vand.u32 2147483647, %v4657_v20  ;;  %v2307_v39 = vmul.f32 1.442695, %v2274_v3 }
 0x166   : > { %v1832_v31 = vmul.f32 0.3275911, %v4644_v56  ;;  %v2019_v16 = vmul.f32 %v4634_v12, %v1987_v54  ;;  %v4679_v54 = vsel %vm1729_vm3, -1.0, %v5839_v24  ;;  %v4684_v60 = vmul.f32 0.5, %v4577_v14 }
 0x167   : > { %5900 = vst [vmem:[#allocation41_spill] sm:$0xff] %v4668_v13  ;;  %5902 = vst [vmem:[#allocation43_spill] sm:$0xff] %v4679_v54  ;;  %v2052_v27 = vadd.f32 1.4214138, %v2020_v17  ;;  %v2275_v4 = vmul.f32 %v2243_v63, %v4595_v51  ;;  %v1831_v21 = vmul.f32 0.3275911, %v4671_v61 }
 0x168   : > { %v1864_v52 = vadd.f32 1.0, %v1832_v31  ;;  %v3225_v11 = vpop.f32.mrb[8].mxu0  ;;  %v2305_v3 = vmul.f32 1.442695, %v2273_v46  ;;  %v2051_v38 = vadd.f32 1.4214138, %v2019_v16 }
 0x169   : > { %v1578_v36 = vpop.f32.mrb[9].mxu0  ;;  %v4692_v49 = vadd.f32 %v3225_v11, %v4555_v15  ;;  %v1863_v14 = vadd.f32 1.0, %v1831_v21  ;;  %v2311_v24 = vmul.f32 1.442695, %v2276_v32  ;;  %v1953_v63 = vmul.f32 1.0614054, %v4673_v53 }
 0x16a   : > { %3391 = vrcp.f32 %v1864_v52  ;;  %v2114_v52 = vadd.f32 -0.28449672, %v2082_v25  ;;  %v2084_v46 = vmul.f32 %v4629_v8, %v2052_v27  ;;  %v2309_v16 = vmul.f32 1.442695, %v2275_v4 }
 0x16b   : > { %v4681_v31 = vpop.eup %3387  ;;  %v4697_v51 = vmul.f32 0.70710677, %v4692_v49  ;;  %3393 = vrcp.f32 %v1863_v14  ;;  %v2083_v25 = vmul.f32 %v4634_v12, %v2051_v38  ;;  %v4704_v11 = vmul.f32 0.5, %v4580_v23 }
 0x16c   : > { %v4688_v7 = vpop.eup %3389  ;;  %v1958_v29 = vmul.f32 1.0614054, %v4681_v31  ;;  %v2246_v21 = vsub.f32 0.0, %v4622_v44  ;;  %v2146_v40 = vmul.f32 %v4603_v9, %v2114_v52  ;;  %3395 = vpow2.f32 %v2307_v39 }
 0x16d   : > { %v1957_v17 = vmul.f32 1.0614054, %v4688_v7  ;;  %v4711_v27 = vsel %vm1732_vm4, -1.0, %v5903_v10  ;;  %3397 = vpow2.f32 %v2311_v24  ;;  %v4717_v23 = vand.u32 2147483647, %v4697_v51 }
 0x16e   : > { %v1990_v58 = vadd.f32 -1.4531521, %v1958_v29  ;;  %v1985_v38 = vadd.f32 -1.4531521, %v1953_v63  ;;  %v2116_v14 = vadd.f32 -0.28449672, %v2084_v46  ;;  %3399 = vpow2.f32 %v2309_v16 }
 0x16f   : > { %v1989_v4 = vadd.f32 -1.4531521, %v1957_v17  ;;  %v2115_v52 = vadd.f32 -0.28449672, %v2083_v25  ;;  %v2278_v17 = vmul.f32 %v2246_v21, %v4622_v44  ;;  %v4727_v24 = vmul.f32 0.5, %v4601_v5 }
 0x170   : > { %v2022_v39 = vmul.f32 %v4681_v31, %v1990_v58  ;;  %v1834_v42 = vmul.f32 0.3275911, %v4717_v23  ;;  %v2178_v30 = vadd.f32 0.2548296, %v2146_v40  ;;  %v4733_v50 = vadd.f32 %v4555_v15, %v1578_v36 }
 0x171   : > { %v3228_v32 = vpop.f32.mrb[10].mxu0  ;;  %v2021_v63 = vmul.f32 %v4688_v7, %v1989_v4  ;;  %v2277_v58 = vmul.f32 %v2245_v57, %v4625_v26  ;;  %v2017_v44 = vmul.f32 %v4673_v53, %v1985_v38  ;;  %v2148_v5 = vmul.f32 %v4629_v8, %v2116_v14 }
 0x172   : > { %v4713_v29 = vpop.f32.mrb[11].mxu0  ;;  %v1866_v16 = vadd.f32 1.0, %v1834_v42  ;;  %v2054_v25 = vadd.f32 1.4214138, %v2022_v39  ;;  %v4741_v40 = vmul.f32 0.5, %v4606_v28  ;;  %v2147_v21 = vmul.f32 %v4634_v12, %v2115_v52 }
 0x173   : > { %v4745_v36 = vmul.f32 0.70710677, %v4733_v50  ;;  %v2210_v42 = vmul.f32 %v4603_v9, %v2178_v30  ;;  %v4751_v26 = vsel %vm1734_vm6, -1.0, %v5903_v10  ;;  %v2315_v57 = vmul.f32 1.442695, %v2278_v17 }
 0x174   : > { %v4723_v37 = vpop.eup %3391  ;;  %3401 = vrcp.f32 %v1866_v16  ;;  %v2053_v38 = vadd.f32 1.4214138, %v2021_v63  ;;  %v4754_v28 = vsel %vm1733_vm7, -1.0, %v5903_v10  ;;  %v2313_v41 = vmul.f32 1.442695, %v2277_v58 }
 0x175   : > { %v1960_v46 = vmul.f32 1.0614054, %v4723_v37  ;;  %v4747_v22 = vpop.eup %3393  ;;  %3403 = vpow2.f32 %v2305_v3  ;;  %v2049_v39 = vadd.f32 1.4214138, %v2017_v44  ;;  %v2086_v16 = vmul.f32 %v4681_v31, %v2054_v25 }
 0x176   : > { %v3396_v52 = vpop.eup %3395  ;;  %vm1736_vm8 = vcmp.lt.f32.partialorder %v4641_v0, 0.0  ;;  %v1959_v30 = vmul.f32 1.0614054, %v4747_v22  ;;  %v2179_v63 = vadd.f32 0.2548296, %v2147_v21  ;;  %v2248_v55 = vsub.f32 0.0, %v4644_v56 }
 0x177   : > { %v1992_v4 = vadd.f32 -1.4531521, %v1960_v46  ;;  %v2180_v46 = vadd.f32 0.2548296, %v2148_v5  ;;  %v3398_v17 = vpop.eup %3397  ;;  %v4766_v58 = vand.u32 2147483647, %v4745_v36  ;;  %v2370_v34 = vmul.f32 %v3396_v52, %v2210_v42 }
 0x178   : > { %v3400_v44 = vpop.eup %3399  ;;  %3405 = vpow2.f32 %v2315_v57  ;;  %v2085_v5 = vmul.f32 %v4688_v7, %v2053_v38  ;;  %v4770_v0 = vadd.f32 %v3228_v32, %v4555_v15  ;;  %v4773_v25 = vsel %vm1736_vm8, -1.0, %v5903_v10 }
 0x179   : > { %v2024_v3 = vmul.f32 %v4723_v37, %v1992_v4  ;;  %3407 = vpow2.f32 %v2313_v41  ;;  %v4776_v21 = vmul.f32 0.5, %v4632_v62  ;;  %v1833_v4 = vmul.f32 0.3275911, %v4766_v58 }
 0x17a   : > { %v2212_v35 = vmul.f32 %v4629_v8, %v2180_v46  ;;  %v2118_v6 = vadd.f32 -0.28449672, %v2086_v16  ;;  %v1991_v48 = vadd.f32 -1.4531521, %v1959_v30  ;;  %v4781_v42 = vmul.f32 0.70710677, %v4770_v0 }
 0x17b   : > { %v2211_v57 = vmul.f32 %v4634_v12, %v2179_v63  ;;  %v2056_v32 = vadd.f32 1.4214138, %v2024_v3  ;;  %v2280_v38 = vmul.f32 %v2248_v55, %v4644_v56  ;;  %v1865_v41 = vadd.f32 1.0, %v1833_v4 }
 0x17c   : > { %v4756_v14 = vpop.f32.mrb[12].mxu0  ;;  %v2402_v52 = vsub.f32 1.0, %v2370_v34  ;;  %v2117_v19 = vadd.f32 -0.28449672, %v2085_v5  ;;  %v2247_v62 = vsub.f32 0.0, %v4671_v61  ;;  %vm1735_vm9 = vcmp.lt.f32.partialorder %v4657_v20, 0.0 }
 0x17d   : > { %v4761_v9 = vpop.f32.mrb[13].mxu0  ;;  %v4787_v43 = vand.u32 2147483647, %v4781_v42  ;;  %v4793_v8 = vmul.f32 0.5, %v4647_v18  ;;  %3409 = vrcp.f32 %v1865_v41  ;;  %v4796_v12 = vmul.f32 %v4673_v53, %v2049_v39 }
 0x17e   : > { %v4789_v59 = vpop.eup %3401  ;;  %v2372_v55 = vmul.f32 %v3398_v17, %v2212_v35  ;;  %v2150_v34 = vmul.f32 %v4681_v31, %v2118_v6  ;;  %v2023_v56 = vmul.f32 %v4747_v22, %v1991_v48  ;;  %v2371_v63 = vmul.f32 %v3400_v44, %v2211_v57 }
 0x17f   : > { %5904 = vst [vmem:[#allocation44_spill] sm:$0xff] %v4796_v12  ;;  %v1962_v46 = vmul.f32 1.0614054, %v4789_v59  ;;  %v4803_v30 = vpop.eup %3403  ;;  %v2088_v3 = vmul.f32 %v4723_v37, %v2056_v32  ;;  %v2319_v18 = vmul.f32 1.442695, %v2280_v38  ;;  %v2434_v35 = vmul.f32 %v2402_v52, %v4664_v45 }
 0x180   : > { %5905 = vst [vmem:[#allocation45_spill] sm:$0xff] %v4803_v30  ;;  %v1836_v5 = vmul.f32 0.3275911, %v4787_v43  ;;  %v2149_v6 = vmul.f32 %v4688_v7, %v2117_v19  ;;  %v4814_v48 = vsel %vm1735_vm9, -1.0, %v5903_v10  ;;  %v2279_v39 = vmul.f32 %v2247_v62, %v4671_v61 }
 0x181   : > { %v1994_v17 = vadd.f32 -1.4531521, %v1962_v46  ;;  %v2250_v44 = vsub.f32 0.0, %v4717_v23  ;;  %v4820_v32 = vadd.f32 %v4555_v15, %v4713_v29  ;;  %v2404_v41 = vsub.f32 1.0, %v2372_v55 }
 0x182   : > { %v1868_v57 = vadd.f32 1.0, %v1836_v5  ;;  %v3406_v38 = vpop.eup %3405  ;;  %v2182_v45 = vadd.f32 0.2548296, %v2150_v34  ;;  %v2055_v52 = vadd.f32 1.4214138, %v2023_v56  ;;  %vm1738_vm10 = vcmp.lt.f32.partialorder %v4697_v51, 0.0 }
 0x183   : > { %v3408_v19 = vpop.eup %3407  ;;  %v2403_v20 = vsub.f32 1.0, %v2371_v63  ;;  %v2120_v2 = vadd.f32 -0.28449672, %v2088_v3  ;;  %v4824_v61 = vmul.f32 0.70710677, %v4820_v32  ;;  %v4828_v29 = vadd.f32 %v4756_v14, %v4555_v15 }
 0x184   : > { %3411 = vrcp.f32 %v1868_v57  ;;  %v2181_v62 = vadd.f32 0.2548296, %v2149_v6  ;;  %v2317_v46 = vmul.f32 1.442695, %v2279_v39  ;;  %v2498_v5 = vadd.f32 1.0, %v2434_v35 }
 0x185   : > { %v4801_v16 = vpop.f32.mrb[14].mxu0  ;;  %3413 = vpow2.f32 %v2319_v18  ;;  %v2026_v55 = vmul.f32 %v4789_v59, %v1994_v17  ;;  %v2282_v34 = vmul.f32 %v2250_v44, %v4717_v23  ;;  %v4833_v56 = vand.u32 2147483647, %v4824_v61 }
 0x186   : > { %v4807_v4 = vpop.f32.mrb[15].mxu0  ;;  %v2436_v63 = vmul.f32 %v2404_v41, %v4711_v27  ;;  %v2214_v3 = vmul.f32 %v4681_v31, %v2182_v45  ;;  %v2087_v6 = vmul.f32 %v4747_v22, %v2055_v52  ;;  %v4841_v18 = vsel %vm1738_vm10, -1.0, %v5903_v10 }
 0x187   : > { %v4845_v35 = vpop.eup %3409  ;;  %v2435_v23 = vmul.f32 %v2403_v20, %v4720_v33  ;;  %v2152_v39 = vmul.f32 %v4723_v37, %v2120_v2  ;;  %v1835_v17 = vmul.f32 0.3275911, %v4833_v56  ;;  %v4851_v27 = vmul.f32 0.70710677, %v4828_v29 }
 0x188   : > { %v2213_v44 = vmul.f32 %v4688_v7, %v2181_v62  ;;  %3415 = vpow2.f32 %v2317_v46  ;;  %v1961_v51 = vmul.f32 1.0614054, %v4845_v35  ;;  %v4859_v57 = vadd.f32 %v4555_v15, %v4761_v9 }
 0x189   : > { %v4862_v33 = vmul.f32 %v2498_v5, %v4660_v1  ;;  %v2058_v2 = vadd.f32 1.4214138, %v2026_v55  ;;  %v2323_v41 = vmul.f32 1.442695, %v2282_v34  ;;  %v1867_v45 = vadd.f32 1.0, %v1835_v17 }
 0x18a   : > { %v2500_v52 = vadd.f32 1.0, %v2436_v63  ;;  %v2374_v20 = vmul.f32 %v3406_v38, %v2214_v3  ;;  %v2119_v47 = vadd.f32 -0.28449672, %v2087_v6  ;;  %v1993_v13 = vadd.f32 -1.4531521, %v1961_v51 }
 0x18b   : > { %5906 = vst [vmem:[#allocation46_spill] sm:$0xff] %v4862_v33  ;;  %v2499_v54 = vadd.f32 1.0, %v2435_v23  ;;  %v2184_v30 = vadd.f32 0.2548296, %v2152_v39  ;;  %3417 = vrcp.f32 %v1867_v45  ;;  %v4865_v7 = vand.u32 2147483647, %v4851_v27 }
 0x18c   : > { %v2373_v62 = vmul.f32 %v3408_v19, %v2213_v44  ;;  %vm1737_vm11 = vcmp.lt.f32.partialorder %v4745_v36, 0.0  ;;  %v2249_v9 = vsub.f32 0.0, %v4766_v58  ;;  %v4870_v1 = vmul.f32 0.70710677, %v4859_v57 }
 0x18d   : > { %v2090_v38 = vmul.f32 %v4789_v59, %v2058_v2  ;;  %v4876_v5 = vmul.f32 0.5, %v4692_v49  ;;  %v2025_v55 = vmul.f32 %v4845_v35, %v1993_v13  ;;  %v1838_v34 = vmul.f32 0.3275911, %v4865_v7 }
 0x18e   : > { %v4843_v14 = vpop.f32.mrb[16].mxu0  ;;  %v4872_v46 = vpop.eup %3411  ;;  %v4881_v19 = vmul.f32 %v2500_v52, %v4684_v60  ;;  %v2406_v36 = vsub.f32 1.0, %v2374_v20  ;;  %v2151_v3 = vmul.f32 %v4747_v22, %v2119_v47  ;;  %3419 = vpow2.f32 %v2323_v41 }
 0x18f   : > { %v4853_v31 = vpop.f32.mrb[17].mxu0  ;;  %v3414_v63 = vpop.eup %3413  ;;  %v4885_v6 = vmul.f32 %v2499_v54, %v4704_v11  ;;  %v2216_v23 = vmul.f32 %v4723_v37, %v2184_v30  ;;  %v4889_v49 = vsel %vm1737_vm11, -1.0, %v5903_v10  ;;  %v1870_v39 = vadd.f32 1.0, %v1838_v34 }
 0x190   : > { %5907 = vst [vmem:[#allocation47_spill] sm:$0xff] %v4881_v19  ;;  %v2405_v17 = vsub.f32 1.0, %v2373_v62  ;;  %v2281_v44 = vmul.f32 %v2249_v9, %v4766_v58  ;;  %v1964_v60 = vmul.f32 1.0614054, %v4872_v46  ;;  %v4896_v51 = vand.u32 2147483647, %v4870_v1 }
 0x191   : > { %5908 = vst [vmem:[#allocation48_spill] sm:$0xff] %v4885_v6  ;;  %v2122_v54 = vadd.f32 -0.28449672, %v2090_v38  ;;  %v2057_v11 = vadd.f32 1.4214138, %v2025_v55  ;;  %3421 = vrcp.f32 %v1870_v39  ;;  %v4902_v37 = vadd.f32 %v4801_v16, %v4555_v15 }
 0x192   : > { %v3416_v30 = vpop.eup %3415  ;;  %v2438_v2 = vmul.f32 %v2406_v36, %v4751_v26  ;;  %v2183_v41 = vadd.f32 0.2548296, %v2151_v3  ;;  %v2252_v58 = vsub.f32 0.0, %v4787_v43  ;;  %v1837_v45 = vmul.f32 0.3275911, %v4896_v51 }
 0x193   : > { %v2376_v52 = vmul.f32 %v3414_v63, %v2216_v23  ;;  %v4908_v20 = vmul.f32 0.5, %v4733_v50  ;;  %v4911_v62 = vmul.f32 0.70710677, %v4902_v37  ;;  %v4915_v9 = vadd.f32 %v4555_v15, %v4807_v4 }
 0x194   : > { %v2437_v16 = vmul.f32 %v2405_v17, %v4754_v28  ;;  %vm1740_vm12 = vcmp.lt.f32.partialorder %v4781_v42, 0.0  ;;  %v1996_v26 = vadd.f32 -1.4531521, %v1964_v60  ;;  %v1869_v38 = vadd.f32 1.0, %v1837_v45 }
 0x195   : > { %v4919_v55 = vpop.eup %3417  ;;  %v2154_v34 = vmul.f32 %v4789_v59, %v2122_v54  ;;  %v2089_v50 = vmul.f32 %v4845_v35, %v2057_v11  ;;  %v2321_v63 = vmul.f32 1.442695, %v2281_v44  ;;  %v4924_v36 = vand.u32 2147483647, %v4911_v62 }
 0x196   : > { %v2502_v3 = vadd.f32 1.0, %v2438_v2  ;;  %v2215_v4 = vmul.f32 %v4747_v22, %v2183_v41  ;;  %v2284_v23 = vmul.f32 %v2252_v58, %v4787_v43  ;;  %v1963_v28 = vmul.f32 1.0614054, %v4919_v55 }
 0x197   : > { %v4891_v13 = vpop.f32.mrb[18].mxu0  ;;  %v2408_v39 = vsub.f32 1.0, %v2376_v52  ;;  %3423 = vrcp.f32 %v1869_v38  ;;  %v1840_v17 = vmul.f32 0.3275911, %v4924_v36  ;;  %v4931_v60 = vmul.f32 0.70710677, %v4915_v9 }
 0x198   : > { %v4898_v47 = vpop.f32.mrb[19].mxu0  ;;  %v3420_v54 = vpop.eup %3419  ;;  %v2501_v11 = vadd.f32 1.0, %v2437_v16  ;;  %v4936_v44 = vsel %vm1740_vm12, -1.0, %v5903_v10  ;;  %v2028_v22 = vmul.f32 %v4872_v46, %v1996_v26  ;;  %v4940_v43 = vmul.f32 0.5, %v4770_v0 }
 0x199   : > { %v2186_v2 = vadd.f32 0.2548296, %v2154_v34  ;;  %v2121_v41 = vadd.f32 -0.28449672, %v2089_v50  ;;  %3425 = vpow2.f32 %v2321_v63  ;;  %v1872_v58 = vadd.f32 1.0, %v1840_v17 }
 0x19a   : > { %v4945_v52 = vmul.f32 %v2502_v3, %v4727_v24  ;;  %v2375_v16 = vmul.f32 %v3416_v30, %v2215_v4  ;;  %v2327_v38 = vmul.f32 1.442695, %v2284_v23  ;;  %v1995_v19 = vadd.f32 -1.4531521, %v1963_v28 }
 0x19b   : > { %v4949_v6 = vpop.eup %3421  ;;  %v2440_v26 = vmul.f32 %v2408_v39, %v4773_v25  ;;  %v2251_v0 = vsub.f32 0.0, %v4833_v56  ;;  %3427 = vrcp.f32 %v1872_v58  ;;  %v4954_v34 = vand.u32 2147483647, %v4931_v60 }
 0x19c   : > { %5909 = vst [vmem:[#allocation49_spill] sm:$0xff] %v4945_v52  ;;  %v4957_v50 = vmul.f32 %v2501_v11, %v4741_v40  ;;  %v2060_v24 = vadd.f32 1.4214138, %v2028_v22  ;;  %v4960_v30 = vmul.f32 0.5, %v4820_v32  ;;  %v4964_v63 = vadd.f32 %v4843_v14, %v4555_v15 }
 0x19d   : > { %v2218_v3 = vmul.f32 %v4789_v59, %v2186_v2  ;;  %v2153_v25 = vmul.f32 %v4845_v35, %v2121_v41  ;;  %v1966_v4 = vmul.f32 1.0614054, %v4949_v6  ;;  %v1839_v23 = vmul.f32 0.3275911, %v4954_v34 }
 0x19e   : > { %5910 = vst [vmem:[#allocation50_spill] sm:$0xff] %v4957_v50  ;;  %v2407_v28 = vsub.f32 1.0, %v2375_v16  ;;  %3429 = vpow2.f32 %v2327_v38  ;;  %vm1739_vm13 = vcmp.lt.f32.partialorder %v4824_v61, 0.0  ;;  %v2027_v40 = vmul.f32 %v4919_v55, %v1995_v19 }
 0x19f   : > { %v2504_v32 = vadd.f32 1.0, %v2440_v26  ;;  %v2283_v39 = vmul.f32 %v2251_v0, %v4833_v56  ;;  %v1871_v17 = vadd.f32 1.0, %v1839_v23  ;;  %v4974_v14 = vmul.f32 0.70710677, %v4964_v63 }
 0x1a0   : > { %v2092_v59 = vmul.f32 %v4872_v46, %v2060_v24  ;;  %vm1742_vm14 = vcmp.lt.f32.partialorder %v4851_v27, 0.0  ;;  %v1998_v11 = vadd.f32 -1.4531521, %v1966_v4  ;;  %v2254_v22 = vsub.f32 0.0, %v4865_v7 }
 0x1a1   : > { %v4979_v2 = vpop.eup %3423  ;;  %v2378_v41 = vmul.f32 %v3420_v54, %v2218_v3  ;;  %v2185_v58 = vadd.f32 0.2548296, %v2153_v25  ;;  %3431 = vrcp.f32 %v1871_v17  ;;  %v4982_v19 = vand.u32 2147483647, %v4974_v14 }
 0x1a2   : > { %v4942_v45 = vpop.f32.mrb[20].mxu0  ;;  %v2439_v56 = vmul.f32 %v2407_v28, %v4814_v48  ;;  %v4988_v16 = vsel %vm1739_vm13, -1.0, %v5903_v10  ;;  %v2059_v38 = vadd.f32 1.4214138, %v2027_v40  ;;  %v1965_v26 = vmul.f32 1.0614054, %v4979_v2 }
 0x1a3   : > { %v4947_v42 = vpop.f32.mrb[21].mxu0  ;;  %v3426_v24 = vpop.eup %3425  ;;  %v4994_v54 = vmul.f32 %v2504_v32, %v4776_v21  ;;  %v2325_v3 = vmul.f32 1.442695, %v2283_v39  ;;  %v4999_v25 = vsel %vm1742_vm14, -1.0, %v5903_v10  ;;  %v5002_v48 = vmul.f32 0.5, %v4828_v29 }
 0x1a4   : > { %v2124_v61 = vadd.f32 -0.28449672, %v2092_v59  ;;  %v2030_v4 = vmul.f32 %v4949_v6, %v1998_v11  ;;  %v1997_v23 = vadd.f32 -1.4531521, %v1965_v26  ;;  %v1842_v28 = vmul.f32 0.3275911, %v4982_v19 }
 0x1a5   : > { %5911 = vst [vmem:[#allocation51_spill] sm:$0xff] %v4994_v54  ;;  %v5006_v40 = vpop.eup %3427  ;;  %v2410_v17 = vsub.f32 1.0, %v2378_v41  ;;  %v2286_v21 = vmul.f32 %v2254_v22, %v4865_v7  ;;  %v5010_v32 = vmul.f32 0.5, %v4859_v57  ;;  %v5014_v27 = vadd.f32 %v4555_v15, %v4853_v31 }
 0x1a6   : > { %v2503_v39 = vadd.f32 1.0, %v2439_v56  ;;  %v2217_v59 = vmul.f32 %v4845_v35, %v2185_v58  ;;  %v2091_v11 = vmul.f32 %v4919_v55, %v2059_v38  ;;  %v1968_v26 = vmul.f32 1.0614054, %v5006_v40 }
 0x1a7   : > { %3433 = vpow2.f32 %v2325_v3  ;;  %vm1741_vm15 = vcmp.lt.f32.partialorder %v4870_v1, 0.0  ;;  %v2253_v7 = vsub.f32 0.0, %v4896_v51  ;;  %v1874_v57 = vadd.f32 1.0, %v1842_v28 }
 0x1a8   : > { %v3430_v22 = vpop.eup %3429  ;;  %v2156_v41 = vmul.f32 %v4872_v46, %v2124_v61  ;;  %v2062_v31 = vadd.f32 1.4214138, %v2030_v4  ;;  %v2029_v54 = vmul.f32 %v4979_v2, %v1997_v23  ;;  %v2000_v52 = vadd.f32 -1.4531521, %v1968_v26 }
 0x1a9   : > { %v2442_v56 = vmul.f32 %v2410_v17, %v4841_v18  ;;  %v2331_v35 = vmul.f32 1.442695, %v2286_v21  ;;  %3435 = vrcp.f32 %v1874_v57  ;;  %v5027_v58 = vmul.f32 0.70710677, %v5014_v27 }
 0x1aa   : > { %v5030_v38 = vmul.f32 %v2503_v39, %v4793_v8  ;;  %v2377_v3 = vmul.f32 %v3426_v24, %v2217_v59  ;;  %v2123_v50 = vadd.f32 -0.28449672, %v2091_v11  ;;  %v2032_v28 = vmul.f32 %v5006_v40, %v2000_v52 }
 0x1ab   : > { %v4991_v0 = vpop.f32.mrb[22].mxu0  ;;  %v5035_v61 = vpop.eup %3431  ;;  %v5040_v18 = vsel %vm1741_vm15, -1.0, %v5903_v10  ;;  %v2285_v4 = vmul.f32 %v2253_v7, %v4896_v51  ;;  %v5044_v23 = vand.u32 2147483647, %v5027_v58  ;;  %v5048_v8 = vadd.f32 %v4891_v13, %v4555_v15 }
 0x1ac   : > { %v5016_v29 = vpop.f32.mrb[23].mxu0  ;;  %5912 = vst [vmem:[#allocation52_spill] sm:$0xff] %v5030_v38  ;;  %v2188_v24 = vadd.f32 0.2548296, %v2156_v41  ;;  %v2094_v52 = vmul.f32 %v4949_v6, %v2062_v31  ;;  %v2061_v17 = vadd.f32 1.4214138, %v2029_v54  ;;  %3437 = vpow2.f32 %v2331_v35 }
 0x1ad   : > { %v1967_v21 = vmul.f32 1.0614054, %v5035_v61  ;;  %v2506_v39 = vadd.f32 1.0, %v2442_v56  ;;  %vm1744_vm1 = vcmp.lt.f32.partialorder %v4911_v62, 0.0  ;;  %v1841_v1 = vmul.f32 0.3275911, %v5044_v23 }
 0x1ae   : > { %v2409_v59 = vsub.f32 1.0, %v2377_v3  ;;  %v2155_v11 = vmul.f32 %v4919_v55, %v2123_v50  ;;  %v2064_v26 = vadd.f32 1.4214138, %v2032_v28  ;;  %v2256_v13 = vsub.f32 0.0, %v4924_v36 }
 0x1af   : > { %v5059_v7 = vmul.f32 0.5, %v4902_v37  ;;  %v1999_v54 = vadd.f32 -1.4531521, %v1967_v21  ;;  %v1873_v57 = vadd.f32 1.0, %v1841_v1  ;;  %v5062_v41 = vmul.f32 0.70710677, %v5048_v8 }
 0x1b0   : > { %v2220_v31 = vmul.f32 %v4872_v46, %v2188_v24  ;;  %v2126_v56 = vadd.f32 -0.28449672, %v2094_v52  ;;  %v2093_v35 = vmul.f32 %v4979_v2, %v2061_v17  ;;  %v2329_v38 = vmul.f32 1.442695, %v2285_v4 }
 0x1b1   : > { %v3434_v3 = vpop.eup %3433  ;;  %v5067_v50 = vmul.f32 %v2506_v39, %v4876_v5  ;;  %v5072_v37 = vsel %vm1744_vm1, -1.0, %v5903_v10  ;;  %vm1743_vm2 = vcmp.lt.f32.partialorder %v4931_v60, 0.0  ;;  %3439 = vrcp.f32 %v1873_v57 }
 0x1b2   : > { %v2441_v28 = vmul.f32 %v2409_v59, %v4889_v49  ;;  %v2187_v21 = vadd.f32 0.2548296, %v2155_v11  ;;  %v2096_v46 = vmul.f32 %v5006_v40, %v2064_v26  ;;  %v2288_v24 = vmul.f32 %v2256_v13, %v4924_v36 }
 0x1b3   : > { %5914 = vst [vmem:[#allocation54_spill] sm:$0xff] %v5067_v50  ;;  %v5078_v4 = vpop.eup %3435  ;;  %v2031_v5 = vmul.f32 %v5035_v61, %v1999_v54  ;;  %v2255_v52 = vsub.f32 0.0, %v4954_v34  ;;  %v5083_v62 = vand.u32 2147483647, %v5062_v41  ;;  %v5087_v17 = vadd.f32 %v4555_v15, %v4898_v47 }
 0x1b4   : > { %v5033_v33 = vpop.f32.mrb[24].mxu0  ;;  %v2380_v49 = vmul.f32 %v3430_v22, %v2220_v31  ;;  %v2158_v1 = vmul.f32 %v4949_v6, %v2126_v56  ;;  %v2125_v59 = vadd.f32 -0.28449672, %v2093_v35  ;;  %v1970_v36 = vmul.f32 1.0614054, %v5078_v4 }
 0x1b5   : > { %v5054_v51 = vpop.f32.mrb[25].mxu0  ;;  %3441 = vpow2.f32 %v2329_v38  ;;  %v5098_v26 = vsel %vm1743_vm2, -1.0, %v5903_v10  ;;  %v1844_v13 = vmul.f32 0.3275911, %v5083_v62  ;;  %v5102_v47 = vmul.f32 0.70710677, %v5087_v17 }
 0x1b6   : > { %5913 = vst [vmem:[#allocation53_spill] sm:$0xff] %v5054_v51  ;;  %v2219_v22 = vmul.f32 %v4919_v55, %v2187_v21  ;;  %v2128_v54 = vadd.f32 -0.28449672, %v2096_v46  ;;  %v2335_v57 = vmul.f32 1.442695, %v2288_v24  ;;  %v3438_v56 = vpop.eup %3437  ;;  %v2505_v35 = vadd.f32 1.0, %v2441_v28 }
 0x1b7   : > { %v2002_v31 = vadd.f32 -1.4531521, %v1970_v36  ;;  %v2063_v50 = vadd.f32 1.4214138, %v2031_v5  ;;  %v2287_v38 = vmul.f32 %v2255_v52, %v4954_v34  ;;  %v2190_v60 = vadd.f32 0.2548296, %v2158_v1 }
 0x1b8   : > { %v2157_v53 = vmul.f32 %v4979_v2, %v2125_v59  ;;  %v2258_v12 = vsub.f32 0.0, %v4982_v19  ;;  %v5109_v51 = vmul.f32 0.5, %v4915_v9  ;;  %v5113_v21 = vand.u32 2147483647, %v5102_v47 }
 0x1b9   : > { %v2034_v55 = vmul.f32 %v5078_v4, %v2002_v31  ;;  %v2379_v28 = vmul.f32 %v3434_v3, %v2219_v22  ;;  %v2160_v46 = vmul.f32 %v5006_v40, %v2128_v54  ;;  %vm1746_vm3 = vcmp.lt.f32.partialorder %v4974_v14, 0.0 }
 0x1ba   : > { %v5120_v24 = vmul.f32 %v2505_v35, %v4908_v20  ;;  %v2095_v9 = vmul.f32 %v5035_v61, %v2063_v50  ;;  %v2333_v5 = vmul.f32 1.442695, %v2287_v38  ;;  %v1843_v52 = vmul.f32 0.3275911, %v5113_v21 }
 0x1bb   : > { %v5117_v34 = vpop.eup %3439  ;;  %v2222_v1 = vmul.f32 %v4949_v6, %v2190_v60  ;;  %v2189_v3 = vadd.f32 0.2548296, %v2157_v53  ;;  %v2290_v59 = vmul.f32 %v2258_v12, %v4982_v19  ;;  %v2066_v36 = vadd.f32 1.4214138, %v2034_v55 }
 0x1bc   : > { %v5130_v20 = vadd.f32 %v4942_v45, %v4555_v15  ;;  %v2411_v50 = vsub.f32 1.0, %v2379_v28  ;;  %v2192_v54 = vadd.f32 0.2548296, %v2160_v46  ;;  %v5141_v53 = vadd.f32 %v4555_v15, %v4947_v42 }
 0x1bd   : > { %v5089_v39 = vpop.f32.mrb[26].mxu0  ;;  %v2127_v19 = vadd.f32 -0.28449672, %v2095_v9  ;;  %v2382_v31 = vmul.f32 %v3438_v56, %v2222_v1  ;;  %v5149_v14 = vmul.f32 0.5, %v4964_v63  ;;  %v2221_v35 = vmul.f32 %v4979_v2, %v2189_v3 }
 0x1be   : > { %5915 = vst [vmem:[#allocation55_spill] sm:$0xff] %v5089_v39  ;;  %v5093_v11 = vpop.f32.mrb[27].mxu0  ;;  %v2412_v39 = vsub.f32 1.0, %v2380_v49  ;;  %v5146_v45 = vmul.f32 0.70710677, %v5130_v20  ;;  %v2098_v15 = vmul.f32 %v5078_v4, %v2066_v36  ;;  %v2224_v60 = vmul.f32 %v5006_v40, %v2192_v54 }
 0x1bf   : > { %5916 = vst [vmem:[#allocation56_spill] sm:$0xff] %v5093_v11  ;;  %v1876_v11 = vadd.f32 1.0, %v1844_v13  ;;  %v1875_v13 = vadd.f32 1.0, %v1843_v52  ;;  %v3442_v6 = vpop.eup %3441  ;;  %v2339_v42 = vmul.f32 1.442695, %v2290_v59  ;;  %v5159_v28 = vmul.f32 0.5, %v5014_v27 }
 0x1c0   : > { %v2444_v49 = vmul.f32 %v2412_v39, %v4936_v44  ;;  %v5137_v44 = vsel %vm1746_vm3, -1.0, %v5903_v10  ;;  %v5154_v38 = vand.u32 2147483647, %v5146_v45  ;;  %v5162_v56 = vmul.f32 0.70710677, %v5141_v53 }
 0x1c1   : > { %3443 = vrcp.f32 %v1876_v11  ;;  %v1969_v11 = vmul.f32 1.0614054, %v5117_v34  ;;  %v2443_v2 = vmul.f32 %v2411_v50, %v4988_v16  ;;  %v2159_v46 = vmul.f32 %v5035_v61, %v2127_v19 }
 0x1c2   : > { %3445 = vpow2.f32 %v2335_v57  ;;  %v2508_v57 = vadd.f32 1.0, %v2444_v49  ;;  %vm1745_vm4 = vcmp.lt.f32.partialorder %v5027_v58, 0.0  ;;  %v1846_v9 = vmul.f32 0.3275911, %v5154_v38 }
 0x1c3   : > { %v2001_v39 = vadd.f32 -1.4531521, %v1969_v11  ;;  %3447 = vrcp.f32 %v1875_v13  ;;  %v2414_v52 = vsub.f32 1.0, %v2382_v31  ;;  %v2257_v27 = vsub.f32 0.0, %v5044_v23 }
 0x1c4   : > { %3449 = vpow2.f32 %v2333_v5  ;;  %v5171_v40 = vmul.f32 %v2508_v57, %v4940_v43  ;;  %v2381_v1 = vmul.f32 %v3442_v6, %v2221_v35  ;;  %v2130_v3 = vadd.f32 -0.28449672, %v2098_v15  ;;  %v5189_v6 = vld [vmem:[%s5819_s4] ss:$0 sm:$0xff] }
 0x1c5   : > { %v2033_v55 = vmul.f32 %v5117_v34, %v2001_v39  ;;  %3451 = vpow2.f32 %v2339_v42  ;;  %v5176_v16 = vmul.f32 0.5, %v5048_v8  ;;  %v5179_v58 = vsel %vm1745_vm4, -1.0, %v5903_v10 }
 0x1c6   : > { %v5182_v11 = vand.u32 2147483647, %v5162_v56  ;;  %v2507_v13 = vadd.f32 1.0, %v2443_v2  ;;  %v2191_v50 = vadd.f32 0.2548296, %v2159_v46  ;;  %v1878_v54 = vadd.f32 1.0, %v1846_v9 }
 0x1c7   : > { %v5132_v22 = vpop.f32.mrb[28].mxu0  ;;  %v2065_v36 = vadd.f32 1.4214138, %v2033_v55  ;;  %v5193_v8 = vadd.f32 %v5189_v6, %v4991_v0  ;;  %v2446_v39 = vmul.f32 %v2414_v52, %v4999_v25  ;;  %v2289_v57 = vmul.f32 %v2257_v27, %v5044_v23 }
 0x1c8   : > { %v5143_v12 = vpop.f32.mrb[29].mxu0  ;;  %v1845_v35 = vmul.f32 0.3275911, %v5182_v11  ;;  %v2413_v42 = vsub.f32 1.0, %v2381_v1  ;;  %vm1748_vm5 = vcmp.lt.f32.partialorder %v5062_v41, 0.0  ;;  %v2162_v46 = vmul.f32 %v5078_v4, %v2130_v3 }
 0x1c9   : > { %v5205_v55 = vmul.f32 0.70710677, %v5193_v8  ;;  %v2097_v25 = vmul.f32 %v5117_v34, %v2065_v36  ;;  %v2223_v9 = vmul.f32 %v5035_v61, %v2191_v50  ;;  %3453 = vrcp.f32 %v1878_v54 }
 0x1ca   : > { %v1877_v23 = vadd.f32 1.0, %v1845_v35  ;;  %v2510_v27 = vadd.f32 1.0, %v2446_v39  ;;  %v5221_v3 = vsel %vm1748_vm5, -1.0, %v5903_v10  ;;  %v2445_v50 = vmul.f32 %v2413_v42, %v5040_v18 }
 0x1cb   : > { %v5164_v63 = vpop.eup %3443  ;;  %v5212_v52 = vand.u32 2147483647, %v5205_v55  ;;  %v2194_v54 = vadd.f32 0.2548296, %v2162_v46  ;;  %v2129_v39 = vadd.f32 -0.28449672, %v2097_v25  ;;  %v5230_v41 = vadd.f32 %v5189_v6, %v5016_v29 }
 0x1cc   : > { %v3446_v5 = vpop.eup %3445  ;;  %v1972_v49 = vmul.f32 1.0614054, %v5164_v63  ;;  %3455 = vrcp.f32 %v1877_v23  ;;  %v5233_v23 = vmul.f32 %v2510_v27, %v5002_v48  ;;  %vm1747_vm6 = vcmp.lt.f32.partialorder %v5102_v47, 0.0 }
 0x1cd   : > { %v2384_v59 = vmul.f32 %v3446_v5, %v2224_v60  ;;  %v5200_v15 = vpop.eup %3447  ;;  %v2260_v60 = vsub.f32 0.0, %v5083_v62  ;;  %v1848_v36 = vmul.f32 0.3275911, %v5212_v52  ;;  %v5237_v42 = vmul.f32 0.70710677, %v5230_v41 }
 0x1ce   : > { %v2004_v31 = vadd.f32 -1.4531521, %v1972_v49  ;;  %v3450_v0 = vpop.eup %3449  ;;  %v1971_v5 = vmul.f32 1.0614054, %v5200_v15  ;;  %v2337_v49 = vmul.f32 1.442695, %v2289_v57  ;;  %v2226_v29 = vmul.f32 %v5078_v4, %v2194_v54 }
 0x1cf   : > { %v2416_v2 = vsub.f32 1.0, %v2384_v59  ;;  %v5216_v59 = vmul.f32 %v2507_v13, %v4960_v30  ;;  %v2292_v61 = vmul.f32 %v2260_v60, %v5083_v62  ;;  %v2259_v57 = vsub.f32 0.0, %v5113_v21 }
 0x1d0   : > { %v5184_v43 = vpop.f32.mrb[30].mxu0  ;;  %v2036_v1 = vmul.f32 %v5164_v63, %v2004_v31  ;;  %v3452_v31 = vpop.eup %3451  ;;  %v2383_v30 = vmul.f32 %v3450_v0, %v2223_v9  ;;  %v2003_v13 = vadd.f32 -1.4531521, %v1971_v5  ;;  %3457 = vpow2.f32 %v2337_v49 }
 0x1d1   : > { %v5195_v19 = vpop.f32.mrb[31].mxu0  ;;  %v2448_v35 = vmul.f32 %v2416_v2, %v5072_v37  ;;  %v1880_v60 = vadd.f32 1.0, %v1848_v36  ;;  %v2343_v18 = vmul.f32 1.442695, %v2292_v61  ;;  %v5241_v37 = vadd.f32 %v5189_v6, %v5033_v33 }
 0x1d2   : > { %v2068_v62 = vadd.f32 1.4214138, %v2036_v1  ;;  %v2509_v0 = vadd.f32 1.0, %v2445_v50  ;;  %v2161_v2 = vmul.f32 %v5117_v34, %v2129_v39  ;;  %v2291_v48 = vmul.f32 %v2259_v57, %v5113_v21 }
 0x1d3   : > { %5917 = vst [vmem:[#allocation57_spill] sm:$0xff] %v5241_v37  ;;  %v2512_v46 = vadd.f32 1.0, %v2448_v35  ;;  %v2415_v25 = vsub.f32 1.0, %v2383_v30  ;;  %v2035_v9 = vmul.f32 %v5200_v15, %v2003_v13  ;;  %v5248_v47 = vand.u32 2147483647, %v5237_v42  ;;  %v5255_v4 = vpop.eup %3453 }
 0x1d4   : > { %v2100_v5 = vmul.f32 %v5164_v63, %v2068_v62  ;;  %v5252_v27 = vsel %vm1747_vm6, -1.0, %v5903_v10  ;;  %v2262_v33 = vsub.f32 0.0, %v5154_v38  ;;  %3459 = vrcp.f32 %v1880_v60 }
 0x1d5   : > { %3461 = vpow2.f32 %v2343_v18  ;;  %v5258_v21 = vmul.f32 0.5, %v5087_v17  ;;  %v1847_v49 = vmul.f32 0.3275911, %v5248_v47  ;;  %v5262_v1 = vmul.f32 0.70710677, %v5241_v37 }
 0x1d6   : > { %v5264_v61 = vpop.eup %3455  ;;  %v5267_v36 = vmul.f32 %v2509_v0, %v5010_v32  ;;  %v2386_v50 = vmul.f32 %v3452_v31, %v2226_v29  ;;  %v2193_v54 = vadd.f32 0.2548296, %v2161_v2  ;;  %v2341_v39 = vmul.f32 1.442695, %v2291_v48 }
 0x1d7   : > { %v5270_v57 = vmul.f32 %v2512_v46, %v5059_v7  ;;  %v2447_v35 = vmul.f32 %v2415_v25, %v5098_v26  ;;  %v2067_v17 = vadd.f32 1.4214138, %v2035_v9  ;;  %v1879_v30 = vadd.f32 1.0, %v1847_v49 }
 0x1d8   : > { %v2132_v13 = vadd.f32 -0.28449672, %v2100_v5  ;;  %vm1750_vm7 = vcmp.lt.f32.partialorder %v5146_v45, 0.0  ;;  %v1974_v62 = vmul.f32 1.0614054, %v5255_v4  ;;  %v2294_v60 = vmul.f32 %v2262_v33, %v5154_v38  ;;  %v5918_v33 = vld [vmem:[#allocation53_spill] sm:$0xff] }
 0x1d9   : > { %v5277_v32 = vmul.f32 0.5, %v5130_v20  ;;  %v1973_v31 = vmul.f32 1.0614054, %v5264_v61  ;;  %3463 = vrcp.f32 %v1879_v30  ;;  %v5281_v7 = vand.u32 2147483647, %v5262_v1 }
 0x1da   : > { %v3458_v18 = vpop.eup %3457  ;;  %v2418_v26 = vsub.f32 1.0, %v2386_v50  ;;  %v2225_v0 = vmul.f32 %v5117_v34, %v2193_v54  ;;  %3465 = vpow2.f32 %v2341_v39  ;;  %v2261_v45 = vsub.f32 0.0, %v5182_v11 }
 0x1db   : > { %v2511_v29 = vadd.f32 1.0, %v2447_v35  ;;  %v2099_v2 = vmul.f32 %v5200_v15, %v2067_v17  ;;  %v5287_v38 = vsel %vm1750_vm7, -1.0, %v5903_v10  ;;  %v1850_v20 = vmul.f32 0.3275911, %v5281_v7 }
 0x1dc   : > { %v2164_v48 = vmul.f32 %v5164_v63, %v2132_v13  ;;  %v2006_v46 = vadd.f32 -1.4531521, %v1974_v62  ;;  %v2347_v25 = vmul.f32 1.442695, %v2294_v60  ;;  %vm1749_vm8 = vcmp.lt.f32.partialorder %v5162_v56, 0.0 }
 0x1dd   : > { %v2005_v9 = vadd.f32 -1.4531521, %v1973_v31  ;;  %v5293_v34 = vmul.f32 0.5, %v5141_v53  ;;  %v1882_v5 = vadd.f32 1.0, %v1850_v20  ;;  %v5297_v49 = vadd.f32 %v5189_v6, %v5918_v33 }
 0x1de   : > { %v5299_v50 = vpop.eup %3459  ;;  %v2450_v54 = vmul.f32 %v2418_v26, %v5137_v44  ;;  %v2385_v39 = vmul.f32 %v3458_v18, %v2225_v0  ;;  %v2293_v35 = vmul.f32 %v2261_v45, %v5182_v11  ;;  %v2264_v17 = vsub.f32 0.0, %v5212_v52 }
 0x1df   : > { %v3462_v30 = vpop.eup %3461  ;;  %v5305_v56 = vmul.f32 %v2511_v29, %v5109_v51  ;;  %v2131_v53 = vadd.f32 -0.28449672, %v2099_v2  ;;  %v5308_v13 = vsel %vm1749_vm8, -1.0, %v5903_v10  ;;  %v5311_v62 = vmul.f32 0.70710677, %v5297_v49 }
 0x1e0   : > { %v2196_v60 = vadd.f32 0.2548296, %v2164_v48  ;;  %v2038_v31 = vmul.f32 %v5255_v4, %v2006_v46  ;;  %3467 = vpow2.f32 %v2347_v25  ;;  %vm1752_vm9 = vcmp.lt.f32.partialorder %v5205_v55, 0.0  ;;  %v5920_v46 = vld [vmem:[#allocation44_spill] sm:$0xff] }
 0x1e1   : > { %v2037_v44 = vmul.f32 %v5264_v61, %v2005_v9  ;;  %v1976_v11 = vmul.f32 1.0614054, %v5299_v50  ;;  %3469 = vrcp.f32 %v1882_v5  ;;  %v5318_v51 = vand.u32 2147483647, %v5311_v62 }
 0x1e2   : > { %v2514_v18 = vadd.f32 1.0, %v2450_v54  ;;  %v2417_v26 = vsub.f32 1.0, %v2385_v39  ;;  %v2345_v0 = vmul.f32 1.442695, %v2293_v35  ;;  %v2296_v45 = vmul.f32 %v2264_v17, %v5212_v52 }
 0x1e3   : > { %v5321_v29 = vpop.eup %3463  ;;  %v2163_v2 = vmul.f32 %v5200_v15, %v2131_v53  ;;  %v5325_v20 = vmul.f32 0.5, %v5193_v8  ;;  %v1849_v48 = vmul.f32 0.3275911, %v5318_v51  ;;  %v2113_v25 = vadd.f32 -0.28449672, %v5920_v46  ;;  %v5921_v8 = vld [vmem:[#allocation42_spill] sm:$0xff] }
 0x1e4   : > { %v3466_v9 = vpop.eup %3465  ;;  %v2228_v5 = vmul.f32 %v5164_v63, %v2196_v60  ;;  %v2070_v33 = vadd.f32 1.4214138, %v2038_v31  ;;  %v5333_v54 = vsel %vm1752_vm9, -1.0, %v5903_v10  ;;  %v1975_v52 = vmul.f32 1.0614054, %v5321_v29 }
 0x1e5   : > { %5919 = vst [vmem:[#allocation53_spill] sm:$0xff] %v5325_v20  ;;  %v2069_v39 = vadd.f32 1.4214138, %v2037_v44  ;;  %v2008_v35 = vadd.f32 -1.4531521, %v1976_v11  ;;  %v1881_v17 = vadd.f32 1.0, %v1849_v48  ;;  %v2145_v53 = vmul.f32 %v5921_v8, %v2113_v25 }
 0x1e6   : > { %v5338_v37 = vmul.f32 %v2514_v18, %v5149_v14  ;;  %v2449_v46 = vmul.f32 %v2417_v26, %v5179_v58  ;;  %3471 = vpow2.f32 %v2345_v0  ;;  %v2351_v63 = vmul.f32 1.442695, %v2296_v45  ;;  %v5922_v11 = vld [vmem:[#allocation55_spill] sm:$0xff] }
 0x1e7   : > { %v2195_v60 = vadd.f32 0.2548296, %v2163_v2  ;;  %vm1751_vm10 = vcmp.lt.f32.partialorder %v5237_v42, 0.0  ;;  %3473 = vrcp.f32 %v1881_v17  ;;  %v2177_v55 = vadd.f32 0.2548296, %v2145_v53 }
 0x1e8   : > { %v2102_v31 = vmul.f32 %v5255_v4, %v2070_v33  ;;  %v2007_v20 = vadd.f32 -1.4531521, %v1975_v52  ;;  %v2263_v44 = vsub.f32 0.0, %v5248_v47  ;;  %v5346_v48 = vadd.f32 %v5189_v6, %v5922_v11 }
 0x1e9   : > { %v2388_v14 = vmul.f32 %v3462_v30, %v2228_v5  ;;  %v2101_v18 = vmul.f32 %v5264_v61, %v2069_v39  ;;  %v2040_v58 = vmul.f32 %v5299_v50, %v2008_v35  ;;  %v2209_v26 = vmul.f32 %v5921_v8, %v2177_v55  ;;  %v5925_v30 = vld [vmem:[#allocation45_spill] sm:$0xff]  ;;  %v5926_v39 = vld [vmem:[#allocation56_spill] sm:$0xff] }
 0x1ea   : > { %5923 = vst [vmem:[#allocation44_spill] sm:$0xff] %v5346_v48  ;;  %v5351_v0 = vpop.eup %3467  ;;  %v2513_v45 = vadd.f32 1.0, %v2449_v46  ;;  %3475 = vpow2.f32 %v2351_v63  ;;  %v5354_v2 = vmul.f32 0.5, %v5230_v41  ;;  %vm1754_vm11 = vcmp.lt.f32.partialorder %v5262_v1, 0.0 }
 0x1eb   : > { %v5357_v25 = vpop.eup %3469  ;;  %v2227_v33 = vmul.f32 %v5200_v15, %v2195_v60  ;;  %v2369_v5 = vmul.f32 %v5925_v30, %v2209_v26  ;;  %v5362_v52 = vmul.f32 0.70710677, %v5346_v48  ;;  %v5366_v35 = vadd.f32 %v5189_v6, %v5926_v39  ;;  %v5929_v26 = vld [vmem:[#allocation43_spill] sm:$0xff] }
 0x1ec   : > { %5924 = vst [vmem:[#allocation42_spill] sm:$0xff] %v5354_v2  ;;  %v2134_v17 = vadd.f32 -0.28449672, %v2102_v31  ;;  %v5371_v41 = vsel %vm1751_vm10, -1.0, %v5903_v10  ;;  %v2039_v1 = vmul.f32 %v5321_v29, %v2007_v20  ;;  %v2295_v8 = vmul.f32 %v2263_v44, %v5248_v47 }
 0x1ed   : > { %5927 = vst [vmem:[#allocation55_spill] sm:$0xff] %v5366_v35  ;;  %v2420_v15 = vsub.f32 1.0, %v2388_v14  ;;  %v2133_v53 = vadd.f32 -0.28449672, %v2101_v18  ;;  %v2072_v46 = vadd.f32 1.4214138, %v2040_v58  ;;  %v5376_v60 = vmul.f32 %v2513_v45, %v5159_v28 }
 0x1ee   : > { %v2401_v63 = vsub.f32 1.0, %v2369_v5  ;;  %v5379_v55 = vsel %vm1754_vm11, -1.0, %v5903_v10  ;;  %v1978_v31 = vmul.f32 1.0614054, %v5357_v25  ;;  %v5383_v42 = vand.u32 2147483647, %v5362_v52 }
 0x1ef   : > { %5928 = vst [vmem:[#allocation45_spill] sm:$0xff] %v5379_v55  ;;  %v2387_v11 = vmul.f32 %v3466_v9, %v2227_v33  ;;  %v2266_v20 = vsub.f32 0.0, %v5281_v7  ;;  %v5388_v44 = vmul.f32 0.70710677, %v5366_v35  ;;  %v2166_v28 = vmul.f32 %v5255_v4, %v2134_v17 }
 0x1f0   : > { %v2433_v47 = vmul.f32 %v2401_v63, %v5929_v26  ;;  %v3472_v14 = vpop.eup %3471  ;;  %v2071_v18 = vadd.f32 1.4214138, %v2039_v1  ;;  %v2349_v58 = vmul.f32 1.442695, %v2295_v8  ;;  %v1852_v45 = vmul.f32 0.3275911, %v5383_v42 }
 0x1f1   : > { %v5392_v30 = vpop.eup %3473  ;;  %v2452_v5 = vmul.f32 %v2420_v15, %v5221_v3  ;;  %v2165_v9 = vmul.f32 %v5264_v61, %v2133_v53  ;;  %v2104_v33 = vmul.f32 %v5299_v50, %v2072_v46  ;;  %v2010_v63 = vadd.f32 -1.4531521, %v1978_v31  ;;  %v5930_v1 = vld [vmem:[#allocation41_spill] sm:$0xff] }
 0x1f2   : > { %v2497_v39 = vadd.f32 1.0, %v2433_v47  ;;  %v1977_v26 = vmul.f32 1.0614054, %v5392_v30  ;;  %vm2572_vm12 = vcmask 261120   ;;  %v1884_v48 = vadd.f32 1.0, %v1852_v45 }
 0x1f3   : > { %v2419_v35 = vsub.f32 1.0, %v2387_v11  ;;  %v2298_v17 = vmul.f32 %v2266_v20, %v5281_v7  ;;  %v5401_v55 = vand.u32 2147483647, %v5388_v44  ;;  %v2198_v3 = vadd.f32 0.2548296, %v2166_v28 }
 0x1f4   : > { %v2529_v8 = vmul.f32 %v2497_v39, %v5930_v1  ;;  %v5403_v2 = vpop.eup %3475  ;;  %v2103_v15 = vmul.f32 %v5321_v29, %v2071_v18  ;;  %v2009_v53 = vadd.f32 -1.4531521, %v1977_v26  ;;  %3477 = vrcp.f32 %v1884_v48  ;;  %v5931_v18 = vld [vmem:[#allocation46_spill] sm:$0xff]  ;;  %v5932_v26 = vld [vmem:[#allocation48_spill] sm:$0xff] }
 0x1f5   : > { %v2197_v46 = vadd.f32 0.2548296, %v2165_v9  ;;  %v2265_v31 = vsub.f32 0.0, %v5318_v51  ;;  %v1851_v11 = vmul.f32 0.3275911, %v5401_v55  ;;  %v5411_v7 = vadd.f32 %v5189_v6, %v5132_v22 }
 0x1f6   : > { %3267 = vmatprep.mubr.msk.f32.mxu1 %vm2572_vm12, %v2529_v8  ;;  %v2516_v20 = vadd.f32 1.0, %v2452_v5  ;;  %v2136_v47 = vadd.f32 -0.28449672, %v2104_v33  ;;  %v2042_v45 = vmul.f32 %v5357_v25, %v2010_v63  ;;  %v2041_v28 = vmul.f32 %v5392_v30, %v2009_v53 }
 0x1f7   : > { %3268 = vmatmul.mubr.msk.f32.vlgmr.msra.gmra.mrb[0].mxu1 %vm2572_vm12, %v5931_v18  ;;  %v2451_v48 = vmul.f32 %v2419_v35, %v5252_v27  ;;  %v2355_v9 = vmul.f32 1.442695, %v2298_v17  ;;  %vm1753_vm13 = vcmp.lt.f32.partialorder %v5311_v62, 0.0  ;;  %v1883_v39 = vadd.f32 1.0, %v1851_v11 }
 0x1f8   : > { %3270 = vmatprep.mubr.msk.f32.mxu1 %vm2572_vm12, %v5932_v26  ;;  %v2230_v22 = vmul.f32 %v5255_v4, %v2198_v3  ;;  %v2135_v5 = vadd.f32 -0.28449672, %v2103_v15  ;;  %v2073_v33 = vadd.f32 1.4214138, %v2041_v28  ;;  %v5423_v63 = vmul.f32 0.70710677, %v5411_v7 }
 0x1f9   : > { %v2229_v1 = vmul.f32 %v5264_v61, %v2197_v46  ;;  %v2297_v8 = vmul.f32 %v2265_v31, %v5318_v51  ;;  %3479 = vrcp.f32 %v1883_v39  ;;  %v5429_v27 = vadd.f32 %v5189_v6, %v5143_v12  ;;  %v5933_v3 = vld [vmem:[#allocation47_spill] sm:$0xff]  ;;  %v5934_v12 = vld [vmem:[#allocation50_spill] sm:$0xff]  ;;  %v5936_v26 = vld [vmem:[#allocation52_spill] sm:$0xff] }
 0x1fa   : > { %v5432_v35 = vmul.f32 %v2516_v20, %v5176_v16  ;;  %v2168_v17 = vmul.f32 %v5299_v50, %v2136_v47  ;;  %3481 = vpow2.f32 %v2349_v58  ;;  %v2074_v4 = vadd.f32 1.4214138, %v2042_v45 }
 0x1fb   : > { %3271 = vmatmul.mubr.msk.f32.gmra.mrb[2].mxu1 %vm2572_vm12, %v5933_v3  ;;  %v2515_v15 = vadd.f32 1.0, %v2451_v48  ;;  %v2105_v61 = vmul.f32 %v5392_v30, %v2073_v33  ;;  %v5439_v51 = vand.u32 2147483647, %v5423_v63  ;;  %v5442_v53 = vmul.f32 0.70710677, %v5429_v27 }
 0x1fc   : > { %3273 = vmatprep.mubr.msk.f32.mxu1 %vm2572_vm12, %v5934_v12  ;;  %v2167_v16 = vmul.f32 %v5321_v29, %v2135_v5  ;;  %3483 = vpow2.f32 %v2355_v9  ;;  %v5450_v58 = vsel %vm1753_vm13, -1.0, %v5903_v10  ;;  %v5453_v46 = vmul.f32 0.5, %v5297_v49  ;;  %v5935_v9 = vld [vmem:[#allocation49_spill] sm:$0xff]  ;;  %v5937_v12 = vld [vmem:[#allocation51_spill] sm:$0xff] }
 0x1fd   : > { %v2390_v31 = vmul.f32 %v5351_v0, %v2230_v22  ;;  %v2389_v11 = vmul.f32 %v3472_v14, %v2229_v1  ;;  %v2353_v20 = vmul.f32 1.442695, %v2297_v8  ;;  %v1854_v47 = vmul.f32 0.3275911, %v5439_v51 }
 0x1fe   : > { %v5457_v45 = vpop.eup %3477  ;;  %v2200_v28 = vadd.f32 0.2548296, %v2168_v17  ;;  %v2106_v18 = vmul.f32 %v5357_v25, %v2074_v4  ;;  %v2267_v48 = vsub.f32 0.0, %v5401_v55  ;;  %v5462_v62 = vand.u32 2147483647, %v5442_v53 }
 0x1ff   : > { %3274 = vmatmul.mubr.msk.f32.gmra.mrb[4].mxu1 %vm2572_vm12, %v5935_v9  ;;  %v5467_v49 = vmul.f32 %v2515_v15, %v5258_v21  ;;  %v2137_v0 = vadd.f32 -0.28449672, %v2105_v61  ;;  %v1980_v14 = vmul.f32 1.0614054, %v5457_v45  ;;  %v1886_v39 = vadd.f32 1.0, %v1854_v47 }
 0x200   : > { %3276 = vmatprep.mubr.msk.f32.mxu1 %vm2572_vm12, %v5936_v26  ;;  %v2199_v22 = vadd.f32 0.2548296, %v2167_v16  ;;  %v2268_v5 = vsub.f32 0.0, %v5383_v42  ;;  %v1853_v33 = vmul.f32 0.3275911, %v5462_v62  ;;  %v5476_v1 = vadd.f32 %v5189_v6, %v5184_v43 }
 0x201   : > { %v2422_v8 = vsub.f32 1.0, %v2390_v31  ;;  %v2421_v17 = vsub.f32 1.0, %v2389_v11  ;;  %v2012_v21 = vadd.f32 -1.4531521, %v1980_v14  ;;  %3485 = vrcp.f32 %v1886_v39 }
 0x202   : > { %v2138_v4 = vadd.f32 -0.28449672, %v2106_v18  ;;  %v2299_v3 = vmul.f32 %v2267_v48, %v5401_v55  ;;  %v1885_v15 = vadd.f32 1.0, %v1853_v33  ;;  %v5480_v61 = vmul.f32 0.70710677, %v5476_v1 }
 0x203   : > { %3277 = vmatmul.mubr.msk.f32.gmra.mrb[6].mxu1 %vm2572_vm12, %v5937_v12  ;;  %v5484_v16 = vpop.eup %3479  ;;  %v2232_v47 = vmul.f32 %v5299_v50, %v2200_v28  ;;  %v2169_v43 = vmul.f32 %v5392_v30, %v2137_v0  ;;  %3487 = vpow2.f32 %v2353_v20  ;;  %v2044_v31 = vmul.f32 %v5457_v45, %v2012_v21 }
 0x204   : > { %3279 = vmatprep.mubr.msk.f32.mxu1 %vm2572_vm12, %v5120_v24  ;;  %v3482_v55 = vpop.eup %3481  ;;  %v2231_v11 = vmul.f32 %v5321_v29, %v2199_v22  ;;  %v2300_v18 = vmul.f32 %v2268_v5, %v5383_v42  ;;  %v1979_v48 = vmul.f32 1.0614054, %v5484_v16  ;;  %3489 = vrcp.f32 %v1885_v15  ;;  %v5938_v42 = vld [vmem:[#allocation54_spill] sm:$0xff] }
 0x205   : > { %v2454_v9 = vmul.f32 %v2422_v8, %v5287_v38  ;;  %v2453_v50 = vmul.f32 %v2421_v17, %v5308_v13  ;;  %v2076_v28 = vadd.f32 1.4214138, %v2044_v31  ;;  %v5497_v20 = vand.u32 2147483647, %v5480_v61 }
 0x206   : > { %v5499_v0 = vpop.eup %3483  ;;  %v2170_v24 = vmul.f32 %v5357_v25, %v2138_v4  ;;  %v2011_v14 = vadd.f32 -1.4531521, %v1979_v48  ;;  %v2357_v39 = vmul.f32 1.442695, %v2299_v3  ;;  %v2270_v29 = vsub.f32 0.0, %v5439_v51 }
 0x207   : > { %3280 = vmatmul.mubr.msk.f32.gmra.mrb[8].mxu1 %vm2572_vm12, %v5938_v42  ;;  %v2201_v26 = vadd.f32 0.2548296, %v2169_v43  ;;  %v2108_v38 = vmul.f32 %v5457_v45, %v2076_v28  ;;  %v1856_v13 = vmul.f32 0.3275911, %v5497_v20  ;;  %v5509_v22 = vadd.f32 %v5189_v6, %v5195_v19 }
 0x208   : > { %3282 = vmatprep.mubr.msk.f32.mxu1 %vm2572_vm12, %v5216_v59  ;;  %v2392_v5 = vmul.f32 %v5403_v2, %v2232_v47  ;;  %v2391_v33 = vmul.f32 %v3482_v55, %v2231_v11  ;;  %v2359_v8 = vmul.f32 1.442695, %v2300_v18  ;;  %v2043_v17 = vmul.f32 %v5484_v16, %v2011_v14 }
 0x209   : > { %v2140_v21 = vadd.f32 -0.28449672, %v2108_v38  ;;  %v2269_v4 = vsub.f32 0.0, %v5462_v62  ;;  %v1888_v3 = vadd.f32 1.0, %v1856_v13  ;;  %v5517_v15 = vmul.f32 0.70710677, %v5509_v22 }
 0x20a   : > { %v2518_v12 = vadd.f32 1.0, %v2454_v9  ;;  %v2075_v43 = vadd.f32 1.4214138, %v2043_v17  ;;  %3491 = vpow2.f32 %v2357_v39  ;;  %v2302_v6 = vmul.f32 %v2270_v29, %v5439_v51 }
 0x20b   : > { %3283 = vmatmul.mubr.msk.f32.gmra.mrb[10].mxu1 %vm2572_vm12, %v5171_v40  ;;  %v5522_v19 = vpop.eup %3485  ;;  %v2517_v59 = vadd.f32 1.0, %v2453_v50  ;;  %v2202_v2 = vadd.f32 0.2548296, %v2170_v24  ;;  %v2233_v47 = vmul.f32 %v5392_v30, %v2201_v26  ;;  %3493 = vrcp.f32 %v1888_v3 }
 0x20c   : > { %3285 = vmatprep.mubr.msk.f32.mxu1 %vm2572_vm12, %v5267_v36  ;;  %v2424_v31 = vsub.f32 1.0, %v2392_v5  ;;  %v2172_v55 = vmul.f32 %v5457_v45, %v2140_v21  ;;  %v2107_v11 = vmul.f32 %v5484_v16, %v2075_v43  ;;  %v1982_v51 = vmul.f32 1.0614054, %v5522_v19 }
 0x20d   : > { %v3488_v18 = vpop.eup %3487  ;;  %v2423_v48 = vsub.f32 1.0, %v2391_v33  ;;  %3495 = vpow2.f32 %v2359_v8  ;;  %v2301_v40 = vmul.f32 %v2269_v4, %v5462_v62  ;;  %v5532_v9 = vand.u32 2147483647, %v5517_v15 }
 0x20e   : > { %v5534_v30 = vpop.eup %3489  ;;  %v5537_v50 = vmul.f32 %v2518_v12, %v5277_v32  ;;  %vm1756_vm14 = vcmp.lt.f32.partialorder %v5362_v52, 0.0  ;;  %v2139_v36 = vadd.f32 -0.28449672, %v2107_v11  ;;  %v2014_v28 = vadd.f32 -1.4531521, %v1982_v51 }
 0x20f   : > { %v2363_v24 = vmul.f32 1.442695, %v2302_v6  ;;  %3286 = vmatmul.mubr.msk.f32.gmra.mrb[12].mxu1 %vm2572_vm12, %v5233_v23  ;;  %v2234_v14 = vmul.f32 %v5357_v25, %v2202_v2  ;;  %v2393_v39 = vmul.f32 %v3488_v18, %v2233_v47  ;;  %v1981_v62 = vmul.f32 1.0614054, %v5534_v30 }
 0x210   : > { %v1855_v29 = vmul.f32 0.3275911, %v5532_v9  ;;  %3288 = vmatprep.mubr.msk.f32.mxu1 %vm2572_vm12, %v5305_v56  ;;  %v2456_v32 = vmul.f32 %v2424_v31, %v5333_v54  ;;  %v2204_v42 = vadd.f32 0.2548296, %v2172_v55  ;;  %v2171_v26 = vmul.f32 %v5484_v16, %v2139_v36  ;;  %v5939_v36 = vld [vmem:[#allocation42_spill] sm:$0xff] }
 0x211   : > { %v2046_v38 = vmul.f32 %v5522_v19, %v2014_v28  ;;  %v2455_v13 = vmul.f32 %v2423_v48, %v5371_v41  ;;  %v2013_v23 = vadd.f32 -1.4531521, %v1981_v62  ;;  %v2361_v5 = vmul.f32 1.442695, %v2301_v40 }
 0x212   : > { %v1887_v25 = vadd.f32 1.0, %v1855_v29  ;;  %v2203_v33 = vadd.f32 0.2548296, %v2171_v26  ;;  %3497 = vpow2.f32 %v2363_v24  ;;  %v2272_v17 = vsub.f32 0.0, %v5497_v20 }
 0x213   : > { %v2078_v8 = vadd.f32 1.4214138, %v2046_v38  ;;  %3289 = vmatmul.mubr.msk.f32.gmra.mrb[14].mxu1 %vm2572_vm12, %v5270_v57  ;;  %v2394_v56 = vmul.f32 %v5499_v0, %v2234_v14  ;;  %v2425_v54 = vsub.f32 1.0, %v2393_v39  ;;  %v2045_v21 = vmul.f32 %v5534_v30, %v2013_v23  ;;  %v5940_v39 = vld [vmem:[#allocation45_spill] sm:$0xff] }
 0x214   : > { %3499 = vrcp.f32 %v1887_v25  ;;  %3291 = vmatprep.mubr.msk.f32.mxu1 %vm2572_vm12, %v5376_v60  ;;  %v3492_v41 = vpop.eup %3491  ;;  %v2236_v4 = vmul.f32 %v5457_v45, %v2204_v42  ;;  %vm1755_vm15 = vcmp.lt.f32.partialorder %v5388_v44, 0.0  ;;  %v2235_v3 = vmul.f32 %v5484_v16, %v2203_v33  ;;  %v5941_v42 = vld [vmem:[#allocation53_spill] sm:$0xff] }
 0x215   : > { %v2110_v12 = vmul.f32 %v5522_v19, %v2078_v8  ;;  %v5562_v43 = vpop.eup %3493  ;;  %v2549_v57 = vmul.f32 %v2517_v59, %v5293_v34  ;;  %v2519_v0 = vadd.f32 1.0, %v2455_v13  ;;  %v2077_v6 = vadd.f32 1.4214138, %v2045_v21 }
 0x216   : > { %3501 = vpow2.f32 %v2361_v5  ;;  %v2395_v2 = vmul.f32 %v3492_v41, %v2235_v3  ;;  %v1984_v60 = vmul.f32 1.0614054, %v5562_v43  ;;  %v2304_v31 = vmul.f32 %v2272_v17, %v5497_v20 }
 0x217   : > { %v2142_v47 = vadd.f32 -0.28449672, %v2110_v12  ;;  %3292 = vmatmul.mubr.msk.f32.gmra.mrb[16].mxu1 %vm2572_vm12, %v5338_v37  ;;  %v3496_v45 = vpop.eup %3495  ;;  %v2520_v16 = vadd.f32 1.0, %v2456_v32  ;;  %v2426_v55 = vsub.f32 1.0, %v2394_v56  ;;  %v2457_v11 = vmul.f32 %v2425_v54, %v5450_v58 }
 0x218   : > { %v2109_v51 = vmul.f32 %v5534_v30, %v2077_v6  ;;  %3294 = vmatprep.mubr.msk.f32.mxu1 %vm2572_vm12, %v5467_v49  ;;  %v2396_v34 = vmul.f32 %v3496_v45, %v2236_v4  ;;  %v2427_v59 = vsub.f32 1.0, %v2395_v2  ;;  %v2016_v48 = vadd.f32 -1.4531521, %v1984_v60  ;;  %v5943_v6 = vld [vmem:[#allocation55_spill] sm:$0xff] }
 0x219   : > { %v2174_v18 = vmul.f32 %v5522_v19, %v2142_v47  ;;  %v1788_v20 = vsel %vm1756_vm14, -1.0, %v5903_v10  ;;  %v1787_v37 = vsel %vm1755_vm15, -1.0, %v5903_v10  ;;  %v2271_v58 = vsub.f32 0.0, %v5532_v9 }
 0x21a   : > { %v2141_v40 = vadd.f32 -0.28449672, %v2109_v51  ;;  %v2551_v28 = vmul.f32 %v2519_v0, %v5939_v36  ;;  %v2048_v49 = vmul.f32 %v5562_v43, %v2016_v48  ;;  %v2367_v14 = vmul.f32 1.442695, %v2304_v31 }
 0x21b   : > { %v2206_v24 = vadd.f32 0.2548296, %v2174_v18  ;;  %3295 = vmatmul.mubr.msk.f32.gmra.mrb[18].mxu1 %vm2572_vm12, %v5432_v35  ;;  %v2458_v62 = vmul.f32 %v2426_v55, %v5940_v39  ;;  %v2521_v52 = vadd.f32 1.0, %v2457_v11  ;;  %v2459_v29 = vmul.f32 %v2427_v59, %v1787_v37  ;;  %v5944_v18 = vld [vmem:[#allocation44_spill] sm:$0xff] }
 0x21c   : > { %v2173_v32 = vmul.f32 %v5534_v30, %v2141_v40  ;;  %3297 = vmatprep.mubr.msk.f32.mxu1 %vm2572_vm12, %v2549_v57  ;;  %v3498_v44 = vpop.eup %3497  ;;  %v2552_v26 = vmul.f32 %v2520_v16, %v5941_v42  ;;  %v2428_v38 = vsub.f32 1.0, %v2396_v34  ;;  %v2080_v23 = vadd.f32 1.4214138, %v2048_v49  ;;  %v5942_v57 = vld [vmem:[#allocation57_spill] sm:$0xff] }
 0x21d   : > { %v2238_v13 = vmul.f32 %v5522_v19, %v2206_v24  ;;  %vm1758_vm1 = vcmp.lt.f32.partialorder %v5423_v63, 0.0  ;;  %vm1757_vm2 = vcmp.lt.f32.partialorder %v5442_v53, 0.0  ;;  %v2303_v25 = vmul.f32 %v2271_v58, %v5532_v9 }
 0x21e   : > { %v3500_v5 = vpop.eup %3499  ;;  %v2205_v35 = vadd.f32 0.2548296, %v2173_v32  ;;  %v2112_v8 = vmul.f32 %v5562_v43, %v2080_v23  ;;  %3503 = vpow2.f32 %v2367_v14  ;;  %v2522_v54 = vadd.f32 1.0, %v2458_v62 }
 0x21f   : > { %v2398_v33 = vmul.f32 %v3498_v44, %v2238_v13  ;;  %v1983_v17 = vmul.f32 1.0614054, %v3500_v5  ;;  %3298 = vmatmul.mubr.msk.f32.gmra.mrb[20].mxu1 %vm2572_vm12, %v5537_v50  ;;  %v2553_v19 = vmul.f32 %v2521_v52, %v5453_v46  ;;  %v2523_v21 = vadd.f32 1.0, %v2459_v29 }
 0x220   : > { %v3502_v56 = vpop.eup %3501  ;;  %v2237_v41 = vmul.f32 %v5534_v30, %v2205_v35  ;;  %3300 = vmatprep.mubr.msk.f32.mxu1 %vm2572_vm12, %v2551_v28  ;;  %v2460_v4 = vmul.f32 %v2428_v38, %v1788_v20  ;;  %v2144_v9 = vadd.f32 -0.28449672, %v2112_v8  ;;  %v2490_v0 = vmul.f32 0.5, %v5942_v57  ;;  %v5948_v57 = vld [vmem:[#allocation11_spill] sm:$0xff] }
 0x221   : > { %v2430_v3 = vsub.f32 1.0, %v2398_v33  ;;  %v2015_v12 = vadd.f32 -1.4531521, %v1983_v17  ;;  %v2491_v2 = vmul.f32 0.5, %v5943_v6  ;;  %v2365_v60 = vmul.f32 1.442695, %v2303_v25 }
 0x222   : > { %v2397_v47 = vmul.f32 %v3502_v56, %v2237_v41  ;;  %v1790_v50 = vsel %vm1758_vm1, -1.0, %v5903_v10  ;;  %v2176_v46 = vmul.f32 %v5562_v43, %v2144_v9  ;;  %v2554_v30 = vmul.f32 %v2522_v54, %v2490_v0  ;;  %v5945_v56 = vld [vmem:[#allocation10_spill] sm:$0xff]  ;;  %v5947_v9 = vld [vmem:[#allocation12_spill] sm:$0xff] }
 0x223   : > { %v2047_v31 = vmul.f32 %v3500_v5, %v2015_v12  ;;  %3301 = vmatmul.mubr.msk.f32.gmra.mrb[22].mxu1 %vm2572_vm12, %v2552_v26  ;;  %v2555_v45 = vmul.f32 %v2523_v21, %v2491_v2  ;;  %v1789_v16 = vsel %vm1757_vm2, -1.0, %v5903_v10  ;;  %v2524_v11 = vadd.f32 1.0, %v2460_v4 }
 0x224   : > { %v2429_v55 = vsub.f32 1.0, %v2397_v47  ;;  %3303 = vmatprep.mubr.msk.f32.mxu1 %vm2572_vm12, %v2553_v19  ;;  %v2462_v51 = vmul.f32 %v2430_v3, %v1790_v50  ;;  %v2208_v34 = vadd.f32 0.2548296, %v2176_v46  ;;  %3505 = vpow2.f32 %v2365_v60  ;;  %v5949_v50 = vld [vmem:[#allocation14_spill] sm:$0xff] }
 0x225   : > { %v2079_v59 = vadd.f32 1.4214138, %v2047_v31  ;;  %v2492_v48 = vmul.f32 0.5, %v5944_v18  ;;  %v2493_v40 = vmul.f32 0.5, %v5429_v27  ;;  %v2494_v39 = vmul.f32 0.5, %v5411_v7  ;;  %v5950_v31 = vld [vmem:[#allocation13_spill] sm:$0xff] }
 0x226   : > { %v2461_v63 = vmul.f32 %v2429_v55, %v1789_v16  ;;  %v2240_v20 = vmul.f32 %v5562_v43, %v2208_v34  ;;  %v2526_v28 = vadd.f32 1.0, %v2462_v51  ;;  %vm1760_vm3 = vcmp.lt.f32.partialorder %v5480_v61, 0.0  ;;  %v5951_v51 = vld [vmem:[#allocation16_spill] sm:$0xff] }
 0x227   : > { %v2111_v37 = vmul.f32 %v3500_v5, %v2079_v59  ;;  %3304 = vmatmul.mubr.msk.f32.gmra.mrb[24].mxu1 %vm2572_vm12, %v2554_v30  ;;  %v2556_v36 = vmul.f32 %v2524_v11, %v2492_v48  ;;  %v1792_v44 = vsel %vm1760_vm3, -1.0, %v5903_v10  ;;  %vm1759_vm4 = vcmp.lt.f32.partialorder %v5517_v15, 0.0  ;;  %v5630_v15 = vld [vmem:[%s5821_s6] ss:$0 sm:$0xff] }
 0x228   : > { %v2525_v53 = vadd.f32 1.0, %v2461_v63  ;;  %3306 = vmatprep.mubr.msk.f32.mxu1 %vm2572_vm12, %v2555_v45  ;;  %v3504_v58 = vpop.eup %3503  ;;  %v2558_v43 = vmul.f32 %v2526_v28, %v2494_v39  ;;  %v1791_v38 = vsel %vm1759_vm4, -1.0, %v5903_v10  ;;  %v2495_v35 = vmul.f32 0.5, %v5509_v22  ;;  %v5952_v59 = vld [vmem:[#allocation15_spill] sm:$0xff]  ;;  %v5955_v39 = vld [vmem:[#allocation20_spill] sm:$0xff] }
 0x229   : > { %v2143_v24 = vadd.f32 -0.28449672, %v2111_v37  ;;  %v2400_v14 = vmul.f32 %v3504_v58, %v2240_v20  ;;  %v5954_v58 = vld [vmem:[#allocation17_spill] sm:$0xff] }
 0x22a   : > { %v2557_v49 = vmul.f32 %v2525_v53, %v2493_v40  ;;  %v5953_v40 = vld [vmem:[#allocation18_spill] sm:$0xff] }
 0x22b   : > { %v2175_v62 = vmul.f32 %v3500_v5, %v2143_v24  ;;  %3307 = vmatmul.mubr.msk.f32.gmra.mrb[26].mxu1 %vm2572_vm12, %v2556_v36  ;;  %v2432_v27 = vsub.f32 1.0, %v2400_v14 }
 0x22c   : > { %3309 = vmatprep.mubr.msk.f32.mxu1 %vm2572_vm12, %v2557_v49 }
 0x22d   : > { %v2207_v52 = vadd.f32 0.2548296, %v2175_v62  ;;  %v2464_v7 = vmul.f32 %v2432_v27, %v1792_v44 }
 0x22e   : > { %v3506_v32 = vpop.eup %3505 }
 0x22f   : > { %v2239_v29 = vmul.f32 %v3500_v5, %v2207_v52  ;;  %3310 = vmatmul.mubr.msk.f32.gmra.mrb[28].mxu1 %vm2572_vm12, %v2558_v43  ;;  %v2528_v23 = vadd.f32 1.0, %v2464_v7  ;;  %v2496_v5 = vmul.f32 0.5, %v5476_v1  ;;  %v5946_v1 = vld [vmem:[#allocation9_spill] sm:$0xff]  ;;  %v5956_v43 = vld [vmem:[#allocation19_spill] sm:$0xff] }
 0x231   : > { %v2399_v42 = vmul.f32 %v3506_v32, %v2239_v29  ;;  %v2560_v33 = vmul.f32 %v2528_v23, %v2496_v5  ;;  %v5959_v5 = vld [vmem:[#allocation24_spill] sm:$0xff] }
 0x233   : > { %v2431_v26 = vsub.f32 1.0, %v2399_v42  ;;  %v5957_v42 = vld [vmem:[#allocation22_spill] sm:$0xff] }
 0x235   : > { %v2463_v13 = vmul.f32 %v2431_v26, %v1791_v38  ;;  %v5958_v26 = vld [vmem:[#allocation21_spill] sm:$0xff] }
 0x237   : > { %v2527_v61 = vadd.f32 1.0, %v2463_v13 }
 0x239   : > { %v2559_v25 = vmul.f32 %v2527_v61, %v2495_v35 }
 0x23b   : > { %3312 = vmatprep.mubr.msk.f32.mxu1 %vm2572_vm12, %v2559_v25 }
 0x23c   : > { %3313 = vmatmul.mubr.msk.f32.gmra.mrb[30].mxu1 %vm2572_vm12, %v2560_v33  ;;  %v5960_v33 = vld [vmem:[#allocation23_spill] sm:$0xff] }
 0x2ca   : > { %v3269_v10 = vpop.f32.mrb[0].mxu1 }
 0x2cb   : > { %v2741_v8 = vadd.f32 %v3269_v10, %v5630_v15  ;;  %v2735_v17 = vpop.f32.mrb[1].mxu1 }
 0x2cc   : > { %v2736_v22 = vadd.f32 %v5630_v15, %v2735_v17 }
 0x2cd   : > { %v2895_v54 = vadd.f32 %v2741_v8, %v5945_v56 }
 0x2ce   : > { %v2894_v19 = vadd.f32 %v2736_v22, %v5946_v1  ;;  %v3272_v21 = vpop.f32.mrb[2].mxu1 }
 0x2cf   : > { %2927 = vst.msk [vmem:[%s5638_s12 + $0x8] sm:$0xff] %vm297_vm0, %v2895_v54  ;;  %v2751_v41 = vadd.f32 %v3272_v21, %v5630_v15  ;;  %v2745_v4 = vpop.f32.mrb[3].mxu1  ;;  %v5961_v54 = vld [vmem:[#allocation26_spill] sm:$0xff] }
 0x2d0   : > { %2926 = vst.msk [vmem:[%s5638_s12] sm:$0xff] %vm297_vm0, %v2894_v19  ;;  %v2746_v3 = vadd.f32 %v5630_v15, %v2745_v4  ;;  %v5962_v19 = vld [vmem:[#allocation25_spill] sm:$0xff] }
 0x2d1   : > { %v2897_v12 = vadd.f32 %v2751_v41, %v5947_v9 }
 0x2d2   : > { %v2896_v0 = vadd.f32 %v2746_v3, %v5948_v57  ;;  %v3275_v6 = vpop.f32.mrb[4].mxu1 }
 0x2d3   : > { %2929 = vst.msk [vmem:[%s5638_s12 + $0x18] sm:$0xff] %vm297_vm0, %v2897_v12  ;;  %v2761_v2 = vadd.f32 %v3275_v6, %v5630_v15  ;;  %v2755_v47 = vpop.f32.mrb[5].mxu1  ;;  %v5963_v12 = vld [vmem:[#allocation28_spill] sm:$0xff] }
 0x2d4   : > { %2928 = vst.msk [vmem:[%s5638_s12 + $0x10] sm:$0xff] %vm297_vm0, %v2896_v0  ;;  %v2756_v60 = vadd.f32 %v5630_v15, %v2755_v47  ;;  %v5964_v0 = vld [vmem:[#allocation27_spill] sm:$0xff] }
 0x2d5   : > { %v2899_v46 = vadd.f32 %v2761_v2, %v5949_v50 }
 0x2d6   : > { %v2898_v30 = vadd.f32 %v2756_v60, %v5950_v31  ;;  %v3278_v45 = vpop.f32.mrb[6].mxu1 }
 0x2d7   : > { %2931 = vst.msk [vmem:[%s5638_s12 + $0x28] sm:$0xff] %vm297_vm0, %v2899_v46  ;;  %v2771_v16 = vadd.f32 %v3278_v45, %v5630_v15  ;;  %v2765_v55 = vpop.f32.mrb[7].mxu1  ;;  %v5965_v46 = vld [vmem:[#allocation30_spill] sm:$0xff] }
 0x2d8   : > { %2930 = vst.msk [vmem:[%s5638_s12 + $0x20] sm:$0xff] %vm297_vm0, %v2898_v30  ;;  %v2766_v11 = vadd.f32 %v5630_v15, %v2765_v55  ;;  %v5966_v30 = vld [vmem:[#allocation29_spill] sm:$0xff] }
 0x2d9   : > { %v2901_v34 = vadd.f32 %v2771_v16, %v5951_v51 }
 0x2da   : > { %v2900_v63 = vadd.f32 %v2766_v11, %v5952_v59  ;;  %v3281_v18 = vpop.f32.mrb[8].mxu1 }
 0x2db   : > { %2933 = vst.msk [vmem:[%s5638_s12 + $0x38] sm:$0xff] %vm297_vm0, %v2901_v34  ;;  %v2781_v48 = vadd.f32 %v3281_v18, %v5630_v15  ;;  %v2775_v20 = vpop.f32.mrb[9].mxu1  ;;  %v5967_v34 = vld [vmem:[#allocation32_spill] sm:$0xff] }
 0x2dc   : > { %2932 = vst.msk [vmem:[%s5638_s12 + $0x30] sm:$0xff] %vm297_vm0, %v2900_v63  ;;  %v2776_v37 = vadd.f32 %v5630_v15, %v2775_v20  ;;  %v5968_v63 = vld [vmem:[#allocation31_spill] sm:$0xff] }
 0x2dd   : > { %v2903_v53 = vadd.f32 %v2781_v48, %v5953_v40 }
 0x2de   : > { %v2902_v36 = vadd.f32 %v2776_v37, %v5954_v58  ;;  %v3284_v28 = vpop.f32.mrb[10].mxu1 }
 0x2df   : > { %2935 = vst.msk [vmem:[%s5638_s12 + $0x48] sm:$0xff] %vm297_vm0, %v2903_v53  ;;  %v2791_v24 = vadd.f32 %v3284_v28, %v5630_v15  ;;  %v2785_v49 = vpop.f32.mrb[11].mxu1  ;;  %v5969_v53 = vld [vmem:[#allocation34_spill] sm:$0xff] }
 0x2e0   : > { %2934 = vst.msk [vmem:[%s5638_s12 + $0x40] sm:$0xff] %vm297_vm0, %v2902_v36  ;;  %v2786_v14 = vadd.f32 %v5630_v15, %v2785_v49  ;;  %v5970_v36 = vld [vmem:[#allocation33_spill] sm:$0xff] }
 0x2e1   : > { %v2905_v62 = vadd.f32 %v2791_v24, %v5955_v39 }
 0x2e2   : > { %v2904_v52 = vadd.f32 %v2786_v14, %v5956_v43  ;;  %v3287_v27 = vpop.f32.mrb[12].mxu1 }
 0x2e3   : > { %2937 = vst.msk [vmem:[%s5638_s12 + $0x58] sm:$0xff] %vm297_vm0, %v2905_v62  ;;  %v2801_v29 = vadd.f32 %v3287_v27, %v5630_v15  ;;  %v2795_v32 = vpop.f32.mrb[13].mxu1  ;;  %v5971_v62 = vld [vmem:[#allocation36_spill] sm:$0xff] }
 0x2e4   : > { %2936 = vst.msk [vmem:[%s5638_s12 + $0x50] sm:$0xff] %vm297_vm0, %v2904_v52  ;;  %v2796_v44 = vadd.f32 %v5630_v15, %v2795_v32  ;;  %v5972_v52 = vld [vmem:[#allocation35_spill] sm:$0xff] }
 0x2e5   : > { %v2907_v7 = vadd.f32 %v2801_v29, %v5957_v42 }
 0x2e6   : > { %v2906_v38 = vadd.f32 %v2796_v44, %v5958_v26  ;;  %v3290_v13 = vpop.f32.mrb[14].mxu1 }
 0x2e7   : > { %2939 = vst.msk [vmem:[%s5638_s12 + $0x68] sm:$0xff] %vm297_vm0, %v2907_v7  ;;  %v2811_v23 = vadd.f32 %v3290_v13, %v5630_v15  ;;  %v2805_v35 = vpop.f32.mrb[15].mxu1  ;;  %v5973_v7 = vld [vmem:[#allocation38_spill] sm:$0xff] }
 0x2e8   : > { %2938 = vst.msk [vmem:[%s5638_s12 + $0x60] sm:$0xff] %vm297_vm0, %v2906_v38  ;;  %v2806_v61 = vadd.f32 %v5630_v15, %v2805_v35  ;;  %v5974_v38 = vld [vmem:[#allocation37_spill] sm:$0xff] }
 0x2e9   : > { %v2909_v25 = vadd.f32 %v2811_v23, %v5959_v5 }
 0x2ea   : > { %v2908_v10 = vadd.f32 %v2806_v61, %v5960_v33  ;;  %v3293_v8 = vpop.f32.mrb[16].mxu1 }
 0x2eb   : > { %2941 = vst.msk [vmem:[%s5638_s12 + $0x78] sm:$0xff] %vm297_vm0, %v2909_v25  ;;  %v2821_v17 = vadd.f32 %v3293_v8, %v5630_v15  ;;  %v2815_v22 = vpop.f32.mrb[17].mxu1  ;;  %v5975_v25 = vld [vmem:[#allocation40_spill] sm:$0xff] }
 0x2ec   : > { %2940 = vst.msk [vmem:[%s5638_s12 + $0x70] sm:$0xff] %vm297_vm0, %v2908_v10  ;;  %v2816_v56 = vadd.f32 %v5630_v15, %v2815_v22  ;;  %v5976_v10 = vld [vmem:[#allocation39_spill] sm:$0xff] }
 0x2ed   : > { %v2911_v1 = vadd.f32 %v2821_v17, %v5961_v54 }
 0x2ee   : > { %v2910_v21 = vadd.f32 %v2816_v56, %v5962_v19  ;;  %v3296_v41 = vpop.f32.mrb[18].mxu1 }
 0x2ef   : > { %2943 = vst.msk [vmem:[%s5638_s12 + $0x88] sm:$0xff] %vm297_vm0, %v2911_v1  ;;  %v2831_v4 = vadd.f32 %v3296_v41, %v5630_v15  ;;  %v2825_v3 = vpop.f32.mrb[19].mxu1 }
 0x2f0   : > { %2942 = vst.msk [vmem:[%s5638_s12 + $0x80] sm:$0xff] %vm297_vm0, %v2910_v21  ;;  %v2826_v9 = vadd.f32 %v5630_v15, %v2825_v3 }
 0x2f1   : > { %v2913_v57 = vadd.f32 %v2831_v4, %v5963_v12 }
 0x2f2   : > { %v2912_v6 = vadd.f32 %v2826_v9, %v5964_v0  ;;  %v3299_v2 = vpop.f32.mrb[20].mxu1 }
 0x2f3   : > { %2945 = vst.msk [vmem:[%s5638_s12 + $0x98] sm:$0xff] %vm297_vm0, %v2913_v57  ;;  %v2841_v47 = vadd.f32 %v3299_v2, %v5630_v15  ;;  %v2835_v60 = vpop.f32.mrb[21].mxu1 }
 0x2f4   : > { %2944 = vst.msk [vmem:[%s5638_s12 + $0x90] sm:$0xff] %vm297_vm0, %v2912_v6  ;;  %v2836_v50 = vadd.f32 %v5630_v15, %v2835_v60 }
 0x2f5   : > { %v2915_v31 = vadd.f32 %v2841_v47, %v5965_v46 }
 0x2f6   : > { %v2914_v45 = vadd.f32 %v2836_v50, %v5966_v30  ;;  %v3302_v16 = vpop.f32.mrb[22].mxu1 }
 0x2f7   : > { %2947 = vst.msk [vmem:[%s5638_s12 + $0xa8] sm:$0xff] %vm297_vm0, %v2915_v31  ;;  %v2851_v55 = vadd.f32 %v3302_v16, %v5630_v15  ;;  %v2845_v11 = vpop.f32.mrb[23].mxu1 }
 0x2f8   : > { %2946 = vst.msk [vmem:[%s5638_s12 + $0xa0] sm:$0xff] %vm297_vm0, %v2914_v45  ;;  %v2846_v51 = vadd.f32 %v5630_v15, %v2845_v11 }
 0x2f9   : > { %v2917_v59 = vadd.f32 %v2851_v55, %v5967_v34 }
 0x2fa   : > { %v2916_v18 = vadd.f32 %v2846_v51, %v5968_v63  ;;  %v3305_v48 = vpop.f32.mrb[24].mxu1 }
 0x2fb   : > { %2949 = vst.msk [vmem:[%s5638_s12 + $0xb8] sm:$0xff] %vm297_vm0, %v2917_v59  ;;  %v2861_v20 = vadd.f32 %v3305_v48, %v5630_v15  ;;  %v2855_v37 = vpop.f32.mrb[25].mxu1 }
 0x2fc   : > { %2948 = vst.msk [vmem:[%s5638_s12 + $0xb0] sm:$0xff] %vm297_vm0, %v2916_v18  ;;  %v2856_v40 = vadd.f32 %v5630_v15, %v2855_v37 }
 0x2fd   : > { %v2919_v58 = vadd.f32 %v2861_v20, %v5969_v53 }
 0x2fe   : > { %v2918_v28 = vadd.f32 %v2856_v40, %v5970_v36  ;;  %v3308_v24 = vpop.f32.mrb[26].mxu1 }
 0x2ff   : > { %2951 = vst.msk [vmem:[%s5638_s12 + $0xc8] sm:$0xff] %vm297_vm0, %v2919_v58  ;;  %v2871_v49 = vadd.f32 %v3308_v24, %v5630_v15  ;;  %v2865_v14 = vpop.f32.mrb[27].mxu1 }
 0x300   : > { %2950 = vst.msk [vmem:[%s5638_s12 + $0xc0] sm:$0xff] %vm297_vm0, %v2918_v28  ;;  %v2866_v39 = vadd.f32 %v5630_v15, %v2865_v14 }
 0x301   : > { %v2921_v43 = vadd.f32 %v2871_v49, %v5971_v62 }
 0x302   : > { %v2920_v27 = vadd.f32 %v2866_v39, %v5972_v52  ;;  %v3311_v29 = vpop.f32.mrb[28].mxu1 }
 0x303   : > { %2953 = vst.msk [vmem:[%s5638_s12 + $0xd8] sm:$0xff] %vm297_vm0, %v2921_v43  ;;  %v2881_v32 = vadd.f32 %v3311_v29, %v5630_v15  ;;  %v2875_v44 = vpop.f32.mrb[29].mxu1 }
 0x304   : > { %2952 = vst.msk [vmem:[%s5638_s12 + $0xd0] sm:$0xff] %vm297_vm0, %v2920_v27  ;;  %v2876_v42 = vadd.f32 %v5630_v15, %v2875_v44 }
 0x305   : > { %v2923_v26 = vadd.f32 %v2881_v32, %v5973_v7 }
 0x306   : > { %v2922_v13 = vadd.f32 %v2876_v42, %v5974_v38 }
 0x307   : > { %2955 = vst.msk [vmem:[%s5638_s12 + $0xe8] sm:$0xff] %vm297_vm0, %v2923_v26 }
 0x308   : > { %2954 = vst.msk [vmem:[%s5638_s12 + $0xe0] sm:$0xff] %vm297_vm0, %v2922_v13 }
 0x30f   : > { %v3314_v23 = vpop.f32.mrb[30].mxu1 }
 0x310   : > { %v2891_v35 = vadd.f32 %v3314_v23, %v5630_v15  ;;  %v2885_v61 = vpop.f32.mrb[31].mxu1 }
 0x311   : > { %v2886_v5 = vadd.f32 %v5630_v15, %v2885_v61 }
 0x312   : > { %v2925_v33 = vadd.f32 %v2891_v35, %v5975_v25 }
 0x313   : > { %v2924_v8 = vadd.f32 %v2886_v5, %v5976_v10 }
 0x314   : > { %2957 = vst.msk [vmem:[%s5638_s12 + $0xf8] sm:$0xff] %vm297_vm0, %v2925_v33 }
 0x315   : > { %2956 = vst.msk [vmem:[%s5638_s12 + $0xf0] sm:$0xff] %vm297_vm0, %v2924_v8 }
 0x316   : > { %3561 = shalt.err (!%p3558_p2)
}
 0x317   : > { %s3562_s8 = scalar_lea.hbm %s5764_s23, 4096  ;;  %s3566_s12 = scalar_lea.hbm %s5822_s7, 8192 }
 0x318   : > { %p3563_p4 = scmp.ne.s32.totalorder %s5764_s23, %s3562_s8  ;;  %p3567_p9 = scmp.lt.u32.totalorder %s5764_s23, %s5822_s7 }
 0x319   : > { %p3568_p1 = scmp.lt.u32.totalorder %s3566_s12, %s3562_s8  ;;  %p3570_p6 = scmp.lt.u32.totalorder %s3562_s8, %s5764_s23 }
 0x31a   : > { %p3564_p5 = pnand %p3563_p4, %p5977_p11 }
 0x31b   : > { %p3569_p3 = por %p3568_p1, %p3567_p9 }
 0x31c   : > { %p3565_p7 = pneg %p3564_p5 }
 0x31d   : > { %p3571_p12 = por %p3570_p6, %p3569_p3 }
 0x31f   : > { %p3572_p13 = pnand %p3571_p12, %p3565_p7 }
 0x321   : > { %3575 = shalt.err (!%p3572_p13)
}
 0x322   : > { %s3622_s22 = smov 128   ;;  %s3623_s29 = smov 8  }
 0x323   : > { %3329 = dma.vmem_to_hbm [thread:$0]  (%p5977_p11), %s5766_s20, 4096, %s5764_s23, %s2959_s28, %s3622_s22, %s3622_s22, %s3623_s29  }
 0x324 PF: > { %s2987_s19 = sand.u32 1, %s3602_s24   ;;  %p5978_p8 = scmp.ne.s32.totalorder %s5866_s14, 0 }
 0x325   : > { %p5979_p10 = scmp.ge.s32.totalorder %s3614_s27, 2  ;;  %s2988_s21 = scalar_lea.sflag [#allocation5], %s2987_s19 }
 0x327   : > { %p3336_p0 = pnand %p5979_p10, %p5978_p8 }
 0x329   : > { %3597 = dma.done.wait (!%p3336_p0), %s2988_s21, 4096  }
 0x32a   : > { %3599 = vsyncadd (!%p3336_p0), %s2988_s21, 4294963200  ;;  %p20_p2 = scmp.ge.s32.totalorder %s3689_s30, 4   ;;  %s5980_s24 = smov %s3606_s25 }
 0x32b   : > { %s5981_s25 = smov %s3610_s26  ;;  %s5982_s26 = smov %s3701_s10 }
 0x32c   : > { %s5983_s27 = smov %s3689_s30  ;;  %22 = sbr.rel (!%p20_p2) target bundleno = 5 (0x5), region = 95 }
 0x333   :  { %2993 = vsyncpa [#allocation4], 1 }
 0x334   :  { %2995 = vsyncpa [#allocation4 + $0x1], 1 }
 0x335   :  { %2996 = vsyncpa [#allocation5], 1 }
 0x336   :  { %2998 = vsyncpa [#allocation5 + $0x1], 1 }

</bundles_post_ra>
